<compile_context>
chip_gen: v7x
topology: tpu7x:2x2x1
jax: 0.10.0
libtpu: 0.0.40
codegen_flags: <defaults>
</compile_context>

<pallas_src>
import functools

import jax
import jax.numpy as jnp
from jax.experimental import pallas as pl
from jax.experimental.pallas import tpu as pltpu


def _round_up(x, m):
    return ((x + m - 1) // m) * m


# -----------------------------------------------------------------------------
# Device heuristics (tile split / bf16-VPU gating)
# -----------------------------------------------------------------------------
def _device_kind():
    try:
        return jax.devices()[0].device_kind.lower()
    except Exception:
        return ""


def _num_parallel_cores(kind):
    # 2 TensorCores reachable via dimension_semantics=("parallel",):
    # v4 / v5p megacore and v7x.  v5e / v6e are single-core per chip.
    return 2 if any(t in kind for t in ("v7", "7x", "v4", "v5p")) else 1


def _use_bf16_act(kind):
    # v5e has no bf16 VALU -> keep elementwise work in f32 there; everywhere
    # else a packed-bf16 relu/leaky halves the VPU activation cost.
    return not any(t in kind for t in ("v5e", "v5 lite", "v5lite"))


def _choose_tn(n, tn_req, n_cores):
    """Lane-aligned (multiple of 128) points tile.

    Biggest tile that fits the request / point count; only split into >= n_cores
    grid tiles on parts that actually have multiple TensorCores.
    """
    n_lane = _round_up(max(int(n), 1), 128)
    tn = max(128, (min(int(tn_req), 2048) // 128) * 128)
    tn = min(tn, n_lane)
    if n_cores > 1 and n_lane // 128 >= n_cores:
        per_core = _round_up(pl.cdiv(n_lane, n_cores), 128)
        tn = min(tn, per_core)
    return tn


# -----------------------------------------------------------------------------
# Pallas kernel: fused (fc_p + all fc_c, bias folded) + n_blocks * ResnetBlockFC
#                + fc_out, all in feature-major layout.
# -----------------------------------------------------------------------------
def decoder_kernel(pc_ref, wall_ref, w0_ref, b0_ref, w1_ref, b1_ref,
                   wout_ref, bout_ref, out_ref, *, n_blocks, hidden,
                   output_normalize, leaky, bf16_act):
    H = hidden
    bf16 = jnp.bfloat16

    def actvn(x):
        return jax.nn.leaky_relu(x, 0.2) if leaky else jnp.maximum(x, 0)

    def act_cast(x):  # f32 accumulator -> bf16 operand for the next MXU dot
        if bf16_act:  # v6e/v7x: relu/leaky on packed bf16 vregs (2 elem/lane)
            return actvn(x.astype(bf16))
        return actvn(x).astype(bf16)  # v5e: keep VALU work in f32, cast after

    pc = pc_ref[...].astype(bf16)  # (PCp, tn); includes the constant-1 bias row

    # Fused projection: rows [0:H) = fc_p(p)+bp, rows [(i+1)H:(i+2)H) =
    # fc_c[i](c)+bc[i].  Biases folded in through the ones row of pc.
    proj = jnp.dot(wall_ref[...], pc, preferred_element_type=jnp.float32)

    net = proj[0:H, :]  # (H, tn) f32
    for i in range(n_blocks):  # small static unroll
        net = net + proj[(i + 1) * H:(i + 2) * H, :]
        # ResnetBlockFC (size_in == size_out -> identity shortcut):
        #   h = fc_0(actvn(net)); dx = fc_1(actvn(h)); net = net + dx
        h = jnp.dot(w0_ref[i], act_cast(net),
                    preferred_element_type=jnp.float32) + b0_ref[i]
        dx = jnp.dot(w1_ref[i], act_cast(h),
                     preferred_element_type=jnp.float32) + b1_ref[i]
        net = net + dx

    out = jnp.dot(wout_ref[...], act_cast(net),
                  preferred_element_type=jnp.float32) + bout_ref[...]
    if output_normalize:
        out = jax.nn.sigmoid(out)
    out_ref[...] = out.astype(out_ref.dtype)


# -----------------------------------------------------------------------------
# One-time weight preparation (hoisted out of the per-call hot path)
# -----------------------------------------------------------------------------
def prepare_params(params, *, p_dim, c_dim, n_blocks):
    H = params["wp"].shape[1]
    O = params["wout"].shape[1]
    PC = p_dim + c_dim
    PCp = _round_up(PC + 1, 128)   # +1 row reserved for the bias fold
    ones_row = PC

    # Fused projection weight: (6H, PCp), feature-major, with biases written
    # into the column that multiplies the constant-1 input row.
    wf = jnp.zeros(((n_blocks + 1) * H, PCp), jnp.float32)
    wf = wf.at[0:H, 0:p_dim].set(params["wp"].T)
    wf = wf.at[0:H, ones_row].set(params["bp"][0])
    for i in range(n_blocks):
        r0, r1 = (i + 1) * H, (i + 2) * H
        wf = wf.at[r0:r1, p_dim:PC].set(params["wc"][i].T)
        wf = wf.at[r0:r1, ones_row].set(params["bc"][i, 0])

    prep = {
        "w_all": wf.astype(jnp.bfloat16),                                   # (6H, PCp)
        "w0": jnp.transpose(params["w0"], (0, 2, 1)).astype(jnp.bfloat16),  # (nb, H, H)
        "b0": jnp.transpose(params["b0"], (0, 2, 1)),                       # (nb, H, 1) f32
        "w1": jnp.transpose(params["w1"], (0, 2, 1)).astype(jnp.bfloat16),
        "b1": jnp.transpose(params["b1"], (0, 2, 1)),
        "wout": params["wout"].T.astype(jnp.bfloat16),                      # (O, H)
        "bout": params["bout"].T,                                           # (O, 1) f32
    }
    meta = dict(H=H, O=O, PC=PC, PCp=PCp, ones_row=ones_row)
    return prep, meta


# -----------------------------------------------------------------------------
# Hot-path wrapper
# -----------------------------------------------------------------------------
def multiscale_decoder_pallas(p, c, prep, meta, *, n_blocks,
                              output_normalize=False, leaky=False, tn=1024):
    N = p.shape[0]
    H, O, PC, PCp = meta["H"], meta["O"], meta["PC"], meta["PCp"]
    assert p.shape[1] + c.shape[1] == PC

    kind = _device_kind()
    tn = _choose_tn(N, tn, _num_parallel_cores(kind))
    Np = pl.cdiv(N, tn) * tn

    # Feature-major input (PCp, Np): [p^T ; c^T ; ones (bias row) ; zero pad],
    # zero-padded along points to a whole number of lane tiles.  Kept f32: the
    # kernel is heavily compute-bound, so full input precision costs nothing.
    pcT = jnp.concatenate([p.T, c.T], axis=0).astype(jnp.float32)   # (PC, N)
    pcT = jnp.concatenate(
        [pcT,
         jnp.ones((1, N), jnp.float32),
         jnp.zeros((PCp - PC - 1, N), jnp.float32)], axis=0)        # (PCp, N)
    pcT = jnp.pad(pcT, ((0, 0), (0, Np - N)))                        # (PCp, Np)

    def full(shape):
        nd = len(shape)
        return pl.BlockSpec(shape, lambda i, nd=nd: (0,) * nd)

    kernel = functools.partial(
        decoder_kernel, n_blocks=n_blocks, hidden=H,
        output_normalize=output_normalize, leaky=leaky,
        bf16_act=_use_bf16_act(kind))

    weight_bytes = sum(int(v.size) * v.dtype.itemsize for v in prep.values())
    cost = pl.CostEstimate(
        flops=2 * Np * (PCp * (n_blocks + 1) * H + 2 * n_blocks * H * H + H * O),
        transcendentals=Np * O if output_normalize else 0,
        bytes_accessed=int(pcT.size) * 4 + weight_bytes + Np * O * 4)

    out = pl.pallas_call(
        kernel,
        out_shape=jax.ShapeDtypeStruct((O, Np), jnp.float32),
        grid_spec=pltpu.PrefetchScalarGridSpec(
            num_scalar_prefetch=0,
            grid=(Np // tn,),
            in_specs=[
                pl.BlockSpec((PCp, tn), lambda i: (0, i)),          # [p;c;1] tile
                full(((n_blocks + 1) * H, PCp)),                    # fused W (+bias col)
                full((n_blocks, H, H)), full((n_blocks, H, 1)),     # fc_0 W, b
                full((n_blocks, H, H)), full((n_blocks, H, 1)),     # fc_1 W, b
                full((O, H)), full((O, 1)),                         # fc_out W, b
            ],
            out_specs=pl.BlockSpec((O, tn), lambda i: (0, i)),
        ),
        compiler_params=pltpu.CompilerParams(
            dimension_semantics=("parallel",)),
        cost_estimate=cost,
    )(pcT, prep["w_all"], prep["w0"], prep["b0"], prep["w1"], prep["b1"],
      prep["wout"], prep["bout"])

    return out[:, :N].T   # back to points-major (N, O)


# -----------------------------------------------------------------------------
# Plain-JAX glue mimicking HashTree preprocessing + f32 reference model
# -----------------------------------------------------------------------------
def build_p_and_c(xyz, voxel_size, multiscale_feat, split_indices, multiscale_depths):
    # TODO(synk): HashTree.get_stride / HashTree.split_data are data-structure
    # lookups; simulated here with stride = 2**did and a precomputed per-depth
    # index gather, matching the shapes/semantics of the concatenation.
    p_feats = []
    for did in range(multiscale_depths):
        vs = float(2 ** did) * voxel_size
        p_feats.append(jnp.mod(xyz, vs) / vs)
    p = jnp.concatenate(p_feats, axis=1)

    c_feats = [multiscale_feat[did][split_indices[did]]
               for did in range(multiscale_depths)]
    c = jnp.concatenate(c_feats, axis=1)
    return p, c


def reference_decoder(p, c, params, *, n_blocks, output_normalize, leaky):
    act = (lambda x: jax.nn.leaky_relu(x, 0.2)) if leaky else jax.nn.relu
    net = p @ params["wp"] + params["bp"]
    for i in range(n_blocks):
        net = net + c @ params["wc"][i] + params["bc"][i]
        h = act(net) @ params["w0"][i] + params["b0"][i]
        dx = act(h) @ params["w1"][i] + params["b1"][i]
        net = net + dx
    out = act(net) @ params["wout"] + params["bout"]
    if output_normalize:
        out = jax.nn.sigmoid(out)
    return out


def init_params(key, p_dim, c_dim, hidden, out_dim, n_blocks):
    ks = jax.random.split(key, 6)

    def lin(k, fan_in, shape):
        return jax.random.normal(k, shape, jnp.float32) / jnp.sqrt(float(fan_in))

    return {
        "wp": lin(ks[0], p_dim, (p_dim, hidden)),
        "bp": jnp.zeros((1, hidden), jnp.float32),
        "wc": lin(ks[1], c_dim, (n_blocks, c_dim, hidden)),
        "bc": jnp.zeros((n_blocks, 1, hidden), jnp.float32),
        "w0": lin(ks[2], hidden, (n_blocks, hidden, hidden)),
        "b0": jnp.zeros((n_blocks, 1, hidden), jnp.float32),
        "w1": lin(ks[3], hidden, (n_blocks, hidden, hidden)),
        "b1": jnp.zeros((n_blocks, 1, hidden), jnp.float32),
        "wout": lin(ks[4], hidden, (hidden, out_dim)),
        "bout": jnp.zeros((1, out_dim), jnp.float32),
    }


if __name__ == "__main__":
    # Small, module-consistent config (ragged N to exercise the padding path).
    N = 250                     # number of hash-tree points (not a tile multiple)
    multiscale_depths = 3
    per_depth_c = 32
    c_dim = per_depth_c * multiscale_depths   # 96 (fc_c input dim)
    p_dim = 3 * multiscale_depths             # 9  (fc_p input dim after concat)
    hidden = 128
    n_blocks = 5
    out_dim = 3
    output_normalize = True
    leaky = False
    voxel_size = 0.1

    key = jax.random.PRNGKey(0)
    k_xyz, k_feat, k_idx, k_par = jax.random.split(key, 4)

    xyz = jax.random.uniform(k_xyz, (N, 3), jnp.float32, minval=-1.0, maxval=1.0)

    feat_keys = jax.random.split(k_feat, multiscale_depths)
    idx_keys = jax.random.split(k_idx, multiscale_depths)
    multiscale_feat, split_indices = [], []
    for did in range(multiscale_depths):
        n_vox = max(8, 32 >> did)
        multiscale_feat.append(
            jax.random.normal(feat_keys[did], (n_vox, per_depth_c), jnp.float32))
        split_indices.append(
            jax.random.randint(idx_keys[did], (N,), 0, n_vox))

    params = init_params(k_par, p_dim, c_dim, hidden, out_dim, n_blocks)

    # Glue (HashTree-style preprocessing) in plain JAX.
    p, c = build_p_and_c(xyz, voxel_size, multiscale_feat, split_indices,
                         multiscale_depths)

    # One-time kernel-ready weight preparation (out of the hot path).
    prep, meta = prepare_params(params, p_dim=p_dim, c_dim=c_dim,
                                n_blocks=n_blocks)

    # Hot path (fused projection + residual blocks + head) in the Pallas kernel.
    out = multiscale_decoder_pallas(p, c, prep, meta, n_blocks=n_blocks,
                                    output_normalize=output_normalize,
                                    leaky=leaky, tn=1024)
    out = jax.block_until_ready(out)

    ref = reference_decoder(p, c, params, n_blocks=n_blocks,
                            output_normalize=output_normalize, leaky=leaky)
    assert out.shape == (N, out_dim)
    # bf16 matmul operands / folded biases (f32 accumulation) vs f32 reference.
    assert jnp.allclose(out, ref, rtol=5e-2, atol=5e-2), "mismatch vs JAX reference"

    print("KERNEL_OK")
</pallas_src>

<mosaic_0001>
module attributes {stable_mosaic.version = 11 : i64} {
  func.func @decoder_kernel(%arg0: i32, %arg1: memref<128x256xf32, #tpu.memory_space<vmem>>, %arg2: memref<768x128xbf16, #tpu.memory_space<vmem>>, %arg3: memref<5x128x128xbf16, #tpu.memory_space<vmem>>, %arg4: memref<5x128x1xf32, #tpu.memory_space<vmem>>, %arg5: memref<5x128x128xbf16, #tpu.memory_space<vmem>>, %arg6: memref<5x128x1xf32, #tpu.memory_space<vmem>>, %arg7: memref<3x128xbf16, #tpu.memory_space<vmem>>, %arg8: memref<3x1xf32, #tpu.memory_space<vmem>>, %arg9: memref<3x256xf32, #tpu.memory_space<vmem>>) attributes {dimension_semantics = [#tpu.dimension_semantics<parallel>], iteration_bounds = array<i64: 1>, scalar_prefetch = 0 : i64, scratch_operands = 0 : i64, tpu.core_type = #tpu.core_type<tc>, window_params = [{transform_indices = @transform_0, window_bounds = array<i64: 128, 256>}, {pipeline_mode = #tpu.pipeline_mode<synchronous>, transform_indices = @transform_1, window_bounds = array<i64: 768, 128>}, {pipeline_mode = #tpu.pipeline_mode<synchronous>, transform_indices = @transform_2, window_bounds = array<i64: 5, 128, 128>}, {pipeline_mode = #tpu.pipeline_mode<synchronous>, transform_indices = @transform_3, window_bounds = array<i64: 5, 128, 1>}, {pipeline_mode = #tpu.pipeline_mode<synchronous>, transform_indices = @transform_4, window_bounds = array<i64: 5, 128, 128>}, {pipeline_mode = #tpu.pipeline_mode<synchronous>, transform_indices = @transform_5, window_bounds = array<i64: 5, 128, 1>}, {pipeline_mode = #tpu.pipeline_mode<synchronous>, transform_indices = @transform_6, window_bounds = array<i64: 3, 128>}, {pipeline_mode = #tpu.pipeline_mode<synchronous>, transform_indices = @transform_7, window_bounds = array<i64: 3, 1>}, {transform_indices = @transform_8, window_bounds = array<i64: 3, 256>}]} {
    %c0 = arith.constant 0 : index
    %c0_0 = arith.constant 0 : index
    %0 = vector.load %arg1[%c0, %c0_0] : memref<128x256xf32, #tpu.memory_space<vmem>>, vector<128x256xf32>
    %1 = arith.truncf %0 : vector<128x256xf32> to vector<128x256xbf16>
    %c0_1 = arith.constant 0 : index
    %c0_2 = arith.constant 0 : index
    %2 = vector.load %arg2[%c0_1, %c0_2] : memref<768x128xbf16, #tpu.memory_space<vmem>>, vector<768x128xbf16>
    %cst = arith.constant dense<0.000000e+00> : vector<768x256xf32>
    %3 = tpu.matmul %2, %1, %cst {dimension_numbers = #tpu.dot_dimension_numbers<[1], [0], [0], [1], [0, 0, 1, 1], [], []>} : vector<768x128xbf16>, vector<128x256xbf16>, vector<768x256xf32> -> vector<768x256xf32>
    %4 = vector.extract_strided_slice %3 {offsets = [0, 0], sizes = [128, 256], strides = [1, 1]} : vector<768x256xf32> to vector<128x256xf32>
    %5 = vector.extract_strided_slice %3 {offsets = [128, 0], sizes = [128, 256], strides = [1, 1]} : vector<768x256xf32> to vector<128x256xf32>
    %6 = arith.addf %4, %5 : vector<128x256xf32>
    %c0_3 = arith.constant 0 : index
    %c0_4 = arith.constant 0 : index
    %c0_5 = arith.constant 0 : index
    %7 = vector.load %arg3[%c0_3, %c0_4, %c0_5] : memref<5x128x128xbf16, #tpu.memory_space<vmem>>, vector<1x128x128xbf16>
    %8 = vector.shape_cast %7 : vector<1x128x128xbf16> to vector<128x128xbf16>
    %9 = arith.truncf %6 : vector<128x256xf32> to vector<128x256xbf16>
    %cst_6 = arith.constant 0.000000e+00 : bf16
    %10 = vector.broadcast %cst_6 : bf16 to vector<128x256xbf16>
    %11 = arith.maximumf %9, %10 : vector<128x256xbf16>
    %cst_7 = arith.constant dense<0.000000e+00> : vector<128x256xf32>
    %12 = tpu.matmul %8, %11, %cst_7 {dimension_numbers = #tpu.dot_dimension_numbers<[1], [0], [0], [1], [0, 0, 1, 1], [], []>} : vector<128x128xbf16>, vector<128x256xbf16>, vector<128x256xf32> -> vector<128x256xf32>
    %c0_8 = arith.constant 0 : index
    %c0_9 = arith.constant 0 : index
    %c0_10 = arith.constant 0 : index
    %13 = vector.load %arg4[%c0_8, %c0_9, %c0_10] : memref<5x128x1xf32, #tpu.memory_space<vmem>>, vector<1x128x1xf32>
    %14 = vector.shape_cast %13 : vector<1x128x1xf32> to vector<128x1xf32>
    %15 = vector.broadcast %14 : vector<128x1xf32> to vector<128x256xf32>
    %16 = arith.addf %12, %15 : vector<128x256xf32>
    %c0_11 = arith.constant 0 : index
    %c0_12 = arith.constant 0 : index
    %c0_13 = arith.constant 0 : index
    %17 = vector.load %arg5[%c0_11, %c0_12, %c0_13] : memref<5x128x128xbf16, #tpu.memory_space<vmem>>, vector<1x128x128xbf16>
    %18 = vector.shape_cast %17 : vector<1x128x128xbf16> to vector<128x128xbf16>
    %19 = arith.truncf %16 : vector<128x256xf32> to vector<128x256xbf16>
    %cst_14 = arith.constant 0.000000e+00 : bf16
    %20 = vector.broadcast %cst_14 : bf16 to vector<128x256xbf16>
    %21 = arith.maximumf %19, %20 : vector<128x256xbf16>
    %cst_15 = arith.constant dense<0.000000e+00> : vector<128x256xf32>
    %22 = tpu.matmul %18, %21, %cst_15 {dimension_numbers = #tpu.dot_dimension_numbers<[1], [0], [0], [1], [0, 0, 1, 1], [], []>} : vector<128x128xbf16>, vector<128x256xbf16>, vector<128x256xf32> -> vector<128x256xf32>
    %c0_16 = arith.constant 0 : index
    %c0_17 = arith.constant 0 : index
    %c0_18 = arith.constant 0 : index
    %23 = vector.load %arg6[%c0_16, %c0_17, %c0_18] : memref<5x128x1xf32, #tpu.memory_space<vmem>>, vector<1x128x1xf32>
    %24 = vector.shape_cast %23 : vector<1x128x1xf32> to vector<128x1xf32>
    %25 = vector.broadcast %24 : vector<128x1xf32> to vector<128x256xf32>
    %26 = arith.addf %22, %25 : vector<128x256xf32>
    %27 = arith.addf %6, %26 : vector<128x256xf32>
    %28 = vector.extract_strided_slice %3 {offsets = [256, 0], sizes = [128, 256], strides = [1, 1]} : vector<768x256xf32> to vector<128x256xf32>
    %29 = arith.addf %27, %28 : vector<128x256xf32>
    %c1 = arith.constant 1 : index
    %c0_19 = arith.constant 0 : index
    %c0_20 = arith.constant 0 : index
    %30 = vector.load %arg3[%c1, %c0_19, %c0_20] : memref<5x128x128xbf16, #tpu.memory_space<vmem>>, vector<1x128x128xbf16>
    %31 = vector.shape_cast %30 : vector<1x128x128xbf16> to vector<128x128xbf16>
    %32 = arith.truncf %29 : vector<128x256xf32> to vector<128x256xbf16>
    %cst_21 = arith.constant 0.000000e+00 : bf16
    %33 = vector.broadcast %cst_21 : bf16 to vector<128x256xbf16>
    %34 = arith.maximumf %32, %33 : vector<128x256xbf16>
    %cst_22 = arith.constant dense<0.000000e+00> : vector<128x256xf32>
    %35 = tpu.matmul %31, %34, %cst_22 {dimension_numbers = #tpu.dot_dimension_numbers<[1], [0], [0], [1], [0, 0, 1, 1], [], []>} : vector<128x128xbf16>, vector<128x256xbf16>, vector<128x256xf32> -> vector<128x256xf32>
    %c1_23 = arith.constant 1 : index
    %c0_24 = arith.constant 0 : index
    %c0_25 = arith.constant 0 : index
    %36 = vector.load %arg4[%c1_23, %c0_24, %c0_25] : memref<5x128x1xf32, #tpu.memory_space<vmem>>, vector<1x128x1xf32>
    %37 = vector.shape_cast %36 : vector<1x128x1xf32> to vector<128x1xf32>
    %38 = vector.broadcast %37 : vector<128x1xf32> to vector<128x256xf32>
    %39 = arith.addf %35, %38 : vector<128x256xf32>
    %c1_26 = arith.constant 1 : index
    %c0_27 = arith.constant 0 : index
    %c0_28 = arith.constant 0 : index
    %40 = vector.load %arg5[%c1_26, %c0_27, %c0_28] : memref<5x128x128xbf16, #tpu.memory_space<vmem>>, vector<1x128x128xbf16>
    %41 = vector.shape_cast %40 : vector<1x128x128xbf16> to vector<128x128xbf16>
    %42 = arith.truncf %39 : vector<128x256xf32> to vector<128x256xbf16>
    %cst_29 = arith.constant 0.000000e+00 : bf16
    %43 = vector.broadcast %cst_29 : bf16 to vector<128x256xbf16>
    %44 = arith.maximumf %42, %43 : vector<128x256xbf16>
    %cst_30 = arith.constant dense<0.000000e+00> : vector<128x256xf32>
    %45 = tpu.matmul %41, %44, %cst_30 {dimension_numbers = #tpu.dot_dimension_numbers<[1], [0], [0], [1], [0, 0, 1, 1], [], []>} : vector<128x128xbf16>, vector<128x256xbf16>, vector<128x256xf32> -> vector<128x256xf32>
    %c1_31 = arith.constant 1 : index
    %c0_32 = arith.constant 0 : index
    %c0_33 = arith.constant 0 : index
    %46 = vector.load %arg6[%c1_31, %c0_32, %c0_33] : memref<5x128x1xf32, #tpu.memory_space<vmem>>, vector<1x128x1xf32>
    %47 = vector.shape_cast %46 : vector<1x128x1xf32> to vector<128x1xf32>
    %48 = vector.broadcast %47 : vector<128x1xf32> to vector<128x256xf32>
    %49 = arith.addf %45, %48 : vector<128x256xf32>
    %50 = arith.addf %29, %49 : vector<128x256xf32>
    %51 = vector.extract_strided_slice %3 {offsets = [384, 0], sizes = [128, 256], strides = [1, 1]} : vector<768x256xf32> to vector<128x256xf32>
    %52 = arith.addf %50, %51 : vector<128x256xf32>
    %c2 = arith.constant 2 : index
    %c0_34 = arith.constant 0 : index
    %c0_35 = arith.constant 0 : index
    %53 = vector.load %arg3[%c2, %c0_34, %c0_35] : memref<5x128x128xbf16, #tpu.memory_space<vmem>>, vector<1x128x128xbf16>
    %54 = vector.shape_cast %53 : vector<1x128x128xbf16> to vector<128x128xbf16>
    %55 = arith.truncf %52 : vector<128x256xf32> to vector<128x256xbf16>
    %cst_36 = arith.constant 0.000000e+00 : bf16
    %56 = vector.broadcast %cst_36 : bf16 to vector<128x256xbf16>
    %57 = arith.maximumf %55, %56 : vector<128x256xbf16>
    %cst_37 = arith.constant dense<0.000000e+00> : vector<128x256xf32>
    %58 = tpu.matmul %54, %57, %cst_37 {dimension_numbers = #tpu.dot_dimension_numbers<[1], [0], [0], [1], [0, 0, 1, 1], [], []>} : vector<128x128xbf16>, vector<128x256xbf16>, vector<128x256xf32> -> vector<128x256xf32>
    %c2_38 = arith.constant 2 : index
    %c0_39 = arith.constant 0 : index
    %c0_40 = arith.constant 0 : index
    %59 = vector.load %arg4[%c2_38, %c0_39, %c0_40] : memref<5x128x1xf32, #tpu.memory_space<vmem>>, vector<1x128x1xf32>
    %60 = vector.shape_cast %59 : vector<1x128x1xf32> to vector<128x1xf32>
    %61 = vector.broadcast %60 : vector<128x1xf32> to vector<128x256xf32>
    %62 = arith.addf %58, %61 : vector<128x256xf32>
    %c2_41 = arith.constant 2 : index
    %c0_42 = arith.constant 0 : index
    %c0_43 = arith.constant 0 : index
    %63 = vector.load %arg5[%c2_41, %c0_42, %c0_43] : memref<5x128x128xbf16, #tpu.memory_space<vmem>>, vector<1x128x128xbf16>
    %64 = vector.shape_cast %63 : vector<1x128x128xbf16> to vector<128x128xbf16>
    %65 = arith.truncf %62 : vector<128x256xf32> to vector<128x256xbf16>
    %cst_44 = arith.constant 0.000000e+00 : bf16
    %66 = vector.broadcast %cst_44 : bf16 to vector<128x256xbf16>
    %67 = arith.maximumf %65, %66 : vector<128x256xbf16>
    %cst_45 = arith.constant dense<0.000000e+00> : vector<128x256xf32>
    %68 = tpu.matmul %64, %67, %cst_45 {dimension_numbers = #tpu.dot_dimension_numbers<[1], [0], [0], [1], [0, 0, 1, 1], [], []>} : vector<128x128xbf16>, vector<128x256xbf16>, vector<128x256xf32> -> vector<128x256xf32>
    %c2_46 = arith.constant 2 : index
    %c0_47 = arith.constant 0 : index
    %c0_48 = arith.constant 0 : index
    %69 = vector.load %arg6[%c2_46, %c0_47, %c0_48] : memref<5x128x1xf32, #tpu.memory_space<vmem>>, vector<1x128x1xf32>
    %70 = vector.shape_cast %69 : vector<1x128x1xf32> to vector<128x1xf32>
    %71 = vector.broadcast %70 : vector<128x1xf32> to vector<128x256xf32>
    %72 = arith.addf %68, %71 : vector<128x256xf32>
    %73 = arith.addf %52, %72 : vector<128x256xf32>
    %74 = vector.extract_strided_slice %3 {offsets = [512, 0], sizes = [128, 256], strides = [1, 1]} : vector<768x256xf32> to vector<128x256xf32>
    %75 = arith.addf %73, %74 : vector<128x256xf32>
    %c3 = arith.constant 3 : index
    %c0_49 = arith.constant 0 : index
    %c0_50 = arith.constant 0 : index
    %76 = vector.load %arg3[%c3, %c0_49, %c0_50] : memref<5x128x128xbf16, #tpu.memory_space<vmem>>, vector<1x128x128xbf16>
    %77 = vector.shape_cast %76 : vector<1x128x128xbf16> to vector<128x128xbf16>
    %78 = arith.truncf %75 : vector<128x256xf32> to vector<128x256xbf16>
    %cst_51 = arith.constant 0.000000e+00 : bf16
    %79 = vector.broadcast %cst_51 : bf16 to vector<128x256xbf16>
    %80 = arith.maximumf %78, %79 : vector<128x256xbf16>
    %cst_52 = arith.constant dense<0.000000e+00> : vector<128x256xf32>
    %81 = tpu.matmul %77, %80, %cst_52 {dimension_numbers = #tpu.dot_dimension_numbers<[1], [0], [0], [1], [0, 0, 1, 1], [], []>} : vector<128x128xbf16>, vector<128x256xbf16>, vector<128x256xf32> -> vector<128x256xf32>
    %c3_53 = arith.constant 3 : index
    %c0_54 = arith.constant 0 : index
    %c0_55 = arith.constant 0 : index
    %82 = vector.load %arg4[%c3_53, %c0_54, %c0_55] : memref<5x128x1xf32, #tpu.memory_space<vmem>>, vector<1x128x1xf32>
    %83 = vector.shape_cast %82 : vector<1x128x1xf32> to vector<128x1xf32>
    %84 = vector.broadcast %83 : vector<128x1xf32> to vector<128x256xf32>
    %85 = arith.addf %81, %84 : vector<128x256xf32>
    %c3_56 = arith.constant 3 : index
    %c0_57 = arith.constant 0 : index
    %c0_58 = arith.constant 0 : index
    %86 = vector.load %arg5[%c3_56, %c0_57, %c0_58] : memref<5x128x128xbf16, #tpu.memory_space<vmem>>, vector<1x128x128xbf16>
    %87 = vector.shape_cast %86 : vector<1x128x128xbf16> to vector<128x128xbf16>
    %88 = arith.truncf %85 : vector<128x256xf32> to vector<128x256xbf16>
    %cst_59 = arith.constant 0.000000e+00 : bf16
    %89 = vector.broadcast %cst_59 : bf16 to vector<128x256xbf16>
    %90 = arith.maximumf %88, %89 : vector<128x256xbf16>
    %cst_60 = arith.constant dense<0.000000e+00> : vector<128x256xf32>
    %91 = tpu.matmul %87, %90, %cst_60 {dimension_numbers = #tpu.dot_dimension_numbers<[1], [0], [0], [1], [0, 0, 1, 1], [], []>} : vector<128x128xbf16>, vector<128x256xbf16>, vector<128x256xf32> -> vector<128x256xf32>
    %c3_61 = arith.constant 3 : index
    %c0_62 = arith.constant 0 : index
    %c0_63 = arith.constant 0 : index
    %92 = vector.load %arg6[%c3_61, %c0_62, %c0_63] : memref<5x128x1xf32, #tpu.memory_space<vmem>>, vector<1x128x1xf32>
    %93 = vector.shape_cast %92 : vector<1x128x1xf32> to vector<128x1xf32>
    %94 = vector.broadcast %93 : vector<128x1xf32> to vector<128x256xf32>
    %95 = arith.addf %91, %94 : vector<128x256xf32>
    %96 = arith.addf %75, %95 : vector<128x256xf32>
    %97 = vector.extract_strided_slice %3 {offsets = [640, 0], sizes = [128, 256], strides = [1, 1]} : vector<768x256xf32> to vector<128x256xf32>
    %98 = arith.addf %96, %97 : vector<128x256xf32>
    %c4 = arith.constant 4 : index
    %c0_64 = arith.constant 0 : index
    %c0_65 = arith.constant 0 : index
    %99 = vector.load %arg3[%c4, %c0_64, %c0_65] : memref<5x128x128xbf16, #tpu.memory_space<vmem>>, vector<1x128x128xbf16>
    %100 = vector.shape_cast %99 : vector<1x128x128xbf16> to vector<128x128xbf16>
    %101 = arith.truncf %98 : vector<128x256xf32> to vector<128x256xbf16>
    %cst_66 = arith.constant 0.000000e+00 : bf16
    %102 = vector.broadcast %cst_66 : bf16 to vector<128x256xbf16>
    %103 = arith.maximumf %101, %102 : vector<128x256xbf16>
    %cst_67 = arith.constant dense<0.000000e+00> : vector<128x256xf32>
    %104 = tpu.matmul %100, %103, %cst_67 {dimension_numbers = #tpu.dot_dimension_numbers<[1], [0], [0], [1], [0, 0, 1, 1], [], []>} : vector<128x128xbf16>, vector<128x256xbf16>, vector<128x256xf32> -> vector<128x256xf32>
    %c4_68 = arith.constant 4 : index
    %c0_69 = arith.constant 0 : index
    %c0_70 = arith.constant 0 : index
    %105 = vector.load %arg4[%c4_68, %c0_69, %c0_70] : memref<5x128x1xf32, #tpu.memory_space<vmem>>, vector<1x128x1xf32>
    %106 = vector.shape_cast %105 : vector<1x128x1xf32> to vector<128x1xf32>
    %107 = vector.broadcast %106 : vector<128x1xf32> to vector<128x256xf32>
    %108 = arith.addf %104, %107 : vector<128x256xf32>
    %c4_71 = arith.constant 4 : index
    %c0_72 = arith.constant 0 : index
    %c0_73 = arith.constant 0 : index
    %109 = vector.load %arg5[%c4_71, %c0_72, %c0_73] : memref<5x128x128xbf16, #tpu.memory_space<vmem>>, vector<1x128x128xbf16>
    %110 = vector.shape_cast %109 : vector<1x128x128xbf16> to vector<128x128xbf16>
    %111 = arith.truncf %108 : vector<128x256xf32> to vector<128x256xbf16>
    %cst_74 = arith.constant 0.000000e+00 : bf16
    %112 = vector.broadcast %cst_74 : bf16 to vector<128x256xbf16>
    %113 = arith.maximumf %111, %112 : vector<128x256xbf16>
    %cst_75 = arith.constant dense<0.000000e+00> : vector<128x256xf32>
    %114 = tpu.matmul %110, %113, %cst_75 {dimension_numbers = #tpu.dot_dimension_numbers<[1], [0], [0], [1], [0, 0, 1, 1], [], []>} : vector<128x128xbf16>, vector<128x256xbf16>, vector<128x256xf32> -> vector<128x256xf32>
    %c4_76 = arith.constant 4 : index
    %c0_77 = arith.constant 0 : index
    %c0_78 = arith.constant 0 : index
    %115 = vector.load %arg6[%c4_76, %c0_77, %c0_78] : memref<5x128x1xf32, #tpu.memory_space<vmem>>, vector<1x128x1xf32>
    %116 = vector.shape_cast %115 : vector<1x128x1xf32> to vector<128x1xf32>
    %117 = vector.broadcast %116 : vector<128x1xf32> to vector<128x256xf32>
    %118 = arith.addf %114, %117 : vector<128x256xf32>
    %119 = arith.addf %98, %118 : vector<128x256xf32>
    %c0_79 = arith.constant 0 : index
    %c0_80 = arith.constant 0 : index
    %120 = vector.load %arg7[%c0_79, %c0_80] : memref<3x128xbf16, #tpu.memory_space<vmem>>, vector<3x128xbf16>
    %121 = arith.truncf %119 : vector<128x256xf32> to vector<128x256xbf16>
    %cst_81 = arith.constant 0.000000e+00 : bf16
    %122 = vector.broadcast %cst_81 : bf16 to vector<128x256xbf16>
    %123 = arith.maximumf %121, %122 : vector<128x256xbf16>
    %cst_82 = arith.constant dense<0.000000e+00> : vector<3x256xf32>
    %124 = tpu.matmul %120, %123, %cst_82 {dimension_numbers = #tpu.dot_dimension_numbers<[1], [0], [0], [1], [0, 0, 1, 1], [], []>} : vector<3x128xbf16>, vector<128x256xbf16>, vector<3x256xf32> -> vector<3x256xf32>
    %c0_83 = arith.constant 0 : index
    %c0_84 = arith.constant 0 : index
    %125 = vector.load %arg8[%c0_83, %c0_84] : memref<3x1xf32, #tpu.memory_space<vmem>>, vector<3x1xf32>
    %126 = vector.broadcast %125 : vector<3x1xf32> to vector<3x256xf32>
    %127 = arith.addf %124, %126 : vector<3x256xf32>
    %128 = arith.negf %127 : vector<3x256xf32>
    %129 = math.exp %128 : vector<3x256xf32>
    %cst_85 = arith.constant 1.000000e+00 : f32
    %130 = vector.broadcast %cst_85 : f32 to vector<3x256xf32>
    %131 = arith.addf %130, %129 : vector<3x256xf32>
    %132 = arith.divf %130, %131 : vector<3x256xf32>
    %c0_86 = arith.constant 0 : index
    %c0_87 = arith.constant 0 : index
    %133 = vector.load %arg9[%c0_86, %c0_87] : memref<3x256xf32, #tpu.memory_space<vmem>>, vector<3x256xf32>
    tpu.vector_store %arg9[%c0_86, %c0_87], %132 {strides = array<i32>} : memref<3x256xf32, #tpu.memory_space<vmem>>, vector<3x256xf32>,
    return
  }
  func.func @transform_0(%arg0: i32) -> (i32, i32) {
    %c0_i32 = arith.constant 0 : i32
    %c0_i32_0 = arith.constant 0 : i32
    return %c0_i32, %arg0 : i32, i32
  }
  func.func @transform_1(%arg0: i32) -> (i32, i32) {
    %c0_i32 = arith.constant 0 : i32
    %c0_i32_0 = arith.constant 0 : i32
    %c0_i32_1 = arith.constant 0 : i32
    return %c0_i32, %c0_i32_0 : i32, i32
  }
  func.func @transform_2(%arg0: i32) -> (i32, i32, i32) {
    %c0_i32 = arith.constant 0 : i32
    %c0_i32_0 = arith.constant 0 : i32
    %c0_i32_1 = arith.constant 0 : i32
    %c0_i32_2 = arith.constant 0 : i32
    return %c0_i32, %c0_i32_0, %c0_i32_1 : i32, i32, i32
  }
  func.func @transform_3(%arg0: i32) -> (i32, i32, i32) {
    %c0_i32 = arith.constant 0 : i32
    %c0_i32_0 = arith.constant 0 : i32
    %c0_i32_1 = arith.constant 0 : i32
    %c0_i32_2 = arith.constant 0 : i32
    return %c0_i32, %c0_i32_0, %c0_i32_1 : i32, i32, i32
  }
  func.func @transform_4(%arg0: i32) -> (i32, i32, i32) {
    %c0_i32 = arith.constant 0 : i32
    %c0_i32_0 = arith.constant 0 : i32
    %c0_i32_1 = arith.constant 0 : i32
    %c0_i32_2 = arith.constant 0 : i32
    return %c0_i32, %c0_i32_0, %c0_i32_1 : i32, i32, i32
  }
  func.func @transform_5(%arg0: i32) -> (i32, i32, i32) {
    %c0_i32 = arith.constant 0 : i32
    %c0_i32_0 = arith.constant 0 : i32
    %c0_i32_1 = arith.constant 0 : i32
    %c0_i32_2 = arith.constant 0 : i32
    return %c0_i32, %c0_i32_0, %c0_i32_1 : i32, i32, i32
  }
  func.func @transform_6(%arg0: i32) -> (i32, i32) {
    %c0_i32 = arith.constant 0 : i32
    %c0_i32_0 = arith.constant 0 : i32
    %c0_i32_1 = arith.constant 0 : i32
    return %c0_i32, %c0_i32_0 : i32, i32
  }
  func.func @transform_7(%arg0: i32) -> (i32, i32) {
    %c0_i32 = arith.constant 0 : i32
    %c0_i32_0 = arith.constant 0 : i32
    %c0_i32_1 = arith.constant 0 : i32
    return %c0_i32, %c0_i32_0 : i32, i32
  }
  func.func @transform_8(%arg0: i32) -> (i32, i32) {
    %c0_i32 = arith.constant 0 : i32
    %c0_i32_0 = arith.constant 0 : i32
    return %c0_i32, %arg0 : i32, i32
  }
}

</mosaic_0001>

<bundles_post_ra>
// kernel: tpu_custom_call.1
= control target key start
LH: loop header
LB: loop body
LE: loop exit
PB: predicated region body
PF: predicated region fallthrough
CT: control target
= control target key end

     0   :  { %v8154_v7 = vmov 0   ;;  %s8145_s0 = inlined_call_operand.vmem [shape: f32[128,256], index: 0, kind: input, shape index: {}]   ;;  %s8146_s1 = inlined_call_operand.vmem [shape: bf16[768,128], index: 1, kind: input, shape index: {}]   ;;  %s8147_s2 = inlined_call_operand.vmem [shape: bf16[5,128,128], index: 2, kind: input, shape index: {}]   ;;  %s8148_s3 = inlined_call_operand.vmem [shape: f32[5,128,1], index: 3, kind: input, shape index: {}]   ;;  %s8149_s4 = inlined_call_operand.vmem [shape: bf16[5,128,128], index: 4, kind: input, shape index: {}]   ;;  %s8150_s5 = inlined_call_operand.vmem [shape: f32[5,128,1], index: 5, kind: input, shape index: {}]   ;;  %s8151_s6 = inlined_call_operand.vmem [shape: bf16[3,128], index: 6, kind: input, shape index: {}]   ;;  %s8152_s7 = inlined_call_operand.vmem [shape: f32[3,1], index: 7, kind: input, shape index: {}]   ;;  %s8153_s8 = inlined_call_operand.hbm [shape: f32[3,256], index: 8, kind: output, shape index: {}]  }
   0x1   :  { %v32_v0 = vld [vmem:[%s8145_s0 + $0x8] sm:$0xff]  ;;  %v34_v1 = vld [vmem:[%s8145_s0 + $0x18] sm:$0xff]  ;;  %v31_v2 = vld [vmem:[%s8145_s0] sm:$0xff]  ;;  %495 = vmatprep.mubr.bf16.mxu0 %v8154_v7  ;;  %5293 = vset.pattern.permute.xlu0 %v8154_v7 }
   0x2   :  { %v64_v3 = vpack.c.bf16 %v34_v1, %v32_v0  ;;  %v33_v4 = vld [vmem:[%s8145_s0 + $0x10] sm:$0xff]  ;;  %v36_v5 = vld [vmem:[%s8145_s0 + $0x28] sm:$0xff]  ;;  %v38_v6 = vld [vmem:[%s8145_s0 + $0x38] sm:$0xff]  ;;  %5294 = vset.pattern.permute.xlu1 %v8154_v7  ;;  %825 = vmatprep.mubr.bf16.mxu1 %v8154_v7 }
   0x3   :  { %v63_v8 = vpack.c.bf16 %v33_v4, %v31_v2  ;;  %v66_v9 = vpack.c.bf16 %v38_v6, %v36_v5  ;;  %v35_v10 = vld [vmem:[%s8145_s0 + $0x20] sm:$0xff]  ;;  %v37_v11 = vld [vmem:[%s8145_s0 + $0x30] sm:$0xff]  ;;  %v40_v12 = vld [vmem:[%s8145_s0 + $0x48] sm:$0xff] }
   0x4   :  { %463 = vmatprep.subr.bf16.mxu0 %v64_v3  ;;  %v42_v13 = vld [vmem:[%s8145_s0 + $0x58] sm:$0xff]  ;;  %4859 = vmatprep.subr.bf16.mxu1 %v64_v3  ;;  %v65_v14 = vpack.c.bf16 %v37_v11, %v35_v10  ;;  %v39_v16 = vld [vmem:[%s8145_s0 + $0x40] sm:$0xff]  ;;  %v41_v17 = vld [vmem:[%s8145_s0 + $0x50] sm:$0xff] }
   0x5   :  { %464 = vmatpush1.bf16.msra.mxu0 %v63_v8  ;;  %4867 = vmatpush1.bf16.msra.mxu1 %v63_v8  ;;  %v68_v15 = vpack.c.bf16 %v42_v13, %v40_v12  ;;  %v44_v18 = vld [vmem:[%s8145_s0 + $0x68] sm:$0xff]  ;;  %v46_v19 = vld [vmem:[%s8145_s0 + $0x78] sm:$0xff]  ;;  %v67_v20 = vpack.c.bf16 %v41_v17, %v39_v16  ;;  %v43_v22 = vld [vmem:[%s8145_s0 + $0x60] sm:$0xff] }
   0x6   :  { %465 = vmatprep.subr.bf16.mxu0 %v66_v9  ;;  %4860 = vmatprep.subr.bf16.mxu1 %v66_v9  ;;  %v70_v21 = vpack.c.bf16 %v46_v19, %v44_v18  ;;  %v45_v23 = vld [vmem:[%s8145_s0 + $0x70] sm:$0xff]  ;;  %v48_v24 = vld [vmem:[%s8145_s0 + $0x88] sm:$0xff]  ;;  %v50_v25 = vld [vmem:[%s8145_s0 + $0x98] sm:$0xff] }
   0x7   :  { %v47_v26 = vld [vmem:[%s8145_s0 + $0x80] sm:$0xff]  ;;  %v69_v27 = vpack.c.bf16 %v45_v23, %v43_v22  ;;  %v49_v28 = vld [vmem:[%s8145_s0 + $0x90] sm:$0xff]  ;;  %v72_v29 = vpack.c.bf16 %v50_v25, %v48_v24  ;;  %v52_v30 = vld [vmem:[%s8145_s0 + $0xa8] sm:$0xff] }
   0x8   :  { %v54_v31 = vld [vmem:[%s8145_s0 + $0xb8] sm:$0xff]  ;;  %v51_v32 = vld [vmem:[%s8145_s0 + $0xa0] sm:$0xff]  ;;  %v71_v33 = vpack.c.bf16 %v49_v28, %v47_v26  ;;  %v53_v34 = vld [vmem:[%s8145_s0 + $0xb0] sm:$0xff] }
   0x9   :  { %466 = vmatpush1.bf16.msra.mxu0 %v65_v14  ;;  %4868 = vmatpush1.bf16.msra.mxu1 %v65_v14  ;;  %v74_v35 = vpack.c.bf16 %v54_v31, %v52_v30  ;;  %v56_v36 = vld [vmem:[%s8145_s0 + $0xc8] sm:$0xff]  ;;  %v58_v37 = vld [vmem:[%s8145_s0 + $0xd8] sm:$0xff]  ;;  %v55_v38 = vld [vmem:[%s8145_s0 + $0xc0] sm:$0xff]  ;;  %v73_v39 = vpack.c.bf16 %v53_v34, %v51_v32 }
   0xa   :  { %467 = vmatprep.subr.bf16.mxu0 %v68_v15  ;;  %4861 = vmatprep.subr.bf16.mxu1 %v68_v15  ;;  %v57_v40 = vld [vmem:[%s8145_s0 + $0xd0] sm:$0xff]  ;;  %v76_v41 = vpack.c.bf16 %v58_v37, %v56_v36  ;;  %v60_v42 = vld [vmem:[%s8145_s0 + $0xe8] sm:$0xff]  ;;  %v62_v43 = vld [vmem:[%s8145_s0 + $0xf8] sm:$0xff] }
   0xb   :  { %v75_v44 = vpack.c.bf16 %v57_v40, %v55_v38  ;;  %v59_v45 = vld [vmem:[%s8145_s0 + $0xe0] sm:$0xff]  ;;  %v78_v47 = vpack.c.bf16 %v62_v43, %v60_v42  ;;  %v61_v48 = vld [vmem:[%s8145_s0 + $0xf0] sm:$0xff]  ;;  %v1057_v49 = vld [vmem:[%s8148_s3 + $0x8] sm:$0xff] }
   0xc   :  { %v1056_v46 = vld [vmem:[%s8148_s3] sm:$0xff]  ;;  %v1058_v50 = vld [vmem:[%s8148_s3 + $0x10] sm:$0xff]  ;;  %v77_v51 = vpack.c.bf16 %v61_v48, %v59_v45  ;;  %v1059_v52 = vld [vmem:[%s8148_s3 + $0x18] sm:$0xff] }
   0xd   :  { %468 = vmatpush1.bf16.msra.mxu0 %v67_v20  ;;  %4869 = vmatpush1.bf16.msra.mxu1 %v67_v20  ;;  %v1060_v53 = vld [vmem:[%s8148_s3 + $0x20] sm:$0xff]  ;;  %v1061_v55 = vld [vmem:[%s8148_s3 + $0x28] sm:$0xff]  ;;  %v1062_v56 = vld [vmem:[%s8148_s3 + $0x30] sm:$0xff] }
   0xe   :  { %469 = vmatprep.subr.bf16.mxu0 %v70_v21  ;;  %4862 = vmatprep.subr.bf16.mxu1 %v70_v21  ;;  %v5295_v54 = vld [vmem:[%s8146_s1] sm:$0xff]   ;;  %v1063_v57 = vld [vmem:[%s8148_s3 + $0x38] sm:$0xff]  ;;  %v5296_v59 = vld [vmem:[%s8146_s1 + $0x8] sm:$0xff]  }
   0xf   :  { %1074 = vperm.xlu0 %5293, %v1056_v46   ;;  %1084 = vperm.xlu1 %5294, %v1058_v50   ;;  %v1064_v58 = vld [vmem:[%s8148_s3 + $0x40] sm:$0xff]  ;;  %v1065_v60 = vld [vmem:[%s8148_s3 + $0x48] sm:$0xff]  ;;  %v1066_v61 = vld [vmem:[%s8148_s3 + $0x50] sm:$0xff] }
  0x10   :  { %v5311_v62 = vld [vmem:[%s8146_s1 + $0x108] sm:$0xff]   ;;  %v1067_v63 = vld [vmem:[%s8148_s3 + $0x58] sm:$0xff]  ;;  %v1068_v0 = vld [vmem:[%s8148_s3 + $0x60] sm:$0xff] }
  0x11   :  { %470 = vmatpush1.bf16.msra.mxu0 %v69_v27  ;;  %4870 = vmatpush1.bf16.msra.mxu1 %v69_v27  ;;  %v5297_v1 = vld [vmem:[%s8146_s1 + $0x10] sm:$0xff]   ;;  %v1069_v2 = vld [vmem:[%s8148_s3 + $0x68] sm:$0xff]  ;;  %v1071_v5 = vld [vmem:[%s8148_s3 + $0x78] sm:$0xff] }
  0x12   :  { %471 = vmatprep.subr.bf16.mxu0 %v72_v29  ;;  %4863 = vmatprep.subr.bf16.mxu1 %v72_v29  ;;  %v5312_v3 = vld [vmem:[%s8146_s1 + $0x110] sm:$0xff]   ;;  %v1361_v6 = vld [vmem:[%s8150_s5] sm:$0xff]  ;;  %v5298_v8 = vld [vmem:[%s8146_s1 + $0x18] sm:$0xff]  }
  0x13   :  { %1079 = vperm.xlu0 %5293, %v1057_v49   ;;  %1089 = vperm.xlu1 %5294, %v1059_v52   ;;  %v1070_v4 = vld [vmem:[%s8148_s3 + $0x70] sm:$0xff]  ;;  %v1362_v10 = vld [vmem:[%s8150_s5 + $0x8] sm:$0xff]  ;;  %v5313_v11 = vld [vmem:[%s8146_s1 + $0x118] sm:$0xff]  }
  0x14   :  { %v1363_v9 = vld [vmem:[%s8150_s5 + $0x10] sm:$0xff]  ;;  %v1365_v12 = vld [vmem:[%s8150_s5 + $0x20] sm:$0xff]  ;;  %v1364_v14 = vld [vmem:[%s8150_s5 + $0x18] sm:$0xff] }
  0x15   :  { %472 = vmatpush1.bf16.msra.mxu0 %v71_v33  ;;  %4871 = vmatpush1.bf16.msra.mxu1 %v71_v33  ;;  %v5299_v13 = vld [vmem:[%s8146_s1 + $0x20] sm:$0xff]   ;;  %v1367_v15 = vld [vmem:[%s8150_s5 + $0x30] sm:$0xff]  ;;  %v1366_v16 = vld [vmem:[%s8150_s5 + $0x28] sm:$0xff] }
  0x16   :  { %473 = vmatprep.subr.bf16.mxu0 %v74_v35  ;;  %4864 = vmatprep.subr.bf16.mxu1 %v74_v35  ;;  %v5314_v17 = vld [vmem:[%s8146_s1 + $0x120] sm:$0xff]   ;;  %v1368_v18 = vld [vmem:[%s8150_s5 + $0x38] sm:$0xff]  ;;  %v5300_v20 = vld [vmem:[%s8146_s1 + $0x28] sm:$0xff]  }
  0x17   :  { %1094 = vperm.xlu0 %5293, %v1060_v53   ;;  %1099 = vperm.xlu1 %5294, %v1061_v55   ;;  %v1369_v19 = vld [vmem:[%s8150_s5 + $0x40] sm:$0xff]  ;;  %v1370_v21 = vld [vmem:[%s8150_s5 + $0x48] sm:$0xff]  ;;  %v1371_v23 = vld [vmem:[%s8150_s5 + $0x50] sm:$0xff] }
  0x18   :  { %v5315_v22 = vld [vmem:[%s8146_s1 + $0x128] sm:$0xff]   ;;  %v1372_v24 = vld [vmem:[%s8150_s5 + $0x58] sm:$0xff]  ;;  %v1373_v25 = vld [vmem:[%s8150_s5 + $0x60] sm:$0xff] }
  0x19   :  { %474 = vmatpush1.bf16.msra.mxu0 %v73_v39  ;;  %4872 = vmatpush1.bf16.msra.mxu1 %v73_v39  ;;  %v5301_v26 = vld [vmem:[%s8146_s1 + $0x30] sm:$0xff]   ;;  %v1374_v27 = vld [vmem:[%s8150_s5 + $0x68] sm:$0xff]  ;;  %v1376_v30 = vld [vmem:[%s8150_s5 + $0x78] sm:$0xff] }
  0x1a   :  { %475 = vmatprep.subr.bf16.mxu0 %v76_v41  ;;  %4865 = vmatprep.subr.bf16.mxu1 %v76_v41  ;;  %v5316_v28 = vld [vmem:[%s8146_s1 + $0x130] sm:$0xff]   ;;  %v4553_v31 = vld [vmem:[%s8148_s3 + $0x80] sm:$0xff]  ;;  %v5302_v32 = vld [vmem:[%s8146_s1 + $0x38] sm:$0xff]  }
  0x1b   :  { %1104 = vperm.xlu0 %5293, %v1062_v56   ;;  %1109 = vperm.xlu1 %5294, %v1063_v57   ;;  %v1375_v29 = vld [vmem:[%s8150_s5 + $0x70] sm:$0xff]  ;;  %v4554_v33 = vld [vmem:[%s8148_s3 + $0x88] sm:$0xff]  ;;  %v5317_v34 = vld [vmem:[%s8146_s1 + $0x138] sm:$0xff]  }
  0x1c   :  { %v4555_v35 = vld [vmem:[%s8148_s3 + $0x90] sm:$0xff]  ;;  %v4556_v36 = vld [vmem:[%s8148_s3 + $0x98] sm:$0xff]  ;;  %v4557_v37 = vld [vmem:[%s8148_s3 + $0xa0] sm:$0xff] }
  0x1d   :  { %476 = vmatpush1.bf16.msra.mxu0 %v75_v44  ;;  %4873 = vmatpush1.bf16.msra.mxu1 %v75_v44  ;;  %v5303_v38 = vld [vmem:[%s8146_s1 + $0x40] sm:$0xff]   ;;  %v4558_v39 = vld [vmem:[%s8148_s3 + $0xa8] sm:$0xff]  ;;  %v4559_v40 = vld [vmem:[%s8148_s3 + $0xb0] sm:$0xff] }
  0x1e   :  { %477 = vmatprep.subr.bf16.mxu0 %v78_v47  ;;  %4866 = vmatprep.subr.bf16.mxu1 %v78_v47  ;;  %v4560_v41 = vld [vmem:[%s8148_s3 + $0xb8] sm:$0xff]  ;;  %v4561_v42 = vld [vmem:[%s8148_s3 + $0xc0] sm:$0xff]  ;;  %v5304_v43 = vld [vmem:[%s8146_s1 + $0x48] sm:$0xff]  }
  0x1f   :  { %1114 = vperm.xlu0 %5293, %v1064_v58   ;;  %1119 = vperm.xlu1 %5294, %v1065_v60   ;;  %v4562_v44 = vld [vmem:[%s8148_s3 + $0xc8] sm:$0xff]  ;;  %v4563_v45 = vld [vmem:[%s8148_s3 + $0xd0] sm:$0xff]  ;;  %v4564_v46 = vld [vmem:[%s8148_s3 + $0xd8] sm:$0xff] }
  0x20   :  { %v4565_v47 = vld [vmem:[%s8148_s3 + $0xe0] sm:$0xff]  ;;  %v5305_v48 = vld [vmem:[%s8146_s1 + $0x50] sm:$0xff]   ;;  %v4566_v49 = vld [vmem:[%s8148_s3 + $0xe8] sm:$0xff] }
  0x21   :  { %478 = vmatpush1.bf16.msra.mxu0 %v77_v51  ;;  %4874 = vmatpush1.bf16.msra.mxu1 %v77_v51  ;;  %v4567_v50 = vld [vmem:[%s8148_s3 + $0xf0] sm:$0xff]  ;;  %v4568_v51 = vld [vmem:[%s8148_s3 + $0xf8] sm:$0xff]  ;;  %v4593_v52 = vld [vmem:[%s8150_s5 + $0x80] sm:$0xff] }
  0x22   :  { %v5306_v53 = vld [vmem:[%s8146_s1 + $0x58] sm:$0xff]   ;;  %v4595_v55 = vld [vmem:[%s8150_s5 + $0x90] sm:$0xff]  ;;  %v4597_v57 = vld [vmem:[%s8150_s5 + $0xa0] sm:$0xff] }
  0x23   :  { %1124 = vperm.xlu0 %5293, %v1066_v61   ;;  %1129 = vperm.xlu1 %5294, %v1067_v63   ;;  %v4596_v56 = vld [vmem:[%s8150_s5 + $0x98] sm:$0xff]  ;;  %v5307_v58 = vld [vmem:[%s8146_s1 + $0x60] sm:$0xff]  }
  0x24   :  { %496 = vmatmul.mubr.bf16.vlgmr.msra.gmra.mrb[0].mxu0 %v5295_v54  ;;  %826 = vmatmul.mubr.bf16.vlgmr.msra.gmra.mrb[0].mxu1 %v5311_v62  ;;  %v4594_v54 = vld [vmem:[%s8150_s5 + $0x88] sm:$0xff] }
  0x25   :  { %505 = vmatprep.mubr.bf16.mxu0 %v8154_v7  ;;  %835 = vmatprep.mubr.bf16.mxu1 %v8154_v7 }
  0x27   :  { %1134 = vperm.xlu0 %5293, %v1068_v0   ;;  %1139 = vperm.xlu1 %5294, %v1069_v2  }
  0x2b   :  { %1144 = vperm.xlu0 %5293, %v1070_v4   ;;  %1149 = vperm.xlu1 %5294, %v1071_v5  }
  0x2c   :  { %506 = vmatmul.mubr.bf16.gmra.mrb[4].mxu0 %v5296_v59  ;;  %836 = vmatmul.mubr.bf16.gmra.mrb[4].mxu1 %v5312_v3  ;;  %v4598_v59 = vld [vmem:[%s8150_s5 + $0xa8] sm:$0xff] }
  0x2d   :  { %515 = vmatprep.mubr.bf16.mxu0 %v8154_v7  ;;  %845 = vmatprep.mubr.bf16.mxu1 %v8154_v7 }
  0x2f   :  { %1379 = vperm.xlu0 %5293, %v1361_v6   ;;  %1384 = vperm.xlu1 %5294, %v1362_v10  }
  0x33   :  { %1389 = vperm.xlu0 %5293, %v1363_v9   ;;  %1394 = vperm.xlu1 %5294, %v1364_v14  }
  0x34   :  { %516 = vmatmul.mubr.bf16.gmra.mrb[8].mxu0 %v5297_v1  ;;  %846 = vmatmul.mubr.bf16.gmra.mrb[8].mxu1 %v5313_v11 }
  0x35   :  { %525 = vmatprep.mubr.bf16.mxu0 %v8154_v7  ;;  %855 = vmatprep.mubr.bf16.mxu1 %v8154_v7 }
  0x37   :  { %1399 = vperm.xlu0 %5293, %v1365_v12   ;;  %1404 = vperm.xlu1 %5294, %v1366_v16  }
  0x3b   :  { %1409 = vperm.xlu0 %5293, %v1367_v15   ;;  %1414 = vperm.xlu1 %5294, %v1368_v18  }
  0x3c   :  { %526 = vmatmul.mubr.bf16.gmra.mrb[12].mxu0 %v5298_v8  ;;  %856 = vmatmul.mubr.bf16.gmra.mrb[12].mxu1 %v5314_v17 }
  0x3d   :  { %535 = vmatprep.mubr.bf16.mxu0 %v8154_v7  ;;  %865 = vmatprep.mubr.bf16.mxu1 %v8154_v7 }
  0x3f   :  { %1419 = vperm.xlu0 %5293, %v1369_v19   ;;  %1424 = vperm.xlu1 %5294, %v1370_v21  }
  0x43   :  { %1429 = vperm.xlu0 %5293, %v1371_v23   ;;  %1434 = vperm.xlu1 %5294, %v1372_v24  }
  0x44   :  { %536 = vmatmul.mubr.bf16.gmra.mrb[16].mxu0 %v5299_v13  ;;  %866 = vmatmul.mubr.bf16.gmra.mrb[16].mxu1 %v5315_v22 }
  0x45   :  { %545 = vmatprep.mubr.bf16.mxu0 %v8154_v7  ;;  %875 = vmatprep.mubr.bf16.mxu1 %v8154_v7 }
  0x47   :  { %1439 = vperm.xlu0 %5293, %v1373_v25   ;;  %1444 = vperm.xlu1 %5294, %v1374_v27  }
  0x4b   :  { %1449 = vperm.xlu0 %5293, %v1375_v29   ;;  %1454 = vperm.xlu1 %5294, %v1376_v30  }
  0x4c   :  { %546 = vmatmul.mubr.bf16.gmra.mrb[20].mxu0 %v5300_v20  ;;  %876 = vmatmul.mubr.bf16.gmra.mrb[20].mxu1 %v5316_v28 }
  0x4d   :  { %555 = vmatprep.mubr.bf16.mxu0 %v8154_v7  ;;  %885 = vmatprep.mubr.bf16.mxu1 %v8154_v7 }
  0x4f   :  { %1750 = vperm.xlu0 %5293, %v4553_v31   ;;  %1755 = vperm.xlu1 %5294, %v4554_v33  }
  0x53   :  { %1760 = vperm.xlu0 %5293, %v4555_v35   ;;  %1765 = vperm.xlu1 %5294, %v4556_v36  }
  0x54   :  { %556 = vmatmul.mubr.bf16.gmra.mrb[24].mxu0 %v5301_v26  ;;  %886 = vmatmul.mubr.bf16.gmra.mrb[24].mxu1 %v5317_v34 }
  0x55   :  { %565 = vmatprep.mubr.bf16.mxu0 %v8154_v7  ;;  %895 = vmatprep.mubr.bf16.mxu1 %v8154_v7 }
  0x57   :  { %1770 = vperm.xlu0 %5293, %v4557_v37   ;;  %1775 = vperm.xlu1 %5294, %v4558_v39  }
  0x5b   :  { %1780 = vperm.xlu0 %5293, %v4559_v40   ;;  %1785 = vperm.xlu1 %5294, %v4560_v41  }
  0x5c   :  { %566 = vmatmul.mubr.bf16.gmra.mrb[28].mxu0 %v5302_v32 }
  0x5d   :  { %575 = vmatprep.mubr.bf16.mxu0 %v8154_v7 }
  0x5f   :  { %1790 = vperm.xlu0 %5293, %v4561_v42   ;;  %1795 = vperm.xlu1 %5294, %v4562_v44  }
  0x63   :  { %1800 = vperm.xlu0 %5293, %v4563_v45   ;;  %1805 = vperm.xlu1 %5294, %v4564_v46  }
  0x64   :  { %576 = vmatmul.mubr.bf16.gmra.mrb[0].mxu0 %v5303_v38 }
  0x65   :  { %585 = vmatprep.mubr.bf16.mxu0 %v8154_v7 }
  0x67   :  { %1810 = vperm.xlu0 %5293, %v4565_v47   ;;  %1815 = vperm.xlu1 %5294, %v4566_v49  }
  0x6b   :  { %1820 = vperm.xlu0 %5293, %v4567_v50   ;;  %1825 = vperm.xlu1 %5294, %v4568_v51  }
  0x6c   :  { %586 = vmatmul.mubr.bf16.gmra.mrb[4].mxu0 %v5304_v43 }
  0x6d   :  { %595 = vmatprep.mubr.bf16.mxu0 %v8154_v7 }
  0x6f   :  { %2057 = vperm.xlu0 %5293, %v4593_v52   ;;  %2062 = vperm.xlu1 %5294, %v4594_v54  }
  0x73   :  { %2067 = vperm.xlu0 %5293, %v4595_v55   ;;  %2072 = vperm.xlu1 %5294, %v4596_v56  }
  0x74   :  { %596 = vmatmul.mubr.bf16.gmra.mrb[8].mxu0 %v5305_v48 }
  0x75   :  { %605 = vmatprep.mubr.bf16.mxu0 %v8154_v7 }
  0x77   :  { %2077 = vperm.xlu0 %5293, %v4597_v57  }
  0x7c   :  { %606 = vmatmul.mubr.bf16.gmra.mrb[12].mxu0 %v5306_v53 }
  0x7d   :  { %615 = vmatprep.mubr.bf16.mxu0 %v8154_v7 }
  0x7e   :  { %13 = vsyncpa [#allocation3], 0  ;;  %v4599_v60 = vld [vmem:[%s8150_s5 + $0xb0] sm:$0xff]  ;;  %2082 = vperm.xlu1 %5294, %v4598_v59   ;;  %v4600_v61 = vld [vmem:[%s8150_s5 + $0xb8] sm:$0xff]  ;;  %s5456_s22 = smov [#allocation2]  }
  0x7f   :  { %2087 = vperm.xlu0 %5293, %v4599_v60   ;;  %v4601_v62 = vld [vmem:[%s8150_s5 + $0xc0] sm:$0xff]  ;;  %v5308_v63 = vld [vmem:[%s8146_s1 + $0x68] sm:$0xff]   ;;  %v4603_v1 = vld [vmem:[%s8150_s5 + $0xd0] sm:$0xff] }
  0x80   :  { %v4602_v0 = vld [vmem:[%s8150_s5 + $0xc8] sm:$0xff]  ;;  %v4604_v2 = vld [vmem:[%s8150_s5 + $0xd8] sm:$0xff]  ;;  %v4605_v3 = vld [vmem:[%s8150_s5 + $0xe0] sm:$0xff] }
  0x81   :  { %v5309_v4 = vld [vmem:[%s8146_s1 + $0x70] sm:$0xff]   ;;  %v4606_v5 = vld [vmem:[%s8150_s5 + $0xe8] sm:$0xff]  ;;  %v4608_v8 = vld [vmem:[%s8150_s5 + $0xf8] sm:$0xff] }
  0x82   :  { %2092 = vperm.xlu1 %5294, %v4600_v61   ;;  %v4607_v6 = vld [vmem:[%s8150_s5 + $0xf0] sm:$0xff]  ;;  %v4633_v9 = vld [vmem:[%s8148_s3 + $0x100] sm:$0xff]  ;;  %v5310_v10 = vld [vmem:[%s8146_s1 + $0x78] sm:$0xff]  }
  0x83   :  { %2097 = vperm.xlu0 %5293, %v4601_v62   ;;  %v4634_v11 = vld [vmem:[%s8148_s3 + $0x108] sm:$0xff]  ;;  %v4635_v12 = vld [vmem:[%s8148_s3 + $0x110] sm:$0xff]  ;;  %v4636_v13 = vld [vmem:[%s8148_s3 + $0x118] sm:$0xff] }
  0x84   :  { %616 = vmatmul.mubr.bf16.gmra.mrb[16].mxu0 %v5307_v58  ;;  %v4637_v14 = vld [vmem:[%s8148_s3 + $0x120] sm:$0xff]  ;;  %v4639_v16 = vld [vmem:[%s8148_s3 + $0x130] sm:$0xff]  ;;  %v4638_v27 = vld [vmem:[%s8148_s3 + $0x128] sm:$0xff] }
  0x85   :  { %625 = vmatprep.mubr.bf16.mxu0 %v8154_v7  ;;  %v4641_v18 = vld [vmem:[%s8148_s3 + $0x140] sm:$0xff]  ;;  %v4643_v19 = vld [vmem:[%s8148_s3 + $0x150] sm:$0xff]  ;;  %v4640_v29 = vld [vmem:[%s8148_s3 + $0x138] sm:$0xff] }
  0x86   :  { %2102 = vperm.xlu1 %5294, %v4602_v0   ;;  %v4645_v21 = vld [vmem:[%s8148_s3 + $0x160] sm:$0xff]  ;;  %v4647_v23 = vld [vmem:[%s8148_s3 + $0x170] sm:$0xff]  ;;  %v5319_v31 = vld [vmem:[%s8146_s1 + $0x148] sm:$0xff]  }
  0x87   :  { %2107 = vperm.xlu0 %5293, %v4603_v1   ;;  %v5318_v24 = vld [vmem:[%s8146_s1 + $0x140] sm:$0xff]   ;;  %v4675_v28 = vld [vmem:[%s8150_s5 + $0x110] sm:$0xff]  ;;  %v4642_v34 = vld [vmem:[%s8148_s3 + $0x148] sm:$0xff] }
  0x88   :  { %v4673_v25 = vld [vmem:[%s8150_s5 + $0x100] sm:$0xff]  ;;  %896 = vmatmul.mubr.bf16.gmra.mrb[28].mxu1 %v5318_v24  ;;  %v4679_v35 = vld [vmem:[%s8150_s5 + $0x130] sm:$0xff]  ;;  %v4644_v37 = vld [vmem:[%s8148_s3 + $0x158] sm:$0xff] }
  0x89   :  { %905 = vmatprep.mubr.bf16.mxu1 %v8154_v7  ;;  %v4677_v33 = vld [vmem:[%s8150_s5 + $0x120] sm:$0xff]  ;;  %v5320_v39 = vld [vmem:[%s8146_s1 + $0x150] sm:$0xff]   ;;  %v4646_v41 = vld [vmem:[%s8148_s3 + $0x168] sm:$0xff] }
  0x8a   :  { %2112 = vperm.xlu1 %5294, %v4604_v2   ;;  %v4681_v40 = vld [vmem:[%s8150_s5 + $0x140] sm:$0xff]  ;;  %v4683_v44 = vld [vmem:[%s8150_s5 + $0x150] sm:$0xff]  ;;  %v4648_v45 = vld [vmem:[%s8148_s3 + $0x178] sm:$0xff] }
  0x8b   :  { %2117 = vperm.xlu0 %5293, %v4605_v3   ;;  %v5321_v46 = vld [vmem:[%s8146_s1 + $0x158] sm:$0xff]   ;;  %v4685_v47 = vld [vmem:[%s8150_s5 + $0x160] sm:$0xff]  ;;  %v4674_v50 = vld [vmem:[%s8150_s5 + $0x108] sm:$0xff] }
  0x8c   :  { %626 = vmatmul.mubr.bf16.gmra.mrb[20].mxu0 %v5308_v63  ;;  %v4687_v51 = vld [vmem:[%s8150_s5 + $0x170] sm:$0xff]  ;;  %v4676_v52 = vld [vmem:[%s8150_s5 + $0x118] sm:$0xff]  ;;  %v5322_v55 = vld [vmem:[%s8146_s1 + $0x160] sm:$0xff]  }
  0x8d   :  { %635 = vmatprep.mubr.bf16.mxu0 %v8154_v7  ;;  %v4713_v56 = vld [vmem:[%s8148_s3 + $0x180] sm:$0xff]  ;;  %v4678_v58 = vld [vmem:[%s8150_s5 + $0x128] sm:$0xff]  ;;  %v4715_v59 = vld [vmem:[%s8148_s3 + $0x190] sm:$0xff] }
  0x8e   :  { %2122 = vperm.xlu1 %5294, %v4606_v5   ;;  %v5901_v15 = vpop.permute.xlu0 %1074  ;;  %v5942_v30 = vpop.permute.xlu1 %1084  ;;  %v4680_v61 = vld [vmem:[%s8150_s5 + $0x138] sm:$0xff]  ;;  %v5323_v63 = vld [vmem:[%s8146_s1 + $0x168] sm:$0xff]   ;;  %v4717_v0 = vld [vmem:[%s8148_s3 + $0x1a0] sm:$0xff] }
  0x8f   :  { %2127 = vperm.xlu0 %5293, %v4607_v6   ;;  %v4682_v2 = vld [vmem:[%s8150_s5 + $0x148] sm:$0xff]  ;;  %v4684_v5 = vld [vmem:[%s8150_s5 + $0x158] sm:$0xff]  ;;  %v5324_v6 = vld [vmem:[%s8146_s1 + $0x170] sm:$0xff]  }
  0x90   :  { %906 = vmatmul.mubr.bf16.gmra.mrb[32].mxu1 %v5319_v31  ;;  %v4718_v31 = vld [vmem:[%s8148_s3 + $0x1a8] sm:$0xff] }
  0x91   :  { %915 = vmatprep.mubr.bf16.mxu1 %v8154_v7 }
  0x92   :  { %2132 = vperm.xlu1 %5294, %v4608_v8   ;;  %v5906_v17 = vpop.permute.xlu0 %1079  ;;  %v5959_v36 = vpop.permute.xlu1 %1089 }
  0x93   :  { %2428 = vperm.xlu0 %5293, %v4633_v9   ;;  %v4721_v9 = vld [vmem:[%s8148_s3 + $0x1c0] sm:$0xff] }
  0x94   :  { %636 = vmatmul.mubr.bf16.gmra.mrb[24].mxu0 %v5309_v4  ;;  %v4719_v4 = vld [vmem:[%s8148_s3 + $0x1b0] sm:$0xff] }
  0x95   :  { %645 = vmatprep.mubr.bf16.mxu0 %v8154_v7 }
  0x96   :  { %2433 = vperm.xlu1 %5294, %v4634_v11   ;;  %v5914_v20 = vpop.permute.xlu0 %1094  ;;  %v5976_v42 = vpop.permute.xlu1 %1099  ;;  %v4686_v11 = vld [vmem:[%s8150_s5 + $0x168] sm:$0xff] }
  0x97   :  { %2438 = vperm.xlu0 %5293, %v4635_v12   ;;  %v4723_v12 = vld [vmem:[%s8148_s3 + $0x1d0] sm:$0xff] }
  0x98   :  { %916 = vmatmul.mubr.bf16.gmra.mrb[36].mxu1 %v5320_v39 }
  0x99   :  { %925 = vmatprep.mubr.bf16.mxu1 %v8154_v7 }
  0x9a   :  { %2443 = vperm.xlu1 %5294, %v4636_v13   ;;  %v5919_v22 = vpop.permute.xlu0 %1104  ;;  %v5992_v48 = vpop.permute.xlu1 %1109  ;;  %v4688_v13 = vld [vmem:[%s8150_s5 + $0x178] sm:$0xff] }
  0x9b   :  { %2448 = vperm.xlu0 %5293, %v4637_v14  }
  0x9c   :  { %646 = vmatmul.mubr.bf16.gmra.mrb[28].mxu0 %v5310_v10 }
  0x9d   :  { %655 = vmatprep.mubr.bf16.mxu0 %v8154_v7 }
  0x9e   :  { %v5930_v26 = vpop.permute.xlu0 %1114  ;;  %2453 = vperm.xlu1 %5294, %v4638_v27   ;;  %v6008_v54 = vpop.permute.xlu1 %1119  ;;  %v4716_v27 = vld [vmem:[%s8148_s3 + $0x198] sm:$0xff] }
  0x9f   :  { %2458 = vperm.xlu0 %5293, %v4639_v16  }
  0xa0   :  { %926 = vmatmul.mubr.bf16.gmra.mrb[40].mxu1 %v5321_v46  ;;  %v4759_v46 = vld [vmem:[%s8150_s5 + $0x1b0] sm:$0xff] }
  0xa1   :  { %935 = vmatprep.mubr.bf16.mxu1 %v8154_v7 }
  0xa2   :  { %2463 = vperm.xlu1 %5294, %v4640_v29   ;;  %v5947_v32 = vpop.permute.xlu0 %1124  ;;  %v6025_v60 = vpop.permute.xlu1 %1129  ;;  %v4753_v29 = vld [vmem:[%s8150_s5 + $0x180] sm:$0xff] }
  0xa3   :  { %2468 = vperm.xlu0 %5293, %v4641_v18   ;;  %v5325_v18 = vld [vmem:[%s8146_s1 + $0x178] sm:$0xff]  }
  0xa6   :  { %2473 = vperm.xlu1 %5294, %v4642_v34   ;;  %v5964_v38 = vpop.permute.xlu0 %1134  ;;  %v6044_v3 = vpop.permute.xlu1 %1139 }
  0xa7   :  { %2478 = vperm.xlu0 %5293, %v4643_v19   ;;  %v4725_v19 = vld [vmem:[%s8148_s3 + $0x1e0] sm:$0xff] }
  0xa8   :  { %936 = vmatmul.mubr.bf16.gmra.mrb[44].mxu1 %v5322_v55  ;;  %v4726_v55 = vld [vmem:[%s8148_s3 + $0x1e8] sm:$0xff] }
  0xa9   :  { %945 = vmatprep.mubr.bf16.mxu1 %v8154_v7 }
  0xaa   :  { %2483 = vperm.xlu1 %5294, %v4644_v37   ;;  %v5978_v43 = vpop.permute.xlu0 %1144  ;;  %v6060_v10 = vpop.permute.xlu1 %1149  ;;  %v4720_v37 = vld [vmem:[%s8148_s3 + $0x1b8] sm:$0xff] }
  0xab   :  { %2488 = vperm.xlu0 %5293, %v4645_v21   ;;  %v4714_v21 = vld [vmem:[%s8148_s3 + $0x188] sm:$0xff] }
  0xae   :  { %2493 = vperm.xlu1 %5294, %v4646_v41   ;;  %v5994_v49 = vpop.permute.xlu0 %1379  ;;  %v6074_v16 = vpop.permute.xlu1 %1384  ;;  %v4757_v41 = vld [vmem:[%s8150_s5 + $0x1a0] sm:$0xff] }
  0xaf   :  { %2498 = vperm.xlu0 %5293, %v4647_v23  }
  0xb0   :  { %946 = vmatmul.mubr.bf16.gmra.mrb[48].mxu1 %v5323_v63  ;;  %v4765_v63 = vld [vmem:[%s8150_s5 + $0x1e0] sm:$0xff] }
  0xb1   :  { %955 = vmatprep.mubr.bf16.mxu1 %v8154_v7 }
  0xb2   :  { %2503 = vperm.xlu1 %5294, %v4648_v45   ;;  %v6006_v53 = vpop.permute.xlu0 %1389  ;;  %v6086_v23 = vpop.permute.xlu1 %1394 }
  0xb3   :  { %2735 = vperm.xlu0 %5293, %v4673_v25   ;;  %v4727_v25 = vld [vmem:[%s8148_s3 + $0x1f0] sm:$0xff] }
  0xb6   :  { %2740 = vperm.xlu1 %5294, %v4674_v50   ;;  %v6016_v57 = vpop.permute.xlu0 %1399 }
  0xb7   :  { %2745 = vperm.xlu0 %5293, %v4675_v28   ;;  %v6096_v28 = vpop.permute.xlu1 %1404 }
  0xb8   :  { %956 = vmatmul.mubr.bf16.gmra.mrb[52].mxu1 %v5324_v6  ;;  %v4756_v6 = vld [vmem:[%s8150_s5 + $0x198] sm:$0xff] }
  0xb9   :  { %965 = vmatprep.mubr.bf16.mxu1 %v8154_v7 }
  0xba   :  { %2750 = vperm.xlu1 %5294, %v4676_v52   ;;  %v6030_v62 = vpop.permute.xlu0 %1409  ;;  %v4761_v52 = vld [vmem:[%s8150_s5 + $0x1c0] sm:$0xff] }
  0xbb   :  { %2755 = vperm.xlu0 %5293, %v4677_v33   ;;  %v6106_v34 = vpop.permute.xlu1 %1414 }
  0xbe   :  { %2760 = vperm.xlu1 %5294, %v4678_v58   ;;  %v6038_v1 = vpop.permute.xlu0 %1419  ;;  %v4763_v58 = vld [vmem:[%s8150_s5 + $0x1d0] sm:$0xff] }
  0xbf   :  { %2765 = vperm.xlu0 %5293, %v4679_v35   ;;  %v4755_v35 = vld [vmem:[%s8150_s5 + $0x190] sm:$0xff]  ;;  %v6114_v39 = vpop.permute.xlu1 %1424 }
  0xc0   :  { %966 = vmatmul.mubr.bf16.gmra.mrb[56].mxu1 %v5325_v18  ;;  %v4795_v18 = vld [vmem:[%s8148_s3 + $0x210] sm:$0xff] }
  0xc1   :  { %1232 = vmatprep.mubr.bf16.mxu1 %v8154_v7 }
  0xc2   :  { %2770 = vperm.xlu1 %5294, %v4680_v61   ;;  %v6055_v8 = vpop.permute.xlu0 %1429 }
  0xc3   :  { %2775 = vperm.xlu0 %5293, %v4681_v40   ;;  %8284 = vst [vmem:[#allocation5_spill] sm:$0xff] %v6055_v8  ;;  %v6124_v45 = vpop.permute.xlu1 %1434 }
  0xc4   :  { %8289 = vst [vmem:[#allocation10_spill] sm:$0xff] %v6124_v45 }
  0xc6   :  { %2780 = vperm.xlu1 %5294, %v4682_v2   ;;  %v6072_v14 = vpop.permute.xlu0 %1439 }
  0xc7   :  { %2785 = vperm.xlu0 %5293, %v4683_v44   ;;  %8285 = vst [vmem:[#allocation6_spill] sm:$0xff] %v6072_v14  ;;  %v4722_v44 = vld [vmem:[%s8148_s3 + $0x1c8] sm:$0xff] }
  0xca   :  { %2790 = vperm.xlu1 %5294, %v4684_v5   ;;  %v6088_v24 = vpop.permute.xlu0 %1449  ;;  %v4767_v5 = vld [vmem:[%s8150_s5 + $0x1f0] sm:$0xff] }
  0xcb   :  { %2795 = vperm.xlu0 %5293, %v4685_v47   ;;  %8286 = vst [vmem:[#allocation7_spill] sm:$0xff] %v6088_v24  ;;  %v4724_v47 = vld [vmem:[%s8148_s3 + $0x1d8] sm:$0xff] }
  0xce   :  { %2800 = vperm.xlu1 %5294, %v4686_v11   ;;  %v6104_v33 = vpop.permute.xlu0 %1750  ;;  %v4793_v11 = vld [vmem:[%s8148_s3 + $0x200] sm:$0xff] }
  0xcf   :  { %2805 = vperm.xlu0 %5293, %v4687_v51   ;;  %8287 = vst [vmem:[#allocation8_spill] sm:$0xff] %v6104_v33  ;;  %v6134_v51 = vpop.permute.xlu1 %1444 }
  0xd0   :  { %8291 = vst [vmem:[#allocation12_spill] sm:$0xff] %v6134_v51 }
  0xd2   :  { %2810 = vperm.xlu1 %5294, %v4688_v13   ;;  %v6116_v40 = vpop.permute.xlu0 %1760 }
  0xd3   :  { %3106 = vperm.xlu0 %5293, %v4713_v56   ;;  %8288 = vst [vmem:[#allocation9_spill] sm:$0xff] %v6116_v40  ;;  %v6150_v61 = vpop.permute.xlu1 %1454 }
  0xd4   :  { %8293 = vst [vmem:[#allocation14_spill] sm:$0xff] %v6150_v61 }
  0xd6   :  { %3111 = vperm.xlu1 %5294, %v4714_v21   ;;  %v6132_v50 = vpop.permute.xlu0 %1770 }
  0xd7   :  { %3116 = vperm.xlu0 %5293, %v4715_v59   ;;  %8290 = vst [vmem:[#allocation11_spill] sm:$0xff] %v6132_v50  ;;  %v4728_v59 = vld [vmem:[%s8148_s3 + $0x1f8] sm:$0xff] }
  0xda   :  { %3121 = vperm.xlu1 %5294, %v4716_v27   ;;  %v6142_v56 = vpop.permute.xlu0 %1780  ;;  %v4797_v27 = vld [vmem:[%s8148_s3 + $0x220] sm:$0xff] }
  0xdb   :  { %3126 = vperm.xlu0 %5293, %v4717_v0   ;;  %8292 = vst [vmem:[#allocation13_spill] sm:$0xff] %v6142_v56  ;;  %v4754_v0 = vld [vmem:[%s8150_s5 + $0x188] sm:$0xff] }
  0xde   :  { %3131 = vperm.xlu1 %5294, %v4718_v31   ;;  %v6158_v2 = vpop.permute.xlu0 %1790 }
  0xdf   :  { %3136 = vperm.xlu0 %5293, %v4719_v4   ;;  %8294 = vst [vmem:[#allocation15_spill] sm:$0xff] %v6158_v2  ;;  %v6160_v4 = vpop.permute.xlu1 %1755 }
  0xe0   :  { %8295 = vst [vmem:[#allocation16_spill] sm:$0xff] %v6160_v4 }
  0xe2   :  { %3141 = vperm.xlu1 %5294, %v4720_v37   ;;  %v4764_v37 = vld [vmem:[%s8150_s5 + $0x1d8] sm:$0xff] }
  0xe3   :  { %3146 = vperm.xlu0 %5293, %v4721_v9   ;;  %v6168_v9 = vpop.permute.xlu0 %1800  ;;  %v6176_v13 = vpop.permute.xlu1 %1765 }
  0xe4   :  { %8296 = vst [vmem:[#allocation17_spill] sm:$0xff] %v6168_v9  ;;  %8297 = vst [vmem:[#allocation18_spill] sm:$0xff] %v6176_v13 }
  0xe6   :  { %3151 = vperm.xlu1 %5294, %v4722_v44   ;;  %v4801_v44 = vld [vmem:[%s8148_s3 + $0x240] sm:$0xff] }
  0xe7   :  { %3156 = vperm.xlu0 %5293, %v4723_v12   ;;  %v4758_v12 = vld [vmem:[%s8150_s5 + $0x1a8] sm:$0xff]  ;;  %v6184_v21 = vpop.permute.xlu0 %1810 }
  0xe8   :  { %8298 = vst [vmem:[#allocation19_spill] sm:$0xff] %v6184_v21 }
  0xea   :  { %3161 = vperm.xlu1 %5294, %v4724_v47  }
  0xeb   :  { %3166 = vperm.xlu0 %5293, %v4725_v19   ;;  %v4760_v19 = vld [vmem:[%s8150_s5 + $0x1b8] sm:$0xff]  ;;  %v6194_v31 = vpop.permute.xlu0 %1820 }
  0xec   :  { %8300 = vst [vmem:[#allocation21_spill] sm:$0xff] %v6194_v31 }
  0xee   :  { %3171 = vperm.xlu1 %5294, %v4726_v55   ;;  %v4803_v55 = vld [vmem:[%s8148_s3 + $0x250] sm:$0xff] }
  0xef   :  { %3176 = vperm.xlu0 %5293, %v4727_v25   ;;  %v6186_v25 = vpop.permute.xlu1 %1775  ;;  %v6210_v47 = vpop.permute.xlu0 %2057 }
  0xf0   :  { %8299 = vst [vmem:[#allocation20_spill] sm:$0xff] %v6186_v25  ;;  %8302 = vst [vmem:[#allocation23_spill] sm:$0xff] %v6210_v47 }
  0xf2   :  { %3181 = vperm.xlu1 %5294, %v4728_v59  }
  0xf3   :  { %3413 = vperm.xlu0 %5293, %v4753_v29   ;;  %v4762_v29 = vld [vmem:[%s8150_s5 + $0x1c8] sm:$0xff]  ;;  %v6220_v59 = vpop.permute.xlu0 %2067 }
  0xf4   :  { %8304 = vst [vmem:[#allocation25_spill] sm:$0xff] %v6220_v59 }
  0xf6   :  { %3418 = vperm.xlu1 %5294, %v4754_v0   ;;  %v4794_v0 = vld [vmem:[%s8148_s3 + $0x208] sm:$0xff] }
  0xf7   :  { %3423 = vperm.xlu0 %5293, %v4755_v35   ;;  %v4799_v35 = vld [vmem:[%s8148_s3 + $0x230] sm:$0xff] }
  0xfa   :  { %3428 = vperm.xlu1 %5294, %v4756_v6   ;;  %v4807_v6 = vld [vmem:[%s8148_s3 + $0x270] sm:$0xff] }
  0xfb   :  { %3433 = vperm.xlu0 %5293, %v4757_v41   ;;  %v6202_v41 = vpop.permute.xlu1 %1785 }
  0xfc   :  { %8301 = vst [vmem:[#allocation22_spill] sm:$0xff] %v6202_v41 }
  0xfe   :  { %3438 = vperm.xlu1 %5294, %v4758_v12   ;;  %v6236_v12 = vpop.f32.mrb[0].mxu1 }
  0xff   :  { %3443 = vperm.xlu0 %5293, %v4759_v46   ;;  %v4766_v46 = vld [vmem:[%s8150_s5 + $0x1e8] sm:$0xff]  ;;  %8306 = vst [vmem:[#allocation27_spill] sm:$0xff] %v6236_v12 }
 0x102   :  { %3448 = vperm.xlu1 %5294, %v4760_v19   ;;  %v6240_v19 = vpop.permute.xlu0 %2077 }
 0x103   :  { %3453 = vperm.xlu0 %5293, %v4761_v52   ;;  %v6212_v52 = vpop.permute.xlu1 %1795  ;;  %8308 = vst [vmem:[#allocation29_spill] sm:$0xff] %v6240_v19 }
 0x104   :  { %8303 = vst [vmem:[#allocation24_spill] sm:$0xff] %v6212_v52 }
 0x106   :  { %3458 = vperm.xlu1 %5294, %v4762_v29   ;;  %v6282_v12 = vpop.permute.xlu0 %2087 }
 0x107   :  { %3463 = vperm.xlu0 %5293, %v4763_v58   ;;  %v4768_v58 = vld [vmem:[%s8150_s5 + $0x1f8] sm:$0xff]  ;;  %8316 = vst [vmem:[#allocation36_spill] sm:$0xff] %v6282_v12 }
 0x10a   :  { %3468 = vperm.xlu1 %5294, %v4764_v37   ;;  %v4833_v37 = vld [vmem:[%s8150_s5 + $0x200] sm:$0xff] }
 0x10b   :  { %3473 = vperm.xlu0 %5293, %v4765_v63   ;;  %v4805_v63 = vld [vmem:[%s8148_s3 + $0x260] sm:$0xff] }
 0x10e   :  { %3478 = vperm.xlu1 %5294, %v4766_v46  }
 0x10f   :  { %3483 = vperm.xlu0 %5293, %v4767_v5   ;;  %v6228_v5 = vpop.permute.xlu1 %1805 }
 0x110   :  { %8305 = vst [vmem:[#allocation26_spill] sm:$0xff] %v6228_v5 }
 0x112   :  { %3488 = vperm.xlu1 %5294, %v4768_v58  }
 0x113   :  { %3784 = vperm.xlu0 %5293, %v4793_v11   ;;  %v4796_v11 = vld [vmem:[%s8148_s3 + $0x218] sm:$0xff] }
 0x116   :  { %3789 = vperm.xlu1 %5294, %v4794_v0  }
 0x117   :  { %3794 = vperm.xlu0 %5293, %v4795_v18   ;;  %v6238_v18 = vpop.f32.mrb[1].mxu1 }
 0x118   :  { %8307 = vst [vmem:[#allocation28_spill] sm:$0xff] %v6238_v18  ;;  %v6244_v29 = vpop.f32.mrb[2].mxu1 }
 0x119   :  { %8310 = vst [vmem:[#allocation31_spill] sm:$0xff] %v6244_v29  ;;  %v6254_v46 = vpop.f32.mrb[3].mxu1 }
 0x11a   :  { %3799 = vperm.xlu1 %5294, %v4796_v11   ;;  %8311 = vst [vmem:[#allocation32_spill] sm:$0xff] %v6254_v46  ;;  %v6258_v58 = vpop.f32.mrb[4].mxu1  ;;  %v5334_v11 = vld [vmem:[%s8146_s1 + $0x80] sm:$0xff]   ;;  %v4800_v46 = vld [vmem:[%s8148_s3 + $0x238] sm:$0xff] }
 0x11b   :  { %3804 = vperm.xlu0 %5293, %v4797_v27   ;;  %v6242_v27 = vpop.permute.xlu1 %1815  ;;  %8312 = vst [vmem:[#allocation33_spill] sm:$0xff] %v6258_v58  ;;  %v4835_v58 = vld [vmem:[%s8150_s5 + $0x210] sm:$0xff]  ;;  %v6277_v29 = vpop.f32.mrb[5].mxu1  ;;  %656 = vmatmul.mubr.bf16.gmra.mrb[32].mxu0 %v5334_v11  ;;  %v4802_v11 = vld [vmem:[%s8148_s3 + $0x248] sm:$0xff] }
 0x11c   :  { %8309 = vst [vmem:[#allocation30_spill] sm:$0xff] %v6242_v27  ;;  %8313 = vst [vmem:[#allocation34_spill] sm:$0xff] %v6277_v29  ;;  %v6279_v18 = vpop.f32.mrb[6].mxu1 }
 0x11d   :  { %8314 = vst [vmem:[#allocation35_spill] sm:$0xff] %v6279_v18  ;;  %v6284_v19 = vpop.f32.mrb[7].mxu1 }
 0x11e   :  { %8317 = vst [vmem:[#allocation37_spill] sm:$0xff] %v6284_v19  ;;  %v6290_v31 = vpop.f32.mrb[8].mxu1 }
 0x11f   :  { %3814 = vperm.xlu0 %5293, %v4799_v35   ;;  %v6288_v47 = vpop.permute.xlu1 %1825  ;;  %8319 = vst [vmem:[#allocation39_spill] sm:$0xff] %v6290_v31  ;;  %v6300_v19 = vpop.f32.mrb[9].mxu1 }
 0x120   :  { %8318 = vst [vmem:[#allocation38_spill] sm:$0xff] %v6288_v47  ;;  %8320 = vst [vmem:[#allocation40_spill] sm:$0xff] %v6300_v19 }
 0x123   :  { %3824 = vperm.xlu0 %5293, %v4801_v44   ;;  %v4798_v44 = vld [vmem:[%s8148_s3 + $0x228] sm:$0xff]  ;;  %v6334_v5 = vpop.permute.xlu1 %2062 }
 0x124   :  { %3809 = vperm.xlu1 %5294, %v4798_v44   ;;  %8326 = vst [vmem:[#allocation46_spill] sm:$0xff] %v6334_v5 }
 0x127   :  { %3834 = vperm.xlu0 %5293, %v4803_v55   ;;  %v6380_v41 = vpop.permute.xlu1 %2072 }
 0x128   :  { %3819 = vperm.xlu1 %5294, %v4800_v46   ;;  %v5335_v46 = vld [vmem:[%s8146_s1 + $0x88] sm:$0xff]   ;;  %8334 = vst [vmem:[#allocation54_spill] sm:$0xff] %v6380_v41 }
 0x12b   :  { %3844 = vperm.xlu0 %5293, %v4805_v63   ;;  %v6426_v13 = vpop.permute.xlu1 %2082 }
 0x12c   :  { %3829 = vperm.xlu1 %5294, %v4802_v11   ;;  %8342 = vst [vmem:[#allocation62_spill] sm:$0xff] %v6426_v13 }
 0x12f   :  { %3854 = vperm.xlu0 %5293, %v4807_v6  }
 0x133   :  { %4091 = vperm.xlu0 %5293, %v4833_v37   ;;  %v8315_v37 = vmov 0  }
 0x134   :  { %665 = vmatprep.mubr.bf16.mxu0 %v8315_v37 }
 0x135   :  { %666 = vmatmul.mubr.bf16.gmra.mrb[36].mxu0 %v5335_v46  ;;  %v4806_v46 = vld [vmem:[%s8148_s3 + $0x268] sm:$0xff] }
 0x136   :  { %675 = vmatprep.mubr.bf16.mxu0 %v8315_v37 }
 0x137   :  { %v6246_v35 = vpop.f32.mrb[0].mxu0  ;;  %4101 = vperm.xlu0 %5293, %v4835_v58   ;;  %v6304_v58 = vpop.f32.mrb[10].mxu1 }
 0x138   :  { %v6256_v55 = vpop.f32.mrb[1].mxu0  ;;  %8321 = vst [vmem:[#allocation41_spill] sm:$0xff] %v6304_v58  ;;  %v4804_v58 = vld [vmem:[%s8148_s3 + $0x258] sm:$0xff]  ;;  %v6323_v12 = vpop.f32.mrb[11].mxu1 }
 0x139   :  { %v6260_v63 = vpop.f32.mrb[2].mxu0  ;;  %8322 = vst [vmem:[#allocation42_spill] sm:$0xff] %v6323_v12  ;;  %v6325_v47 = vpop.f32.mrb[12].mxu1  ;;  %3839 = vperm.xlu1 %5294, %v4804_v58   ;;  %v5336_v58 = vld [vmem:[%s8146_s1 + $0x90] sm:$0xff]  }
 0x13a   :  { %v1024_v0 = vpack.c.bf16 %v6260_v63, %v6246_v35  ;;  %v6264_v6 = vpop.f32.mrb[3].mxu0  ;;  %8323 = vst [vmem:[#allocation43_spill] sm:$0xff] %v6325_v47  ;;  %v6330_v11 = vpop.f32.mrb[13].mxu1 }
 0x13b   :  { %v1025_v7 = vpack.c.bf16 %v6264_v6, %v6256_v55  ;;  %8325 = vst [vmem:[#allocation45_spill] sm:$0xff] %v6330_v11  ;;  %v6336_v9 = vpop.f32.mrb[14].mxu1 }
 0x13c   :  { %v1040_v59 = vmax.bf16 %v8315_v37, %v1024_v0  ;;  %8327 = vst [vmem:[#allocation47_spill] sm:$0xff] %v6336_v9  ;;  %v6346_v11 = vpop.f32.mrb[15].mxu1 }
 0x13d   :  { %v1041_v44 = vmax.bf16 %v8315_v37, %v1025_v7  ;;  %v4837_v7 = vld [vmem:[%s8150_s5 + $0x220] sm:$0xff]  ;;  %8328 = vst [vmem:[#allocation48_spill] sm:$0xff] %v6346_v11  ;;  %3849 = vperm.xlu1 %5294, %v4806_v46   ;;  %676 = vmatmul.mubr.bf16.gmra.mrb[40].mxu0 %v5336_v58  ;;  %v4834_v58 = vld [vmem:[%s8150_s5 + $0x208] sm:$0xff] }
 0x13e   :  { %4111 = vperm.xlu0 %5293, %v4837_v7   ;;  %v6328_v7 = vpop.permute.xlu0 %2097  ;;  %685 = vmatprep.mubr.bf16.mxu0 %v8315_v37 }
 0x13f   :  { %v6292_v29 = vpop.f32.mrb[4].mxu0  ;;  %1200 = vmatprep.subr.bf16.mxu1 %v1041_v44  ;;  %8324 = vst [vmem:[#allocation44_spill] sm:$0xff] %v6328_v7 }
 0x140   :  { %v6302_v0 = vpop.f32.mrb[5].mxu0  ;;  %1201 = vmatpush1.bf16.msra.mxu1 %v1040_v59  ;;  %v4839_v59 = vld [vmem:[%s8150_s5 + $0x230] sm:$0xff] }
 0x141   :  { %v6309_v44 = vpop.f32.mrb[6].mxu0 }
 0x142   :  { %v1026_v31 = vpack.c.bf16 %v6309_v44, %v6292_v29  ;;  %v6313_v18 = vpop.f32.mrb[7].mxu0  ;;  %4121 = vperm.xlu0 %5293, %v4839_v59   ;;  %v6350_v59 = vpop.f32.mrb[16].mxu1 }
 0x143   :  { %v1027_v19 = vpack.c.bf16 %v6313_v18, %v6302_v0  ;;  %8329 = vst [vmem:[#allocation49_spill] sm:$0xff] %v6350_v59  ;;  %v4808_v59 = vld [vmem:[%s8148_s3 + $0x278] sm:$0xff]  ;;  %v6369_v7 = vpop.f32.mrb[17].mxu1 }
 0x144   :  { %v1042_v21 = vmax.bf16 %v8315_v37, %v1026_v31  ;;  %8330 = vst [vmem:[#allocation50_spill] sm:$0xff] %v6369_v7  ;;  %v6371_v5 = vpop.f32.mrb[18].mxu1  ;;  %3859 = vperm.xlu1 %5294, %v4808_v59   ;;  %v5337_v59 = vld [vmem:[%s8146_s1 + $0x98] sm:$0xff]  }
 0x145   :  { %v1043_v27 = vmax.bf16 %v8315_v37, %v1027_v19  ;;  %v4841_v19 = vld [vmem:[%s8150_s5 + $0x240] sm:$0xff]  ;;  %8331 = vst [vmem:[#allocation51_spill] sm:$0xff] %v6371_v5  ;;  %v6376_v46 = vpop.f32.mrb[19].mxu1  ;;  %686 = vmatmul.mubr.bf16.gmra.mrb[44].mxu0 %v5337_v59 }
 0x146   :  { %4131 = vperm.xlu0 %5293, %v4841_v19   ;;  %v6374_v19 = vpop.permute.xlu0 %2107  ;;  %8333 = vst [vmem:[#allocation53_spill] sm:$0xff] %v6376_v46  ;;  %v6382_v56 = vpop.f32.mrb[20].mxu1  ;;  %695 = vmatprep.mubr.bf16.mxu0 %v8315_v37  ;;  %v4395_v59 = vld [vmem:[%s8152_s7] sm:$0x7] }
 0x147   :  { %v6338_v12 = vpop.f32.mrb[8].mxu0  ;;  %1202 = vmatprep.subr.bf16.mxu1 %v1043_v27  ;;  %8332 = vst [vmem:[#allocation52_spill] sm:$0xff] %v6374_v19  ;;  %8335 = vst [vmem:[#allocation55_spill] sm:$0xff] %v6382_v56  ;;  %v6392_v46 = vpop.f32.mrb[21].mxu1 }
 0x148   :  { %v6348_v31 = vpop.f32.mrb[9].mxu0  ;;  %1203 = vmatpush1.bf16.msra.mxu1 %v1042_v21  ;;  %v4843_v21 = vld [vmem:[%s8150_s5 + $0x250] sm:$0xff]  ;;  %8336 = vst [vmem:[#allocation56_spill] sm:$0xff] %v6392_v46  ;;  %4096 = vperm.xlu1 %5294, %v4834_v58  }
 0x149   :  { %v6355_v27 = vpop.f32.mrb[10].mxu0 }
 0x14a   :  { %v1028_v9 = vpack.c.bf16 %v6355_v27, %v6338_v12  ;;  %v6359_v47 = vpop.f32.mrb[11].mxu0  ;;  %4141 = vperm.xlu0 %5293, %v4843_v21   ;;  %v6396_v21 = vpop.f32.mrb[22].mxu1 }
 0x14b   :  { %v1029_v11 = vpack.c.bf16 %v6359_v47, %v6348_v31  ;;  %8337 = vst [vmem:[#allocation57_spill] sm:$0xff] %v6396_v21  ;;  %v4836_v21 = vld [vmem:[%s8150_s5 + $0x218] sm:$0xff]  ;;  %v6415_v19 = vpop.f32.mrb[23].mxu1  ;;  %v6417_v41 = vpop.permute.xlu0 %2117 }
 0x14c   :  { %v1044_v2 = vmax.bf16 %v8315_v37, %v1028_v9  ;;  %8338 = vst [vmem:[#allocation58_spill] sm:$0xff] %v6415_v19  ;;  %8339 = vst [vmem:[#allocation59_spill] sm:$0xff] %v6417_v41  ;;  %v6419_v25 = vpop.f32.mrb[24].mxu1  ;;  %4106 = vperm.xlu1 %5294, %v4836_v21   ;;  %v5338_v21 = vld [vmem:[%s8146_s1 + $0xa0] sm:$0xff]   ;;  %v6458_v41 = vpop.permute.xlu1 %2092 }
 0x14d   :  { %v1045_v52 = vmax.bf16 %v8315_v37, %v1029_v11  ;;  %v4845_v11 = vld [vmem:[%s8150_s5 + $0x260] sm:$0xff]  ;;  %8340 = vst [vmem:[#allocation60_spill] sm:$0xff] %v6419_v25  ;;  %v6422_v58 = vpop.f32.mrb[25].mxu1  ;;  %8346 = vst [vmem:[#allocation66_spill] sm:$0xff] %v6458_v41  ;;  %696 = vmatmul.mubr.bf16.gmra.mrb[48].mxu0 %v5338_v21  ;;  %v5339_v21 = vld [vmem:[%s8146_s1 + $0xa8] sm:$0xff]  }
 0x14e   :  { %4151 = vperm.xlu0 %5293, %v4845_v11   ;;  %8341 = vst [vmem:[#allocation61_spill] sm:$0xff] %v6422_v58  ;;  %v6428_v40 = vpop.f32.mrb[26].mxu1  ;;  %705 = vmatprep.mubr.bf16.mxu0 %v8315_v37 }
 0x14f   :  { %v6384_v7 = vpop.f32.mrb[12].mxu0  ;;  %1204 = vmatprep.subr.bf16.mxu1 %v1045_v52  ;;  %8343 = vst [vmem:[#allocation63_spill] sm:$0xff] %v6428_v40  ;;  %v6438_v58 = vpop.f32.mrb[27].mxu1 }
 0x150   :  { %v6394_v9 = vpop.f32.mrb[13].mxu0  ;;  %1205 = vmatpush1.bf16.msra.mxu1 %v1044_v2  ;;  %v4847_v2 = vld [vmem:[%s8150_s5 + $0x270] sm:$0xff]  ;;  %8344 = vst [vmem:[#allocation64_spill] sm:$0xff] %v6438_v58  ;;  %v6451_v25 = vpop.permute.xlu0 %2127 }
 0x151   :  { %v6401_v52 = vpop.f32.mrb[14].mxu0  ;;  %8345 = vst [vmem:[#allocation65_spill] sm:$0xff] %v6451_v25  ;;  %v6479_v41 = vpop.permute.xlu1 %2102 }
 0x152   :  { %v1030_v56 = vpack.c.bf16 %v6401_v52, %v6384_v7  ;;  %v6405_v5 = vpop.f32.mrb[15].mxu0  ;;  %4161 = vperm.xlu0 %5293, %v4847_v2   ;;  %8350 = vst [vmem:[#allocation70_spill] sm:$0xff] %v6479_v41 }
 0x153   :  { %v1031_v46 = vpack.c.bf16 %v6405_v5, %v6394_v9 }
 0x154   :  { %v1046_v50 = vmax.bf16 %v8315_v37, %v1030_v56 }
 0x155   :  { %v1047_v11 = vmax.bf16 %v8315_v37, %v1031_v46  ;;  %v4838_v46 = vld [vmem:[%s8150_s5 + $0x228] sm:$0xff]  ;;  %706 = vmatmul.mubr.bf16.gmra.mrb[52].mxu0 %v5339_v21  ;;  %v6496_v51 = vpop.permute.xlu1 %2112  ;;  %v5340_v21 = vld [vmem:[%s8146_s1 + $0xb0] sm:$0xff]  }
 0x156   :  { %4398 = vperm.xlu0 %5293, %v4395_v59   ;;  %4116 = vperm.xlu1 %5294, %v4838_v46   ;;  %v4842_v59 = vld [vmem:[%s8150_s5 + $0x248] sm:$0xff]  ;;  %8353 = vst [vmem:[#allocation73_spill] sm:$0xff] %v6496_v51 }
 0x157   :  { %v6430_v19 = vpop.f32.mrb[16].mxu0  ;;  %1206 = vmatprep.subr.bf16.mxu1 %v1047_v11  ;;  %715 = vmatprep.mubr.bf16.mxu0 %v8315_v37 }
 0x158   :  { %v6440_v56 = vpop.f32.mrb[17].mxu0  ;;  %1207 = vmatpush1.bf16.msra.mxu1 %v1046_v50  ;;  %v4840_v50 = vld [vmem:[%s8150_s5 + $0x238] sm:$0xff] }
 0x159   :  { %v6445_v2 = vpop.f32.mrb[18].mxu0  ;;  %v6515_v45 = vpop.permute.xlu1 %2122 }
 0x15a   :  { %v1032_v11 = vpack.c.bf16 %v6445_v2, %v6430_v19  ;;  %v6449_v40 = vpop.f32.mrb[19].mxu0  ;;  %4126 = vperm.xlu1 %5294, %v4840_v50   ;;  %8356 = vst [vmem:[#allocation76_spill] sm:$0xff] %v6515_v45  ;;  %v5342_v45 = vld [vmem:[%s8146_s1 + $0xc0] sm:$0xff]  }
 0x15b   :  { %v1033_v58 = vpack.c.bf16 %v6449_v40, %v6440_v56 }
 0x15c   :  { %v1048_v4 = vmax.bf16 %v8315_v37, %v1032_v11 }
 0x15d   :  { %v1049_v13 = vmax.bf16 %v8315_v37, %v1033_v58  ;;  %716 = vmatmul.mubr.bf16.gmra.mrb[56].mxu0 %v5340_v21 }
 0x15e   :  { %4136 = vperm.xlu1 %5294, %v4842_v59   ;;  %v4846_v59 = vld [vmem:[%s8150_s5 + $0x268] sm:$0xff]  ;;  %725 = vmatprep.mubr.bf16.mxu0 %v8315_v37 }
 0x15f   :  { %v6463_v25 = vpop.f32.mrb[20].mxu0  ;;  %1208 = vmatprep.subr.bf16.mxu1 %v1049_v13 }
 0x160   :  { %v6468_v46 = vpop.f32.mrb[21].mxu0  ;;  %1209 = vmatpush1.bf16.msra.mxu1 %v1048_v4  ;;  %v4844_v4 = vld [vmem:[%s8150_s5 + $0x258] sm:$0xff] }
 0x161   :  { %8347 = vst [vmem:[#allocation67_spill] sm:$0xff] %v6468_v46  ;;  %v6473_v58 = vpop.f32.mrb[22].mxu0 }
 0x162   :  { %8348 = vst [vmem:[#allocation68_spill] sm:$0xff] %v6473_v58  ;;  %v1034_v11 = vpack.c.bf16 %v6473_v58, %v6463_v25  ;;  %v6477_v50 = vpop.f32.mrb[23].mxu0  ;;  %4146 = vperm.xlu1 %5294, %v4844_v4  }
 0x163   :  { %8349 = vst [vmem:[#allocation69_spill] sm:$0xff] %v6477_v50  ;;  %v1035_v13 = vpack.c.bf16 %v6477_v50, %v6468_v46 }
 0x164   :  { %v1050_v61 = vmax.bf16 %v8315_v37, %v1034_v11 }
 0x165   :  { %v1051_v33 = vmax.bf16 %v8315_v37, %v1035_v13 }
 0x166   :  { %4156 = vperm.xlu1 %5294, %v4846_v59  }
 0x167   :  { %v6489_v24 = vpop.f32.mrb[24].mxu0  ;;  %1210 = vmatprep.subr.bf16.mxu1 %v1051_v33 }
 0x168   :  { %8351 = vst [vmem:[#allocation71_spill] sm:$0xff] %v6489_v24  ;;  %v6494_v41 = vpop.f32.mrb[25].mxu0  ;;  %1211 = vmatpush1.bf16.msra.mxu1 %v1050_v61  ;;  %v4848_v61 = vld [vmem:[%s8150_s5 + $0x278] sm:$0xff] }
 0x169   :  { %8352 = vst [vmem:[#allocation72_spill] sm:$0xff] %v6494_v41  ;;  %v6501_v13 = vpop.f32.mrb[26].mxu0 }
 0x16a   :  { %8354 = vst [vmem:[#allocation74_spill] sm:$0xff] %v6501_v13  ;;  %v1036_v11 = vpack.c.bf16 %v6501_v13, %v6489_v24  ;;  %v6505_v4 = vpop.f32.mrb[27].mxu0  ;;  %4166 = vperm.xlu1 %5294, %v4848_v61   ;;  %v5326_v61 = vld [vmem:[%s8147_s2] sm:$0xff]  }
 0x16b   :  { %8355 = vst [vmem:[#allocation75_spill] sm:$0xff] %v6505_v4  ;;  %v1037_v33 = vpack.c.bf16 %v6505_v4, %v6494_v41  ;;  %v5341_v4 = vld [vmem:[%s8146_s1 + $0xb8] sm:$0xff]  }
 0x16c   :  { %v1052_v14 = vmax.bf16 %v8315_v37, %v1036_v11  ;;  %726 = vmatmul.mubr.bf16.gmra.mrb[60].mxu0 %v5341_v4  ;;  %v5327_v4 = vld [vmem:[%s8147_s2 + $0x8] sm:$0xff]  }
 0x16d   :  { %v1053_v51 = vmax.bf16 %v8315_v37, %v1037_v33  ;;  %735 = vmatprep.mubr.bf16.mxu0 %v8315_v37 }
 0x16f   :  { %v6517_v13 = vpop.f32.mrb[28].mxu0  ;;  %1212 = vmatprep.subr.bf16.mxu1 %v1053_v51 }
 0x170   :  { %8357 = vst [vmem:[#allocation77_spill] sm:$0xff] %v6517_v13  ;;  %v6519_v59 = vpop.f32.mrb[29].mxu0  ;;  %1213 = vmatpush1.bf16.msra.mxu1 %v1052_v14 }
 0x171   :  { %8358 = vst [vmem:[#allocation78_spill] sm:$0xff] %v6519_v59  ;;  %v6524_v21 = vpop.f32.mrb[30].mxu0 }
 0x172   :  { %8359 = vst [vmem:[#allocation79_spill] sm:$0xff] %v6524_v21  ;;  %v1038_v33 = vpack.c.bf16 %v6524_v21, %v6517_v13  ;;  %v6528_v41 = vpop.f32.mrb[31].mxu0 }
 0x173   :  { %8360 = vst [vmem:[#allocation80_spill] sm:$0xff] %v6528_v41  ;;  %v1039_v11 = vpack.c.bf16 %v6528_v41, %v6519_v59 }
 0x174   :  { %v1054_v14 = vmax.bf16 %v8315_v37, %v1038_v33  ;;  %736 = vmatmul.mubr.bf16.gmra.mrb[64].mxu0 %v5342_v45  ;;  %v5328_v33 = vld [vmem:[%s8147_s2 + $0x10] sm:$0xff]  }
 0x175   :  { %v1055_v51 = vmax.bf16 %v8315_v37, %v1039_v11  ;;  %745 = vmatprep.mubr.bf16.mxu0 %v8315_v37  ;;  %v6550_v11 = vpop.f32.mrb[28].mxu1 }
 0x176   :  { %8361 = vst [vmem:[#allocation81_spill] sm:$0xff] %v6550_v11 }
 0x177   :  { %1214 = vmatprep.subr.bf16.mxu1 %v1055_v51  ;;  %v6553_v51 = vpop.f32.mrb[29].mxu1 }
 0x178   :  { %1215 = vmatpush1.bf16.msra.mxu1 %v1054_v14  ;;  %8362 = vst [vmem:[#allocation82_spill] sm:$0xff] %v6553_v51  ;;  %v6555_v45 = vpop.f32.mrb[30].mxu1 }
 0x179   :  { %8363 = vst [vmem:[#allocation83_spill] sm:$0xff] %v6555_v45  ;;  %v6557_v14 = vpop.f32.mrb[31].mxu1  ;;  %v5330_v45 = vld [vmem:[%s8147_s2 + $0x20] sm:$0xff]  }
 0x17a   :  { %8364 = vst [vmem:[#allocation84_spill] sm:$0xff] %v6557_v14 }
 0x17b   :  { %1233 = vmatmul.mubr.bf16.vlgmr.msra.gmra.mrb[60].mxu1 %v5326_v61  ;;  %v5329_v61 = vld [vmem:[%s8147_s2 + $0x18] sm:$0xff]  }
 0x17c   :  { %1242 = vmatprep.mubr.bf16.mxu1 %v8315_v37 }
 0x183   :  { %1243 = vmatmul.mubr.bf16.gmra.mrb[64].mxu1 %v5327_v4  ;;  %v6562_v4 = vpop.f32.mrb[32].mxu1 }
 0x184   :  { %1252 = vmatprep.mubr.bf16.mxu1 %v8315_v37  ;;  %8365 = vst [vmem:[#allocation85_spill] sm:$0xff] %v6562_v4 }
 0x18b   :  { %1253 = vmatmul.mubr.bf16.gmra.mrb[68].mxu1 %v5328_v33  ;;  %v6565_v33 = vpop.f32.mrb[33].mxu1 }
 0x18c   :  { %1262 = vmatprep.mubr.bf16.mxu1 %v8315_v37  ;;  %8366 = vst [vmem:[#allocation86_spill] sm:$0xff] %v6565_v33  ;;  %v6567_v11 = vpop.f32.mrb[34].mxu1 }
 0x18d   :  { %8367 = vst [vmem:[#allocation87_spill] sm:$0xff] %v6567_v11  ;;  %v6569_v41 = vpop.f32.mrb[35].mxu1  ;;  %v5331_v11 = vld [vmem:[%s8147_s2 + $0x28] sm:$0xff]  }
 0x18e   :  { %8368 = vst [vmem:[#allocation88_spill] sm:$0xff] %v6569_v41  ;;  %v6574_v14 = vpop.f32.mrb[36].mxu1 }
 0x18f   :  { %8369 = vst [vmem:[#allocation89_spill] sm:$0xff] %v6574_v14 }
 0x193   :  { %1263 = vmatmul.mubr.bf16.gmra.mrb[72].mxu1 %v5329_v61  ;;  %v6577_v61 = vpop.f32.mrb[37].mxu1 }
 0x194   :  { %1272 = vmatprep.mubr.bf16.mxu1 %v8315_v37  ;;  %8370 = vst [vmem:[#allocation90_spill] sm:$0xff] %v6577_v61  ;;  %v6579_v4 = vpop.f32.mrb[38].mxu1 }
 0x195   :  { %8371 = vst [vmem:[#allocation91_spill] sm:$0xff] %v6579_v4  ;;  %v6581_v51 = vpop.f32.mrb[39].mxu1  ;;  %v5332_v4 = vld [vmem:[%s8147_s2 + $0x30] sm:$0xff]  }
 0x196   :  { %8372 = vst [vmem:[#allocation92_spill] sm:$0xff] %v6581_v51  ;;  %v6586_v41 = vpop.f32.mrb[40].mxu1 }
 0x197   :  { %8373 = vst [vmem:[#allocation93_spill] sm:$0xff] %v6586_v41 }
 0x19b   :  { %1273 = vmatmul.mubr.bf16.gmra.mrb[76].mxu1 %v5330_v45  ;;  %v6589_v45 = vpop.f32.mrb[41].mxu1 }
 0x19c   :  { %1282 = vmatprep.mubr.bf16.mxu1 %v8315_v37  ;;  %8374 = vst [vmem:[#allocation94_spill] sm:$0xff] %v6589_v45  ;;  %v6591_v14 = vpop.f32.mrb[42].mxu1 }
 0x19d   :  { %8375 = vst [vmem:[#allocation95_spill] sm:$0xff] %v6591_v14  ;;  %v6593_v33 = vpop.f32.mrb[43].mxu1  ;;  %v5333_v14 = vld [vmem:[%s8147_s2 + $0x38] sm:$0xff]  }
 0x19e   :  { %8376 = vst [vmem:[#allocation96_spill] sm:$0xff] %v6593_v33  ;;  %v6598_v51 = vpop.f32.mrb[44].mxu1 }
 0x19f   :  { %8377 = vst [vmem:[#allocation97_spill] sm:$0xff] %v6598_v51 }
 0x1a3   :  { %1283 = vmatmul.mubr.bf16.gmra.mrb[80].mxu1 %v5331_v11  ;;  %v6601_v11 = vpop.f32.mrb[45].mxu1 }
 0x1a4   :  { %1292 = vmatprep.mubr.bf16.mxu1 %v8315_v37  ;;  %8378 = vst [vmem:[#allocation98_spill] sm:$0xff] %v6601_v11  ;;  %v6603_v41 = vpop.f32.mrb[46].mxu1 }
 0x1a5   :  { %8379 = vst [vmem:[#allocation99_spill] sm:$0xff] %v6603_v41  ;;  %v6605_v61 = vpop.f32.mrb[47].mxu1 }
 0x1a6   :  { %8380 = vst [vmem:[#allocation100_spill] sm:$0xff] %v6605_v61  ;;  %v6610_v33 = vpop.f32.mrb[48].mxu1 }
 0x1a7   :  { %8381 = vst [vmem:[#allocation101_spill] sm:$0xff] %v6610_v33  ;;  %v6612_v45 = vpop.f32.mrb[49].mxu1 }
 0x1a8   :  { %8382 = vst [vmem:[#allocation102_spill] sm:$0xff] %v6612_v45 }
 0x1ab   :  { %1293 = vmatmul.mubr.bf16.gmra.mrb[84].mxu1 %v5332_v4  ;;  %v6615_v4 = vpop.f32.mrb[50].mxu1 }
 0x1ac   :  { %1302 = vmatprep.mubr.bf16.mxu1 %v8315_v37  ;;  %8383 = vst [vmem:[#allocation103_spill] sm:$0xff] %v6615_v4  ;;  %v6617_v51 = vpop.f32.mrb[51].mxu1 }
 0x1ad   :  { %8384 = vst [vmem:[#allocation104_spill] sm:$0xff] %v6617_v51  ;;  %v6619_v11 = vpop.f32.mrb[52].mxu1  ;;  %v5343_v51 = vld [vmem:[%s8146_s1 + $0xc8] sm:$0xff]  }
 0x1ae   :  { %8385 = vst [vmem:[#allocation105_spill] sm:$0xff] %v6619_v11  ;;  %v6621_v41 = vpop.f32.mrb[53].mxu1  ;;  %746 = vmatmul.mubr.bf16.gmra.mrb[68].mxu0 %v5343_v51  ;;  %v5346_v51 = vld [vmem:[%s8146_s1 + $0xe0] sm:$0xff]  }
 0x1af   :  { %8386 = vst [vmem:[#allocation106_spill] sm:$0xff] %v6621_v41  ;;  %v6623_v61 = vpop.f32.mrb[54].mxu1  ;;  %755 = vmatprep.mubr.bf16.mxu0 %v8315_v37 }
 0x1b0   :  { %8387 = vst [vmem:[#allocation107_spill] sm:$0xff] %v6623_v61  ;;  %v6625_v21 = vpop.f32.mrb[55].mxu1  ;;  %v5344_v61 = vld [vmem:[%s8146_s1 + $0xd0] sm:$0xff]  }
 0x1b1   :  { %8388 = vst [vmem:[#allocation108_spill] sm:$0xff] %v6625_v21  ;;  %v6627_v59 = vpop.f32.mrb[56].mxu1 }
 0x1b2   :  { %8389 = vst [vmem:[#allocation109_spill] sm:$0xff] %v6627_v59 }
 0x1b3   :  { %1303 = vmatmul.mubr.bf16.gmra.mrb[88].mxu1 %v5333_v14  ;;  %v6629_v14 = vpop.f32.mrb[57].mxu1 }
 0x1b4   :  { %1908 = vmatprep.mubr.bf16.mxu1 %v8315_v37  ;;  %8390 = vst [vmem:[#allocation110_spill] sm:$0xff] %v6629_v14  ;;  %v6631_v33 = vpop.f32.mrb[58].mxu1 }
 0x1b5   :  { %8391 = vst [vmem:[#allocation111_spill] sm:$0xff] %v6631_v33  ;;  %v6633_v45 = vpop.f32.mrb[59].mxu1  ;;  %v5345_v33 = vld [vmem:[%s8146_s1 + $0xd8] sm:$0xff]  }
 0x1b6   :  { %8392 = vst [vmem:[#allocation112_spill] sm:$0xff] %v6633_v45  ;;  %756 = vmatmul.mubr.bf16.gmra.mrb[72].mxu0 %v5344_v61  ;;  %v5347_v61 = vld [vmem:[%s8146_s1 + $0xe8] sm:$0xff]  }
 0x1b7   :  { %765 = vmatprep.mubr.bf16.mxu0 %v8315_v37 }
 0x1be   :  { %766 = vmatmul.mubr.bf16.gmra.mrb[76].mxu0 %v5345_v33  ;;  %v5348_v33 = vld [vmem:[%s8146_s1 + $0xf0] sm:$0xff]  }
 0x1bf   :  { %775 = vmatprep.mubr.bf16.mxu0 %v8315_v37 }
 0x1c6   :  { %776 = vmatmul.mubr.bf16.gmra.mrb[80].mxu0 %v5346_v51  ;;  %v5349_v51 = vld [vmem:[%s8146_s1 + $0xf8] sm:$0xff]  }
 0x1c7   :  { %785 = vmatprep.mubr.bf16.mxu0 %v8315_v37 }
 0x1ce   :  { %786 = vmatmul.mubr.bf16.gmra.mrb[84].mxu0 %v5347_v61  ;;  %v5350_v61 = vld [vmem:[%s8146_s1 + $0x100] sm:$0xff]  }
 0x1cf   :  { %795 = vmatprep.mubr.bf16.mxu0 %v8315_v37 }
 0x1d6   :  { %796 = vmatmul.mubr.bf16.gmra.mrb[88].mxu0 %v5348_v33 }
 0x1d7   :  { %805 = vmatprep.mubr.bf16.mxu0 %v8315_v37 }
 0x1de   :  { %806 = vmatmul.mubr.bf16.gmra.mrb[92].mxu0 %v5349_v51 }
 0x1df   :  { %815 = vmatprep.mubr.bf16.mxu0 %v8315_v37 }
 0x1e6   :  { %816 = vmatmul.mubr.bf16.gmra.mrb[96].mxu0 %v5350_v61 }
 0x1e7   :  { %1537 = vmatprep.mubr.bf16.mxu0 %v8315_v37 }
 0x24e   :  { %v1234_v45 = vpop.f32.mrb[60].mxu1 }
 0x24f   :  { %v1236_v14 = vpop.f32.mrb[61].mxu1  ;;  %v1235_v33 = vadd.f32 %v1234_v45, %v5901_v15 }
 0x250   :  { %v1238_v59 = vpop.f32.mrb[62].mxu1  ;;  %v1237_v11 = vadd.f32 %v1236_v14, %v5901_v15 }
 0x251   :  { %v1239_v21 = vadd.f32 %v1238_v59, %v5906_v17  ;;  %v1240_v41 = vpop.f32.mrb[63].mxu1 }
 0x252   :  { %v1241_v51 = vadd.f32 %v1240_v41, %v5906_v17 }
 0x253   :  { %v1329_v4 = vpack.c.bf16 %v1239_v21, %v1235_v33 }
 0x254   :  { %v1330_v13 = vpack.c.bf16 %v1241_v51, %v1237_v11 }
 0x255   :  { %v1345_v61 = vmax.bf16 %v8315_v37, %v1329_v4 }
 0x256   :  { %v1346_v24 = vmax.bf16 %v8315_v37, %v1330_v13  ;;  %v1244_v8 = vpop.f32.mrb[64].mxu1 }
 0x257   :  { %v1246_v50 = vpop.f32.mrb[65].mxu1  ;;  %v1245_v45 = vadd.f32 %v1244_v8, %v5942_v30 }
 0x258   :  { %1505 = vmatprep.subr.bf16.mxu0 %v1346_v24  ;;  %v1248_v58 = vpop.f32.mrb[66].mxu1  ;;  %v1247_v15 = vadd.f32 %v1246_v50, %v5942_v30 }
 0x259   :  { %1506 = vmatpush1.bf16.msra.mxu0 %v1345_v61  ;;  %v1249_v59 = vadd.f32 %v1248_v58, %v5959_v36  ;;  %v1250_v46 = vpop.f32.mrb[67].mxu1 }
 0x25a   :  { %v1251_v17 = vadd.f32 %v1250_v46, %v5959_v36 }
 0x25b   :  { %v1331_v41 = vpack.c.bf16 %v1249_v59, %v1245_v45 }
 0x25c   :  { %v1332_v21 = vpack.c.bf16 %v1251_v17, %v1247_v15 }
 0x25d   :  { %v1347_v4 = vmax.bf16 %v8315_v37, %v1331_v41 }
 0x25e   :  { %v1254_v11 = vpop.f32.mrb[68].mxu1  ;;  %v1348_v13 = vmax.bf16 %v8315_v37, %v1332_v21 }
 0x25f   :  { %v1256_v14 = vpop.f32.mrb[69].mxu1  ;;  %v1255_v33 = vadd.f32 %v1254_v11, %v5914_v20 }
 0x260   :  { %v1258_v24 = vpop.f32.mrb[70].mxu1  ;;  %1507 = vmatprep.subr.bf16.mxu0 %v1348_v13  ;;  %v1257_v30 = vadd.f32 %v1256_v14, %v5914_v20 }
 0x261   :  { %v1259_v8 = vadd.f32 %v1258_v24, %v5976_v42  ;;  %v1260_v58 = vpop.f32.mrb[71].mxu1  ;;  %1508 = vmatpush1.bf16.msra.mxu0 %v1347_v4 }
 0x262   :  { %v1261_v36 = vadd.f32 %v1260_v58, %v5976_v42 }
 0x263   :  { %v1333_v46 = vpack.c.bf16 %v1259_v8, %v1255_v33 }
 0x264   :  { %v1334_v50 = vpack.c.bf16 %v1261_v36, %v1257_v30 }
 0x265   :  { %v1349_v45 = vmax.bf16 %v8315_v37, %v1333_v46 }
 0x266   :  { %v1264_v51 = vpop.f32.mrb[72].mxu1  ;;  %v1350_v61 = vmax.bf16 %v8315_v37, %v1334_v50 }
 0x267   :  { %v1266_v59 = vpop.f32.mrb[73].mxu1  ;;  %v1265_v17 = vadd.f32 %v1264_v51, %v5919_v22 }
 0x268   :  { %v1268_v15 = vpop.f32.mrb[74].mxu1  ;;  %1509 = vmatprep.subr.bf16.mxu0 %v1350_v61  ;;  %v1267_v20 = vadd.f32 %v1266_v59, %v5919_v22 }
 0x269   :  { %v1269_v41 = vadd.f32 %v1268_v15, %v5992_v48  ;;  %v1270_v21 = vpop.f32.mrb[75].mxu1  ;;  %1510 = vmatpush1.bf16.msra.mxu0 %v1349_v45 }
 0x26a   :  { %v1271_v42 = vadd.f32 %v1270_v21, %v5992_v48 }
 0x26b   :  { %v1335_v11 = vpack.c.bf16 %v1269_v41, %v1265_v17 }
 0x26c   :  { %v1336_v13 = vpack.c.bf16 %v1271_v42, %v1267_v20 }
 0x26d   :  { %v1351_v24 = vmax.bf16 %v8315_v37, %v1335_v11 }
 0x26e   :  { %v1274_v4 = vpop.f32.mrb[76].mxu1  ;;  %v1352_v14 = vmax.bf16 %v8315_v37, %v1336_v13 }
 0x26f   :  { %v1276_v33 = vpop.f32.mrb[77].mxu1  ;;  %v1275_v58 = vadd.f32 %v1274_v4, %v5930_v26 }
 0x270   :  { %v1278_v8 = vpop.f32.mrb[78].mxu1  ;;  %1511 = vmatprep.subr.bf16.mxu0 %v1352_v14  ;;  %v1277_v22 = vadd.f32 %v1276_v33, %v5930_v26 }
 0x271   :  { %v1279_v30 = vadd.f32 %v1278_v8, %v6008_v54  ;;  %v1280_v36 = vpop.f32.mrb[79].mxu1  ;;  %1512 = vmatpush1.bf16.msra.mxu0 %v1351_v24 }
 0x272   :  { %v1281_v48 = vadd.f32 %v1280_v36, %v6008_v54 }
 0x273   :  { %v1337_v46 = vpack.c.bf16 %v1279_v30, %v1275_v58 }
 0x274   :  { %v1338_v50 = vpack.c.bf16 %v1281_v48, %v1277_v22 }
 0x275   :  { %v1353_v45 = vmax.bf16 %v8315_v37, %v1337_v46 }
 0x276   :  { %v1284_v51 = vpop.f32.mrb[80].mxu1  ;;  %v1354_v61 = vmax.bf16 %v8315_v37, %v1338_v50 }
 0x277   :  { %v1286_v59 = vpop.f32.mrb[81].mxu1  ;;  %v1285_v17 = vadd.f32 %v1284_v51, %v5947_v32 }
 0x278   :  { %v1288_v15 = vpop.f32.mrb[82].mxu1  ;;  %1513 = vmatprep.subr.bf16.mxu0 %v1354_v61  ;;  %v1287_v26 = vadd.f32 %v1286_v59, %v5947_v32 }
 0x279   :  { %v1289_v41 = vadd.f32 %v1288_v15, %v6025_v60  ;;  %v1290_v21 = vpop.f32.mrb[83].mxu1  ;;  %1514 = vmatpush1.bf16.msra.mxu0 %v1353_v45 }
 0x27a   :  { %v1291_v54 = vadd.f32 %v1290_v21, %v6025_v60 }
 0x27b   :  { %v1339_v20 = vpack.c.bf16 %v1289_v41, %v1285_v17 }
 0x27c   :  { %v1340_v42 = vpack.c.bf16 %v1291_v54, %v1287_v26  ;;  %v5351_v26 = vld [vmem:[%s8149_s4] sm:$0xff]   ;;  %v5354_v54 = vld [vmem:[%s8149_s4 + $0x18] sm:$0xff]  }
 0x27d   :  { %v1355_v4 = vmax.bf16 %v8315_v37, %v1339_v20  ;;  %v5355_v20 = vld [vmem:[%s8149_s4 + $0x20] sm:$0xff]  }
 0x27e   :  { %v1294_v11 = vpop.f32.mrb[84].mxu1  ;;  %v1356_v13 = vmax.bf16 %v8315_v37, %v1340_v42  ;;  %v5356_v42 = vld [vmem:[%s8149_s4 + $0x28] sm:$0xff]  }
 0x27f   :  { %v1296_v14 = vpop.f32.mrb[85].mxu1  ;;  %v1295_v33 = vadd.f32 %v1294_v11, %v5964_v38  ;;  %v5357_v11 = vld [vmem:[%s8149_s4 + $0x30] sm:$0xff]  }
 0x280   :  { %v1298_v24 = vpop.f32.mrb[86].mxu1  ;;  %1515 = vmatprep.subr.bf16.mxu0 %v1356_v13  ;;  %v1297_v32 = vadd.f32 %v1296_v14, %v5964_v38  ;;  %v5358_v13 = vld [vmem:[%s8149_s4 + $0x38] sm:$0xff]   ;;  %v977_v14 = vadd.f32 nan, %v6256_v55 }
 0x281   :  { %v1299_v8 = vadd.f32 %v1298_v24, %v6044_v3  ;;  %v1300_v58 = vpop.f32.mrb[87].mxu1  ;;  %1516 = vmatpush1.bf16.msra.mxu0 %v1355_v4  ;;  %v976_v4 = vadd.f32 nan, %v6246_v35  ;;  %v978_v24 = vadd.f32 nan, %v6260_v63 }
 0x282   :  { %v1301_v60 = vadd.f32 %v1300_v58, %v6044_v3 }
 0x283   :  { %v1341_v30 = vpack.c.bf16 %v1299_v8, %v1295_v33  ;;  %v979_v33 = vadd.f32 nan, %v6264_v6  ;;  %v4875_v8 = vadd.f32 %v5994_v49, %v976_v4 }
 0x284   :  { %v1342_v36 = vpack.c.bf16 %v1301_v60, %v1297_v32  ;;  %v4877_v32 = vadd.f32 %v5994_v49, %v977_v14 }
 0x285   :  { %v1357_v46 = vmax.bf16 %v8315_v37, %v1341_v30 }
 0x286   :  { %v1304_v22 = vpop.f32.mrb[88].mxu1  ;;  %v1358_v48 = vmax.bf16 %v8315_v37, %v1342_v36 }
 0x287   :  { %v1306_v50 = vpop.f32.mrb[89].mxu1  ;;  %v1305_v61 = vadd.f32 %v1304_v22, %v5978_v43  ;;  %v4879_v22 = vadd.f32 %v6074_v16, %v978_v24 }
 0x288   :  { %v1308_v51 = vpop.f32.mrb[90].mxu1  ;;  %1517 = vmatprep.subr.bf16.mxu0 %v1358_v48  ;;  %v1307_v38 = vadd.f32 %v1306_v50, %v5978_v43  ;;  %v5352_v43 = vld [vmem:[%s8149_s4 + $0x8] sm:$0xff]  }
 0x289   :  { %v1309_v45 = vadd.f32 %v1308_v51, %v6060_v10  ;;  %v1310_v59 = vpop.f32.mrb[91].mxu1  ;;  %1518 = vmatpush1.bf16.msra.mxu0 %v1357_v46  ;;  %v4881_v51 = vadd.f32 %v6074_v16, %v979_v33 }
 0x28a   :  { %v1311_v3 = vadd.f32 %v1310_v59, %v6060_v10  ;;  %v5353_v10 = vld [vmem:[%s8149_s4 + $0x10] sm:$0xff]  }
 0x28b   :  { %v1343_v15 = vpack.c.bf16 %v1309_v45, %v1305_v61  ;;  %v980_v61 = vadd.f32 nan, %v6292_v29 }
 0x28c   :  { %v1344_v17 = vpack.c.bf16 %v1311_v3, %v1307_v38 }
 0x28d   :  { %v1359_v21 = vmax.bf16 %v8315_v37, %v1343_v15  ;;  %v981_v15 = vadd.f32 nan, %v6302_v0 }
 0x28e   :  { %v1360_v41 = vmax.bf16 %v8315_v37, %v1344_v17 }
 0x290   :  { %1519 = vmatprep.subr.bf16.mxu0 %v1360_v41 }
 0x291   :  { %1520 = vmatpush1.bf16.msra.mxu0 %v1359_v21  ;;  %v982_v21 = vadd.f32 nan, %v6309_v44 }
 0x294   :  { %1538 = vmatmul.mubr.bf16.vlgmr.msra.gmra.mrb[32].mxu0 %v5351_v26 }
 0x295   :  { %1547 = vmatprep.mubr.bf16.mxu0 %v8315_v37 }
 0x29c   :  { %1548 = vmatmul.mubr.bf16.gmra.mrb[36].mxu0 %v5352_v43  ;;  %v983_v43 = vadd.f32 nan, %v6313_v18 }
 0x29d   :  { %1557 = vmatprep.mubr.bf16.mxu0 %v8315_v37 }
 0x2a4   :  { %1558 = vmatmul.mubr.bf16.gmra.mrb[40].mxu0 %v5353_v10 }
 0x2a5   :  { %1567 = vmatprep.mubr.bf16.mxu0 %v8315_v37 }
 0x2ac   :  { %1568 = vmatmul.mubr.bf16.gmra.mrb[44].mxu0 %v5354_v54 }
 0x2ad   :  { %1577 = vmatprep.mubr.bf16.mxu0 %v8315_v37 }
 0x2b4   :  { %1578 = vmatmul.mubr.bf16.gmra.mrb[48].mxu0 %v5355_v20  ;;  %v4885_v20 = vadd.f32 %v6006_v53, %v981_v15 }
 0x2b5   :  { %1587 = vmatprep.mubr.bf16.mxu0 %v8315_v37 }
 0x2bc   :  { %1588 = vmatmul.mubr.bf16.gmra.mrb[52].mxu0 %v5356_v42 }
 0x2bd   :  { %1597 = vmatprep.mubr.bf16.mxu0 %v8315_v37 }
 0x2c4   :  { %1598 = vmatmul.mubr.bf16.gmra.mrb[56].mxu0 %v5357_v11 }
 0x2c5   :  { %1607 = vmatprep.mubr.bf16.mxu0 %v8315_v37 }
 0x2cc   :  { %1608 = vmatmul.mubr.bf16.gmra.mrb[60].mxu0 %v5358_v13 }
 0x2cd   :  { %2215 = vmatprep.mubr.bf16.mxu0 %v8315_v37 }
 0x367   :  { %v1539_v58 = vpop.f32.mrb[32].mxu0 }
 0x368   :  { %v1540_v60 = vadd.f32 %v1539_v58, %v5994_v49  ;;  %v6754_v30 = vadd.f32 %v4875_v8, %v1539_v58  ;;  %v1541_v36 = vpop.f32.mrb[33].mxu0  ;;  %v4889_v8 = vadd.f32 %v6086_v23, %v983_v43  ;;  %v984_v58 = vadd.f32 nan, %v6338_v12 }
 0x369   :  { %v1542_v48 = vadd.f32 %v1541_v36, %v5994_v49  ;;  %v6758_v46 = vadd.f32 %v4877_v32, %v1541_v36  ;;  %v1543_v50 = vpop.f32.mrb[34].mxu0 }
 0x36a   :  { %8393 = vst [vmem:[#allocation113_spill] sm:$0xff] %v6754_v30  ;;  %v6763_v45 = vadd.f32 %v1540_v60, %v6246_v35  ;;  %v1544_v59 = vadd.f32 %v1543_v50, %v6074_v16  ;;  %v6766_v38 = vadd.f32 %v4879_v22, %v1543_v50  ;;  %v1545_v3 = vpop.f32.mrb[35].mxu0 }
 0x36b   :  { %8394 = vst [vmem:[#allocation114_spill] sm:$0xff] %v6758_v46  ;;  %v6770_v17 = vadd.f32 %v1542_v48, %v6256_v55  ;;  %v1546_v49 = vadd.f32 %v1545_v3, %v6074_v16  ;;  %v6773_v41 = vadd.f32 %v4881_v51, %v1545_v3  ;;  %v4883_v16 = vadd.f32 %v6006_v53, %v980_v61 }
 0x36c   :  { %8395 = vst [vmem:[#allocation115_spill] sm:$0xff] %v6766_v38  ;;  %v6777_v26 = vadd.f32 %v1544_v59, %v6260_v63  ;;  %v1699_v35 = vpack.c.bf16 %v6766_v38, %v6754_v30  ;;  %v985_v48 = vadd.f32 nan, %v6348_v31  ;;  %v986_v61 = vadd.f32 nan, %v6355_v27 }
 0x36d   :  { %8396 = vst [vmem:[#allocation116_spill] sm:$0xff] %v6773_v41  ;;  %v6783_v10 = vadd.f32 %v1546_v49, %v6264_v6  ;;  %v1700_v55 = vpack.c.bf16 %v6773_v41, %v6758_v46  ;;  %v4887_v6 = vadd.f32 %v6086_v23, %v982_v21  ;;  %v987_v3 = vadd.f32 nan, %v6359_v47 }
 0x36e   :  { %v1715_v63 = vmax.bf16 %v8315_v37, %v1699_v35  ;;  %v4893_v21 = vadd.f32 %v6016_v57, %v985_v48 }
 0x36f   :  { %v1549_v54 = vpop.f32.mrb[36].mxu0  ;;  %v1716_v42 = vmax.bf16 %v8315_v37, %v1700_v55 }
 0x370   :  { %v1550_v11 = vadd.f32 %v1549_v54, %v6006_v53  ;;  %v6792_v13 = vadd.f32 %v4883_v16, %v1549_v54  ;;  %v1551_v4 = vpop.f32.mrb[37].mxu0 }
 0x371   :  { %v1552_v14 = vadd.f32 %v1551_v4, %v6006_v53  ;;  %v6796_v24 = vadd.f32 %v4885_v20, %v1551_v4  ;;  %v1553_v33 = vpop.f32.mrb[38].mxu0  ;;  %1876 = vmatprep.subr.bf16.mxu1 %v1716_v42 }
 0x372   :  { %v6801_v32 = vadd.f32 %v1550_v11, %v6292_v29  ;;  %v1554_v60 = vadd.f32 %v1553_v33, %v6086_v23  ;;  %v6804_v36 = vadd.f32 %v4887_v6, %v1553_v33  ;;  %v1555_v22 = vpop.f32.mrb[39].mxu0  ;;  %1877 = vmatpush1.bf16.msra.mxu1 %v1715_v63  ;;  %v4897_v63 = vadd.f32 %v6096_v28, %v987_v3 }
 0x373   :  { %v6808_v53 = vadd.f32 %v1552_v14, %v6302_v0  ;;  %v1556_v50 = vadd.f32 %v1555_v22, %v6086_v23  ;;  %v6811_v51 = vadd.f32 %v4889_v8, %v1555_v22  ;;  %v4891_v23 = vadd.f32 %v6016_v57, %v984_v58 }
 0x374   :  { %v6815_v29 = vadd.f32 %v1554_v60, %v6309_v44  ;;  %v1701_v59 = vpack.c.bf16 %v6804_v36, %v6792_v13  ;;  %v988_v11 = vadd.f32 nan, %v6384_v7  ;;  %v989_v8 = vadd.f32 nan, %v6394_v9 }
 0x375   :  { %v6821_v15 = vadd.f32 %v1556_v50, %v6313_v18  ;;  %v1702_v0 = vpack.c.bf16 %v6811_v51, %v6796_v24  ;;  %v4895_v18 = vadd.f32 %v6096_v28, %v986_v61  ;;  %v990_v22 = vadd.f32 nan, %v6401_v52 }
 0x376   :  { %v1717_v44 = vmax.bf16 %v8315_v37, %v1701_v59  ;;  %v991_v50 = vadd.f32 nan, %v6405_v5  ;;  %v4901_v3 = vadd.f32 %v6030_v62, %v989_v8 }
 0x377   :  { %v1559_v49 = vpop.f32.mrb[40].mxu0  ;;  %v1718_v35 = vmax.bf16 %v8315_v37, %v1702_v0 }
 0x378   :  { %v1560_v43 = vadd.f32 %v1559_v49, %v6016_v57  ;;  %v6830_v55 = vadd.f32 %v4891_v23, %v1559_v49  ;;  %v1561_v16 = vpop.f32.mrb[41].mxu0 }
 0x379   :  { %v1562_v54 = vadd.f32 %v1561_v16, %v6016_v57  ;;  %v6834_v20 = vadd.f32 %v4893_v21, %v1561_v16  ;;  %v1563_v42 = vpop.f32.mrb[42].mxu0  ;;  %1878 = vmatprep.subr.bf16.mxu1 %v1718_v35  ;;  %v4905_v16 = vadd.f32 %v6106_v34, %v991_v50 }
 0x37a   :  { %v6839_v4 = vadd.f32 %v1560_v43, %v6338_v12  ;;  %v1564_v6 = vadd.f32 %v1563_v42, %v6096_v28  ;;  %v6842_v14 = vadd.f32 %v4895_v18, %v1563_v42  ;;  %v1565_v33 = vpop.f32.mrb[43].mxu0  ;;  %1879 = vmatpush1.bf16.msra.mxu1 %v1717_v44  ;;  %v992_v18 = vadd.f32 nan, %v6430_v19 }
 0x37b   :  { %v6846_v57 = vadd.f32 %v1562_v54, %v6348_v31  ;;  %v1566_v58 = vadd.f32 %v1565_v33, %v6096_v28  ;;  %v6849_v60 = vadd.f32 %v4897_v63, %v1565_v33  ;;  %v4899_v28 = vadd.f32 %v6030_v62, %v988_v11 }
 0x37c   :  { %v6853_v12 = vadd.f32 %v1564_v6, %v6355_v27  ;;  %v1703_v48 = vpack.c.bf16 %v6842_v14, %v6830_v55  ;;  %v993_v6 = vadd.f32 nan, %v6440_v56 }
 0x37d   :  { %v6859_v61 = vadd.f32 %v1566_v58, %v6359_v47  ;;  %v1704_v31 = vpack.c.bf16 %v6849_v60, %v6834_v20  ;;  %v4903_v47 = vadd.f32 %v6106_v34, %v990_v22  ;;  %v994_v58 = vadd.f32 nan, %v6445_v2 }
 0x37e   :  { %v1719_v27 = vmax.bf16 %v8315_v37, %v1703_v48  ;;  %v995_v48 = vadd.f32 nan, %v6449_v40 }
 0x37f   :  { %v1569_v59 = vpop.f32.mrb[44].mxu0  ;;  %v1720_v0 = vmax.bf16 %v8315_v37, %v1704_v31 }
 0x380   :  { %v1570_v23 = vadd.f32 %v1569_v59, %v6030_v62  ;;  %v6868_v49 = vadd.f32 %v4899_v28, %v1569_v59  ;;  %v1571_v21 = vpop.f32.mrb[45].mxu0  ;;  %v4909_v28 = vadd.f32 %v6038_v1, %v993_v6  ;;  %v8399_v6 = vld [vmem:[#allocation67_spill] sm:$0xff] }
 0x381   :  { %v1572_v35 = vadd.f32 %v1571_v21, %v6030_v62  ;;  %v6872_v44 = vadd.f32 %v4901_v3, %v1571_v21  ;;  %v1573_v43 = vpop.f32.mrb[46].mxu0  ;;  %1880 = vmatprep.subr.bf16.mxu1 %v1720_v0 }
 0x382   :  { %v6877_v54 = vadd.f32 %v1570_v23, %v6384_v7  ;;  %v1574_v42 = vadd.f32 %v1573_v43, %v6106_v34  ;;  %v6880_v63 = vadd.f32 %v4903_v47, %v1573_v43  ;;  %v1575_v11 = vpop.f32.mrb[47].mxu0  ;;  %1881 = vmatpush1.bf16.msra.mxu1 %v1719_v27  ;;  %v996_v43 = vadd.f32 nan, %v6463_v25 }
 0x383   :  { %v6884_v62 = vadd.f32 %v1572_v35, %v6394_v9  ;;  %v1576_v33 = vadd.f32 %v1575_v11, %v6106_v34  ;;  %v6887_v8 = vadd.f32 %v4905_v16, %v1575_v11  ;;  %v4907_v34 = vadd.f32 %v6038_v1, %v992_v18 }
 0x384   :  { %v6891_v7 = vadd.f32 %v1574_v42, %v6401_v52  ;;  %v1705_v22 = vpack.c.bf16 %v6880_v63, %v6868_v49  ;;  %v4913_v35 = vadd.f32 %v6114_v39, %v995_v48  ;;  %v8401_v48 = vld [vmem:[#allocation68_spill] sm:$0xff] }
 0x385   :  { %v6897_v50 = vadd.f32 %v1576_v33, %v6405_v5  ;;  %v1706_v9 = vpack.c.bf16 %v6887_v8, %v6872_v44  ;;  %v4911_v5 = vadd.f32 %v6114_v39, %v994_v58  ;;  %v997_v33 = vadd.f32 nan, %v8399_v6 }
 0x386   :  { %v1721_v52 = vmax.bf16 %v8315_v37, %v1705_v22 }
 0x387   :  { %v1579_v31 = vpop.f32.mrb[48].mxu0  ;;  %v1722_v59 = vmax.bf16 %v8315_v37, %v1706_v9  ;;  %v998_v9 = vadd.f32 nan, %v8401_v48 }
 0x388   :  { %v1580_v3 = vadd.f32 %v1579_v31, %v6038_v1  ;;  %v6906_v0 = vadd.f32 %v4907_v34, %v1579_v31  ;;  %v1581_v27 = vpop.f32.mrb[49].mxu0  ;;  %v8402_v31 = vld [vmem:[#allocation69_spill] sm:$0xff] }
 0x389   :  { %v1582_v23 = vadd.f32 %v1581_v27, %v6038_v1  ;;  %v6910_v21 = vadd.f32 %v4909_v28, %v1581_v27  ;;  %v1583_v47 = vpop.f32.mrb[50].mxu0  ;;  %1882 = vmatprep.subr.bf16.mxu1 %v1722_v59  ;;  %v999_v28 = vadd.f32 nan, %v8402_v31 }
 0x38a   :  { %v6915_v16 = vadd.f32 %v1580_v3, %v6430_v19  ;;  %v1584_v18 = vadd.f32 %v1583_v47, %v6114_v39  ;;  %v6918_v42 = vadd.f32 %v4911_v5, %v1583_v47  ;;  %v1585_v11 = vpop.f32.mrb[51].mxu0  ;;  %1883 = vmatpush1.bf16.msra.mxu1 %v1721_v52  ;;  %v8403_v52 = vld [vmem:[#allocation5_spill] sm:$0xff] }
 0x38b   :  { %8397 = vst [vmem:[#allocation117_spill] sm:$0xff] %v6910_v21  ;;  %v6922_v1 = vadd.f32 %v1582_v23, %v6440_v56  ;;  %v1586_v58 = vadd.f32 %v1585_v11, %v6114_v39  ;;  %v6925_v22 = vadd.f32 %v4913_v35, %v1585_v11  ;;  %v4915_v39 = vadd.f32 %v8403_v52, %v996_v43 }
 0x38c   :  { %8398 = vst [vmem:[#allocation118_spill] sm:$0xff] %v6918_v42  ;;  %v6929_v19 = vadd.f32 %v1584_v18, %v6445_v2  ;;  %v1707_v34 = vpack.c.bf16 %v6918_v42, %v6906_v0  ;;  %v4917_v27 = vadd.f32 %v8403_v52, %v997_v33  ;;  %v8405_v18 = vld [vmem:[#allocation10_spill] sm:$0xff]  ;;  %v8407_v33 = vld [vmem:[#allocation71_spill] sm:$0xff] }
 0x38d   :  { %8400 = vst [vmem:[#allocation67_spill] sm:$0xff] %v6925_v22  ;;  %v6935_v59 = vadd.f32 %v1586_v58, %v6449_v40  ;;  %v1708_v56 = vpack.c.bf16 %v6925_v22, %v6910_v21  ;;  %v4919_v40 = vadd.f32 %v8405_v18, %v998_v9  ;;  %v4921_v43 = vadd.f32 %v8405_v18, %v999_v28  ;;  %v8409_v9 = vld [vmem:[#allocation72_spill] sm:$0xff]  ;;  %v8411_v28 = vld [vmem:[#allocation74_spill] sm:$0xff] }
 0x38e   :  { %v1723_v2 = vmax.bf16 %v8315_v37, %v1707_v34  ;;  %v1000_v38 = vadd.f32 nan, %v8407_v33  ;;  %v1001_v46 = vadd.f32 nan, %v8409_v9  ;;  %v8415_v22 = vld [vmem:[#allocation12_spill] sm:$0xff] }
 0x38f   :  { %v1589_v3 = vpop.f32.mrb[52].mxu0  ;;  %v1724_v5 = vmax.bf16 %v8315_v37, %v1708_v56 }
 0x390   :  { %v1590_v23 = vadd.f32 %v1589_v3, %v8403_v52  ;;  %v6944_v47 = vadd.f32 %v4915_v39, %v1589_v3  ;;  %v1591_v35 = vpop.f32.mrb[53].mxu0 }
 0x391   :  { %v1592_v11 = vadd.f32 %v1591_v35, %v8403_v52  ;;  %v6948_v58 = vadd.f32 %v4917_v27, %v1591_v35  ;;  %v1593_v41 = vpop.f32.mrb[54].mxu0  ;;  %1884 = vmatprep.subr.bf16.mxu1 %v1724_v5  ;;  %v1002_v35 = vadd.f32 nan, %v8411_v28 }
 0x392   :  { %8404 = vst [vmem:[#allocation68_spill] sm:$0xff] %v6944_v47  ;;  %v6953_v56 = vadd.f32 %v1590_v23, %v6463_v25  ;;  %v1594_v34 = vadd.f32 %v1593_v41, %v8405_v18  ;;  %v6956_v39 = vadd.f32 %v4919_v40, %v1593_v41  ;;  %v1595_v3 = vpop.f32.mrb[55].mxu0  ;;  %1885 = vmatpush1.bf16.msra.mxu1 %v1723_v2  ;;  %v8412_v23 = vld [vmem:[#allocation75_spill] sm:$0xff] }
 0x393   :  { %8406 = vst [vmem:[#allocation69_spill] sm:$0xff] %v6948_v58  ;;  %v6960_v52 = vadd.f32 %v1592_v11, %v8399_v6  ;;  %v1596_v27 = vadd.f32 %v1595_v3, %v8405_v18  ;;  %v6963_v5 = vadd.f32 %v4921_v43, %v1595_v3  ;;  %v1003_v40 = vadd.f32 nan, %v8412_v23  ;;  %v8413_v11 = vld [vmem:[#allocation6_spill] sm:$0xff] }
 0x394   :  { %8408 = vst [vmem:[#allocation5_spill] sm:$0xff] %v6956_v39  ;;  %v6967_v25 = vadd.f32 %v1594_v34, %v8401_v48  ;;  %v1709_v41 = vpack.c.bf16 %v6956_v39, %v6944_v47  ;;  %v4923_v18 = vadd.f32 %v8413_v11, %v1000_v38  ;;  %v4925_v3 = vadd.f32 %v8413_v11, %v1001_v46  ;;  %v8416_v46 = vld [vmem:[#allocation77_spill] sm:$0xff] }
 0x395   :  { %8410 = vst [vmem:[#allocation10_spill] sm:$0xff] %v6963_v5  ;;  %v6973_v2 = vadd.f32 %v1596_v27, %v8402_v31  ;;  %v1710_v6 = vpack.c.bf16 %v6963_v5, %v6948_v58  ;;  %v4927_v31 = vadd.f32 %v8415_v22, %v1002_v35  ;;  %v4929_v38 = vadd.f32 %v8415_v22, %v1003_v40  ;;  %v8418_v35 = vld [vmem:[#allocation78_spill] sm:$0xff]  ;;  %v8421_v40 = vld [vmem:[#allocation79_spill] sm:$0xff] }
 0x396   :  { %v1725_v48 = vmax.bf16 %v8315_v37, %v1709_v41  ;;  %v1004_v58 = vadd.f32 nan, %v8416_v46  ;;  %v1005_v21 = vadd.f32 nan, %v8418_v35 }
 0x397   :  { %v1599_v43 = vpop.f32.mrb[56].mxu0  ;;  %v1726_v30 = vmax.bf16 %v8315_v37, %v1710_v6 }
 0x398   :  { %v1600_v34 = vadd.f32 %v1599_v43, %v8413_v11  ;;  %v6982_v39 = vadd.f32 %v4923_v18, %v1599_v43  ;;  %v1601_v47 = vpop.f32.mrb[57].mxu0 }
 0x399   :  { %v1602_v27 = vadd.f32 %v1601_v47, %v8413_v11  ;;  %v6986_v42 = vadd.f32 %v4925_v3, %v1601_v47  ;;  %v1603_v5 = vpop.f32.mrb[58].mxu0  ;;  %1886 = vmatprep.subr.bf16.mxu1 %v1726_v30  ;;  %v1006_v3 = vadd.f32 nan, %v8421_v40 }
 0x39a   :  { %8414 = vst [vmem:[#allocation71_spill] sm:$0xff] %v6982_v39  ;;  %v6991_v6 = vadd.f32 %v1600_v34, %v8407_v33  ;;  %v1604_v41 = vadd.f32 %v1603_v5, %v8415_v22  ;;  %v6994_v18 = vadd.f32 %v4927_v31, %v1603_v5  ;;  %v1605_v43 = vpop.f32.mrb[59].mxu0  ;;  %1887 = vmatpush1.bf16.msra.mxu1 %v1725_v48  ;;  %v8423_v34 = vld [vmem:[#allocation80_spill] sm:$0xff] }
 0x39b   :  { %v6998_v47 = vadd.f32 %v1602_v27, %v8409_v9  ;;  %v1606_v30 = vadd.f32 %v1605_v43, %v8415_v22  ;;  %v7001_v11 = vadd.f32 %v4929_v38, %v1605_v43  ;;  %v1007_v31 = vadd.f32 nan, %v8423_v34  ;;  %v8425_v27 = vld [vmem:[#allocation7_spill] sm:$0xff] }
 0x39c   :  { %8417 = vst [vmem:[#allocation72_spill] sm:$0xff] %v6994_v18  ;;  %v7005_v33 = vadd.f32 %v1604_v41, %v8411_v28  ;;  %v1711_v5 = vpack.c.bf16 %v6994_v18, %v6982_v39  ;;  %v4931_v22 = vadd.f32 %v8425_v27, %v1004_v58  ;;  %v4933_v43 = vadd.f32 %v8425_v27, %v1005_v21 }
 0x39d   :  { %8419 = vst [vmem:[#allocation74_spill] sm:$0xff] %v6998_v47  ;;  %8420 = vst [vmem:[#allocation75_spill] sm:$0xff] %v7001_v11  ;;  %v7011_v48 = vadd.f32 %v1606_v30, %v8412_v23  ;;  %v1712_v9 = vpack.c.bf16 %v7001_v11, %v6986_v42 }
 0x39e   :  { %8422 = vst [vmem:[#allocation6_spill] sm:$0xff] %v7005_v33  ;;  %v1727_v28 = vmax.bf16 %v8315_v37, %v1711_v5  ;;  %v8427_v33 = vld [vmem:[#allocation14_spill] sm:$0xff] }
 0x39f   :  { %8424 = vst [vmem:[#allocation12_spill] sm:$0xff] %v7011_v48  ;;  %v1609_v38 = vpop.f32.mrb[60].mxu0  ;;  %v1728_v47 = vmax.bf16 %v8315_v37, %v1712_v9  ;;  %v4935_v23 = vadd.f32 %v8427_v33, %v1006_v3  ;;  %v4937_v58 = vadd.f32 %v8427_v33, %v1007_v31 }
 0x3a0   :  { %v1610_v41 = vadd.f32 %v1609_v38, %v8425_v27  ;;  %v7020_v18 = vadd.f32 %v4931_v22, %v1609_v38  ;;  %v1611_v39 = vpop.f32.mrb[61].mxu0 }
 0x3a1   :  { %v1612_v30 = vadd.f32 %v1611_v39, %v8425_v27  ;;  %v7024_v48 = vadd.f32 %v4933_v43, %v1611_v39  ;;  %v1613_v11 = vpop.f32.mrb[62].mxu0  ;;  %1888 = vmatprep.subr.bf16.mxu1 %v1728_v47  ;;  %v5362_v43 = vld [vmem:[%s8147_s2 + $0x58] sm:$0xff]  }
 0x3a2   :  { %8426 = vst [vmem:[#allocation77_spill] sm:$0xff] %v7020_v18  ;;  %v7028_v21 = vadd.f32 %v1610_v41, %v8416_v46  ;;  %v1614_v5 = vadd.f32 %v1613_v11, %v8427_v33  ;;  %v7031_v9 = vadd.f32 %v4935_v23, %v1613_v11  ;;  %v1615_v22 = vpop.f32.mrb[63].mxu0  ;;  %1889 = vmatpush1.bf16.msra.mxu1 %v1727_v28  ;;  %v5363_v28 = vld [vmem:[%s8147_s2 + $0x60] sm:$0xff]   ;;  %v5364_v41 = vld [vmem:[%s8147_s2 + $0x68] sm:$0xff]   ;;  %v5365_v23 = vld [vmem:[%s8147_s2 + $0x70] sm:$0xff]  }
 0x3a3   :  { %8428 = vst [vmem:[#allocation78_spill] sm:$0xff] %v7024_v48  ;;  %v7034_v38 = vadd.f32 %v1612_v30, %v8418_v35  ;;  %v1616_v3 = vadd.f32 %v1615_v22, %v8427_v33  ;;  %v7037_v39 = vadd.f32 %v4937_v58, %v1615_v22  ;;  %v5359_v33 = vld [vmem:[%s8147_s2 + $0x40] sm:$0xff]   ;;  %v5366_v30 = vld [vmem:[%s8147_s2 + $0x78] sm:$0xff]  }
 0x3a4   :  { %8429 = vst [vmem:[#allocation79_spill] sm:$0xff] %v7031_v9  ;;  %v7040_v47 = vadd.f32 %v1614_v5, %v8421_v40  ;;  %v1713_v46 = vpack.c.bf16 %v7031_v9, %v7020_v18  ;;  %v5360_v40 = vld [vmem:[%s8147_s2 + $0x48] sm:$0xff]  }
 0x3a5   :  { %8430 = vst [vmem:[#allocation80_spill] sm:$0xff] %v7037_v39  ;;  %v7045_v31 = vadd.f32 %v1616_v3, %v8423_v34  ;;  %v1714_v11 = vpack.c.bf16 %v7037_v39, %v7024_v48  ;;  %v5361_v34 = vld [vmem:[%s8147_s2 + $0x50] sm:$0xff]   ;;  %v8432_v3 = vld [vmem:[#allocation8_spill] sm:$0xff]  ;;  %v8434_v9 = vld [vmem:[#allocation9_spill] sm:$0xff] }
 0x3a6   :  { %v1729_v35 = vmax.bf16 %v8315_v37, %v1713_v46 }
 0x3a7   :  { %8431 = vst [vmem:[#allocation7_spill] sm:$0xff] %v7045_v31  ;;  %v1730_v27 = vmax.bf16 %v8315_v37, %v1714_v11  ;;  %v8433_v11 = vld [vmem:[#allocation16_spill] sm:$0xff] }
 0x3a9   :  { %1890 = vmatprep.subr.bf16.mxu1 %v1730_v27 }
 0x3aa   :  { %1891 = vmatpush1.bf16.msra.mxu1 %v1729_v35 }
 0x3ad   :  { %1909 = vmatmul.mubr.bf16.vlgmr.msra.gmra.mrb[92].mxu1 %v5359_v33 }
 0x3ae   :  { %1918 = vmatprep.mubr.bf16.mxu1 %v8315_v37 }
 0x3b5   :  { %1919 = vmatmul.mubr.bf16.gmra.mrb[96].mxu1 %v5360_v40 }
 0x3b6   :  { %1928 = vmatprep.mubr.bf16.mxu1 %v8315_v37 }
 0x3bd   :  { %1929 = vmatmul.mubr.bf16.gmra.mrb[100].mxu1 %v5361_v34 }
 0x3be   :  { %1938 = vmatprep.mubr.bf16.mxu1 %v8315_v37 }
 0x3c5   :  { %1939 = vmatmul.mubr.bf16.gmra.mrb[104].mxu1 %v5362_v43 }
 0x3c6   :  { %1948 = vmatprep.mubr.bf16.mxu1 %v8315_v37 }
 0x3cd   :  { %1949 = vmatmul.mubr.bf16.gmra.mrb[108].mxu1 %v5363_v28 }
 0x3ce   :  { %1958 = vmatprep.mubr.bf16.mxu1 %v8315_v37 }
 0x3d5   :  { %1959 = vmatmul.mubr.bf16.gmra.mrb[112].mxu1 %v5364_v41 }
 0x3d6   :  { %1968 = vmatprep.mubr.bf16.mxu1 %v8315_v37 }
 0x3dd   :  { %1969 = vmatmul.mubr.bf16.gmra.mrb[116].mxu1 %v5365_v23 }
 0x3de   :  { %1978 = vmatprep.mubr.bf16.mxu1 %v8315_v37 }
 0x3e5   :  { %1979 = vmatmul.mubr.bf16.gmra.mrb[120].mxu1 %v5366_v30 }
 0x3e6   :  { %2586 = vmatprep.mubr.bf16.mxu1 %v8315_v37 }
 0x480   :  { %v1910_v58 = vpop.f32.mrb[92].mxu1 }
 0x481   :  { %v1912_v5 = vpop.f32.mrb[93].mxu1  ;;  %v1911_v46 = vadd.f32 %v1910_v58, %v8432_v3  ;;  %v8435_v58 = vld [vmem:[#allocation18_spill] sm:$0xff] }
 0x482   :  { %v1914_v22 = vpop.f32.mrb[94].mxu1  ;;  %v1913_v33 = vadd.f32 %v1912_v5, %v8432_v3 }
 0x483   :  { %v1915_v27 = vadd.f32 %v1914_v22, %v8433_v11  ;;  %v1916_v35 = vpop.f32.mrb[95].mxu1 }
 0x484   :  { %v1917_v40 = vadd.f32 %v1916_v35, %v8433_v11 }
 0x485   :  { %v2006_v34 = vpack.c.bf16 %v1915_v27, %v1911_v46 }
 0x486   :  { %v2007_v43 = vpack.c.bf16 %v1917_v40, %v1913_v33 }
 0x487   :  { %v2022_v23 = vmax.bf16 %v8315_v37, %v2006_v34 }
 0x488   :  { %v1920_v28 = vpop.f32.mrb[96].mxu1  ;;  %v2023_v41 = vmax.bf16 %v8315_v37, %v2007_v43  ;;  %v8436_v43 = vld [vmem:[#allocation11_spill] sm:$0xff] }
 0x489   :  { %v1922_v30 = vpop.f32.mrb[97].mxu1  ;;  %v1921_v48 = vadd.f32 %v1920_v28, %v8434_v9 }
 0x48a   :  { %v1924_v39 = vpop.f32.mrb[98].mxu1  ;;  %2183 = vmatprep.subr.bf16.mxu0 %v2023_v41  ;;  %v1923_v5 = vadd.f32 %v1922_v30, %v8434_v9  ;;  %v8437_v41 = vld [vmem:[#allocation20_spill] sm:$0xff] }
 0x48b   :  { %v1925_v18 = vadd.f32 %v1924_v39, %v8435_v58  ;;  %v1926_v22 = vpop.f32.mrb[99].mxu1  ;;  %2184 = vmatpush1.bf16.msra.mxu0 %v2022_v23 }
 0x48c   :  { %v1927_v3 = vadd.f32 %v1926_v22, %v8435_v58 }
 0x48d   :  { %v2008_v46 = vpack.c.bf16 %v1925_v18, %v1921_v48 }
 0x48e   :  { %v2009_v11 = vpack.c.bf16 %v1927_v3, %v1923_v5 }
 0x48f   :  { %v2024_v33 = vmax.bf16 %v8315_v37, %v2008_v46  ;;  %v8438_v46 = vld [vmem:[#allocation13_spill] sm:$0xff] }
 0x490   :  { %v1930_v27 = vpop.f32.mrb[100].mxu1  ;;  %v2025_v35 = vmax.bf16 %v8315_v37, %v2009_v11 }
 0x491   :  { %v1932_v40 = vpop.f32.mrb[101].mxu1  ;;  %v1931_v28 = vadd.f32 %v1930_v27, %v8436_v43  ;;  %v8439_v27 = vld [vmem:[#allocation22_spill] sm:$0xff] }
 0x492   :  { %v1934_v34 = vpop.f32.mrb[102].mxu1  ;;  %2185 = vmatprep.subr.bf16.mxu0 %v2025_v35  ;;  %v1933_v9 = vadd.f32 %v1932_v40, %v8436_v43 }
 0x493   :  { %v1935_v39 = vadd.f32 %v1934_v34, %v8437_v41  ;;  %v1936_v31 = vpop.f32.mrb[103].mxu1  ;;  %2186 = vmatpush1.bf16.msra.mxu0 %v2024_v33 }
 0x494   :  { %v1937_v23 = vadd.f32 %v1936_v31, %v8437_v41 }
 0x495   :  { %v2010_v18 = vpack.c.bf16 %v1935_v39, %v1931_v28 }
 0x496   :  { %v2011_v48 = vpack.c.bf16 %v1937_v23, %v1933_v9 }
 0x497   :  { %v2026_v22 = vmax.bf16 %v8315_v37, %v2010_v18  ;;  %v8440_v18 = vld [vmem:[#allocation15_spill] sm:$0xff] }
 0x498   :  { %v1940_v30 = vpop.f32.mrb[104].mxu1  ;;  %v2027_v58 = vmax.bf16 %v8315_v37, %v2011_v48 }
 0x499   :  { %v1942_v5 = vpop.f32.mrb[105].mxu1  ;;  %v1941_v11 = vadd.f32 %v1940_v30, %v8438_v46  ;;  %v8441_v30 = vld [vmem:[#allocation24_spill] sm:$0xff] }
 0x49a   :  { %v1944_v3 = vpop.f32.mrb[106].mxu1  ;;  %2187 = vmatprep.subr.bf16.mxu0 %v2027_v58  ;;  %v1943_v33 = vadd.f32 %v1942_v5, %v8438_v46 }
 0x49b   :  { %v1945_v35 = vadd.f32 %v1944_v3, %v8439_v27  ;;  %v1946_v34 = vpop.f32.mrb[107].mxu1  ;;  %2188 = vmatpush1.bf16.msra.mxu0 %v2026_v22 }
 0x49c   :  { %v1947_v31 = vadd.f32 %v1946_v34, %v8439_v27 }
 0x49d   :  { %v2012_v40 = vpack.c.bf16 %v1945_v35, %v1941_v11 }
 0x49e   :  { %v2013_v43 = vpack.c.bf16 %v1947_v31, %v1943_v33 }
 0x49f   :  { %v2028_v39 = vmax.bf16 %v8315_v37, %v2012_v40  ;;  %v8442_v40 = vld [vmem:[#allocation17_spill] sm:$0xff] }
 0x4a0   :  { %v1950_v28 = vpop.f32.mrb[108].mxu1  ;;  %v2029_v41 = vmax.bf16 %v8315_v37, %v2013_v43 }
 0x4a1   :  { %v1952_v9 = vpop.f32.mrb[109].mxu1  ;;  %v1951_v48 = vadd.f32 %v1950_v28, %v8440_v18  ;;  %v8443_v28 = vld [vmem:[#allocation26_spill] sm:$0xff] }
 0x4a2   :  { %v1954_v23 = vpop.f32.mrb[110].mxu1  ;;  %2189 = vmatprep.subr.bf16.mxu0 %v2029_v41  ;;  %v1953_v22 = vadd.f32 %v1952_v9, %v8440_v18 }
 0x4a3   :  { %v1955_v58 = vadd.f32 %v1954_v23, %v8441_v30  ;;  %v1956_v3 = vpop.f32.mrb[111].mxu1  ;;  %2190 = vmatpush1.bf16.msra.mxu0 %v2028_v39 }
 0x4a4   :  { %v1957_v5 = vadd.f32 %v1956_v3, %v8441_v30 }
 0x4a5   :  { %v2014_v46 = vpack.c.bf16 %v1955_v58, %v1951_v48 }
 0x4a6   :  { %v2015_v11 = vpack.c.bf16 %v1957_v5, %v1953_v22 }
 0x4a7   :  { %v2030_v34 = vmax.bf16 %v8315_v37, %v2014_v46  ;;  %v8444_v46 = vld [vmem:[#allocation19_spill] sm:$0xff] }
 0x4a8   :  { %v1960_v27 = vpop.f32.mrb[112].mxu1  ;;  %v2031_v35 = vmax.bf16 %v8315_v37, %v2015_v11 }
 0x4a9   :  { %v1962_v33 = vpop.f32.mrb[113].mxu1  ;;  %v1961_v43 = vadd.f32 %v1960_v27, %v8442_v40  ;;  %v8445_v27 = vld [vmem:[#allocation30_spill] sm:$0xff] }
 0x4aa   :  { %v1964_v31 = vpop.f32.mrb[114].mxu1  ;;  %2191 = vmatprep.subr.bf16.mxu0 %v2031_v35  ;;  %v1963_v39 = vadd.f32 %v1962_v33, %v8442_v40 }
 0x4ab   :  { %v1965_v41 = vadd.f32 %v1964_v31, %v8443_v28  ;;  %v1966_v23 = vpop.f32.mrb[115].mxu1  ;;  %2192 = vmatpush1.bf16.msra.mxu0 %v2030_v34 }
 0x4ac   :  { %v1967_v9 = vadd.f32 %v1966_v23, %v8443_v28 }
 0x4ad   :  { %v2016_v18 = vpack.c.bf16 %v1965_v41, %v1961_v43 }
 0x4ae   :  { %v2017_v48 = vpack.c.bf16 %v1967_v9, %v1963_v39 }
 0x4af   :  { %v2032_v3 = vmax.bf16 %v8315_v37, %v2016_v18  ;;  %v8446_v18 = vld [vmem:[#allocation21_spill] sm:$0xff] }
 0x4b0   :  { %v1970_v30 = vpop.f32.mrb[116].mxu1  ;;  %v2033_v58 = vmax.bf16 %v8315_v37, %v2017_v48 }
 0x4b1   :  { %v1972_v22 = vpop.f32.mrb[117].mxu1  ;;  %v1971_v11 = vadd.f32 %v1970_v30, %v8444_v46  ;;  %v8447_v30 = vld [vmem:[#allocation38_spill] sm:$0xff] }
 0x4b2   :  { %v1974_v5 = vpop.f32.mrb[118].mxu1  ;;  %2193 = vmatprep.subr.bf16.mxu0 %v2033_v58  ;;  %v1973_v34 = vadd.f32 %v1972_v22, %v8444_v46 }
 0x4b3   :  { %v1975_v35 = vadd.f32 %v1974_v5, %v8445_v27  ;;  %v1976_v31 = vpop.f32.mrb[119].mxu1  ;;  %2194 = vmatpush1.bf16.msra.mxu0 %v2032_v3 }
 0x4b4   :  { %v1977_v33 = vadd.f32 %v1976_v31, %v8445_v27  ;;  %v5367_v31 = vld [vmem:[%s8149_s4 + $0x40] sm:$0xff]  }
 0x4b5   :  { %v2018_v40 = vpack.c.bf16 %v1975_v35, %v1971_v11 }
 0x4b6   :  { %v2019_v43 = vpack.c.bf16 %v1977_v33, %v1973_v34  ;;  %v5368_v34 = vld [vmem:[%s8149_s4 + $0x48] sm:$0xff]   ;;  %v5369_v33 = vld [vmem:[%s8149_s4 + $0x50] sm:$0xff]  }
 0x4b7   :  { %v2034_v23 = vmax.bf16 %v8315_v37, %v2018_v40  ;;  %v5370_v40 = vld [vmem:[%s8149_s4 + $0x58] sm:$0xff]  }
 0x4b8   :  { %v1980_v28 = vpop.f32.mrb[120].mxu1  ;;  %v2035_v41 = vmax.bf16 %v8315_v37, %v2019_v43  ;;  %v5371_v43 = vld [vmem:[%s8149_s4 + $0x60] sm:$0xff]  }
 0x4b9   :  { %v1982_v39 = vpop.f32.mrb[121].mxu1  ;;  %v1981_v48 = vadd.f32 %v1980_v28, %v8446_v18  ;;  %v5372_v28 = vld [vmem:[%s8149_s4 + $0x68] sm:$0xff]  }
 0x4ba   :  { %v1984_v9 = vpop.f32.mrb[122].mxu1  ;;  %2195 = vmatprep.subr.bf16.mxu0 %v2035_v41  ;;  %v1983_v3 = vadd.f32 %v1982_v39, %v8446_v18  ;;  %v5373_v41 = vld [vmem:[%s8149_s4 + $0x70] sm:$0xff]   ;;  %v1650_v39 = vadd.f32 nan, %v6763_v45  ;;  %v1652_v18 = vadd.f32 nan, %v6777_v26 }
 0x4bb   :  { %v1985_v58 = vadd.f32 %v1984_v9, %v8447_v30  ;;  %v1986_v5 = vpop.f32.mrb[123].mxu1  ;;  %2196 = vmatpush1.bf16.msra.mxu0 %v2034_v23  ;;  %v5374_v23 = vld [vmem:[%s8149_s4 + $0x78] sm:$0xff]   ;;  %v1651_v9 = vadd.f32 nan, %v6770_v17 }
 0x4bc   :  { %v1987_v22 = vadd.f32 %v1986_v5, %v8447_v30  ;;  %v8448_v30 = vld [vmem:[#allocation23_spill] sm:$0xff] }
 0x4bd   :  { %v2020_v46 = vpack.c.bf16 %v1985_v58, %v1981_v48  ;;  %v1653_v48 = vadd.f32 nan, %v6783_v10  ;;  %v4939_v58 = vadd.f32 %v8448_v30, %v1650_v39  ;;  %v1654_v10 = vadd.f32 nan, %v6801_v32 }
 0x4be   :  { %v2021_v11 = vpack.c.bf16 %v1987_v22, %v1983_v3  ;;  %v4941_v3 = vadd.f32 %v8448_v30, %v1651_v9  ;;  %v1658_v39 = vadd.f32 nan, %v6839_v4 }
 0x4bf   :  { %v2036_v35 = vmax.bf16 %v8315_v37, %v2020_v46 }
 0x4c0   :  { %v2037_v27 = vmax.bf16 %v8315_v37, %v2021_v11  ;;  %v8449_v11 = vld [vmem:[#allocation46_spill] sm:$0xff] }
 0x4c1   :  { %v4945_v26 = vadd.f32 %v8449_v11, %v1653_v48 }
 0x4c2   :  { %2197 = vmatprep.subr.bf16.mxu0 %v2037_v27  ;;  %v4943_v27 = vadd.f32 %v8449_v11, %v1652_v18  ;;  %v8453_v18 = vld [vmem:[#allocation54_spill] sm:$0xff] }
 0x4c3   :  { %2198 = vmatpush1.bf16.msra.mxu0 %v2036_v35 }
 0x4c6   :  { %2216 = vmatmul.mubr.bf16.vlgmr.msra.gmra.mrb[64].mxu0 %v5367_v31 }
 0x4c7   :  { %2225 = vmatprep.mubr.bf16.mxu0 %v8315_v37 }
 0x4ce   :  { %2226 = vmatmul.mubr.bf16.gmra.mrb[68].mxu0 %v5368_v34  ;;  %v1655_v34 = vadd.f32 nan, %v6808_v53 }
 0x4cf   :  { %2235 = vmatprep.mubr.bf16.mxu0 %v8315_v37 }
 0x4d6   :  { %2236 = vmatmul.mubr.bf16.gmra.mrb[72].mxu0 %v5369_v33  ;;  %v1656_v33 = vadd.f32 nan, %v6815_v29 }
 0x4d7   :  { %2245 = vmatprep.mubr.bf16.mxu0 %v8315_v37 }
 0x4d8   :  { %v4951_v29 = vadd.f32 %v8453_v18, %v1656_v33 }
 0x4de   :  { %2246 = vmatmul.mubr.bf16.gmra.mrb[76].mxu0 %v5370_v40 }
 0x4df   :  { %2255 = vmatprep.mubr.bf16.mxu0 %v8315_v37 }
 0x4e6   :  { %2256 = vmatmul.mubr.bf16.gmra.mrb[80].mxu0 %v5371_v43 }
 0x4e7   :  { %2265 = vmatprep.mubr.bf16.mxu0 %v8315_v37 }
 0x4ee   :  { %2266 = vmatmul.mubr.bf16.gmra.mrb[84].mxu0 %v5372_v28  ;;  %v1657_v28 = vadd.f32 nan, %v6821_v15 }
 0x4ef   :  { %2275 = vmatprep.mubr.bf16.mxu0 %v8315_v37 }
 0x4f0   :  { %v4953_v33 = vadd.f32 %v8453_v18, %v1657_v28 }
 0x4f6   :  { %2276 = vmatmul.mubr.bf16.gmra.mrb[88].mxu0 %v5373_v41  ;;  %v8452_v41 = vld [vmem:[#allocation25_spill] sm:$0xff] }
 0x4f7   :  { %2285 = vmatprep.mubr.bf16.mxu0 %v8315_v37  ;;  %v4949_v53 = vadd.f32 %v8452_v41, %v1655_v34 }
 0x4fe   :  { %2286 = vmatmul.mubr.bf16.gmra.mrb[92].mxu0 %v5374_v23  ;;  %v4947_v23 = vadd.f32 %v8452_v41, %v1654_v10  ;;  %v1660_v10 = vadd.f32 nan, %v6853_v12 }
 0x4ff   :  { %2893 = vmatprep.mubr.bf16.mxu0 %v8315_v37 }
 0x599   :  { %v7168_v5 = vpop.f32.mrb[64].mxu0 }
 0x59a   :  { %v7172_v22 = vadd.f32 %v4939_v58, %v7168_v5  ;;  %v7174_v46 = vpop.f32.mrb[65].mxu0  ;;  %v1659_v58 = vadd.f32 nan, %v6846_v57 }
 0x59b   :  { %v7178_v45 = vadd.f32 %v4941_v3, %v7174_v46  ;;  %v7180_v17 = vpop.f32.mrb[66].mxu0 }
 0x59c   :  { %v7185_v35 = vadd.f32 %v4943_v27, %v7180_v17  ;;  %v7187_v31 = vpop.f32.mrb[67].mxu0 }
 0x59d   :  { %v7192_v40 = vadd.f32 %v4945_v26, %v7187_v31 }
 0x59e   :  { %8450 = vst [vmem:[#allocation14_spill] sm:$0xff] %v7185_v35  ;;  %v2377_v43 = vpack.c.bf16 %v7185_v35, %v7172_v22 }
 0x59f   :  { %8451 = vst [vmem:[#allocation8_spill] sm:$0xff] %v7192_v40  ;;  %v2378_v32 = vpack.c.bf16 %v7192_v40, %v7178_v45 }
 0x5a0   :  { %v2393_v3 = vmax.bf16 %v8315_v37, %v2377_v43 }
 0x5a1   :  { %v2227_v9 = vpop.f32.mrb[68].mxu0  ;;  %v2394_v48 = vmax.bf16 %v8315_v37, %v2378_v32  ;;  %v1661_v32 = vadd.f32 nan, %v6859_v61 }
 0x5a2   :  { %v2228_v15 = vadd.f32 %v2227_v9, %v8452_v41  ;;  %v7207_v27 = vadd.f32 %v4947_v23, %v2227_v9  ;;  %v2229_v26 = vpop.f32.mrb[69].mxu0 }
 0x5a3   :  { %v2230_v4 = vadd.f32 %v2229_v26, %v8452_v41  ;;  %v7211_v40 = vadd.f32 %v4949_v53, %v2229_v26  ;;  %v2231_v34 = vpop.f32.mrb[70].mxu0  ;;  %2554 = vmatprep.subr.bf16.mxu1 %v2394_v48  ;;  %v8456_v53 = vld [vmem:[#allocation29_spill] sm:$0xff] }
 0x5a4   :  { %v2300_v57 = vadd.f32 %v6792_v13, %v2228_v15  ;;  %v2232_v43 = vadd.f32 %v2231_v34, %v8453_v18  ;;  %v7217_v35 = vadd.f32 %v4951_v29, %v2231_v34  ;;  %v2233_v23 = vpop.f32.mrb[71].mxu0  ;;  %2555 = vmatpush1.bf16.msra.mxu1 %v2393_v3  ;;  %v4955_v48 = vadd.f32 %v8456_v53, %v1658_v39  ;;  %v8457_v3 = vld [vmem:[#allocation62_spill] sm:$0xff] }
 0x5a5   :  { %v2301_v12 = vadd.f32 %v6796_v24, %v2230_v4  ;;  %v2234_v41 = vadd.f32 %v2233_v23, %v8453_v18  ;;  %v7221_v9 = vadd.f32 %v4953_v33, %v2233_v23  ;;  %v4957_v61 = vadd.f32 %v8456_v53, %v1659_v58  ;;  %v8458_v33 = vld [vmem:[#allocation27_spill] sm:$0xff] }
 0x5a6   :  { %8454 = vst [vmem:[#allocation16_spill] sm:$0xff] %v7217_v35  ;;  %v2332_v26 = vadd.f32 nan, %v2300_v57  ;;  %v2302_v28 = vadd.f32 %v6804_v36, %v2232_v43  ;;  %v2379_v13 = vpack.c.bf16 %v7217_v35, %v7207_v27  ;;  %v4959_v18 = vadd.f32 %v8457_v3, %v1660_v10 }
 0x5a7   :  { %8455 = vst [vmem:[#allocation9_spill] sm:$0xff] %v7221_v9  ;;  %v2333_v29 = vadd.f32 nan, %v2301_v12  ;;  %v2303_v15 = vadd.f32 %v6811_v51, %v2234_v41  ;;  %v2380_v24 = vpack.c.bf16 %v7221_v9, %v7211_v40  ;;  %v1662_v4 = vadd.f32 nan, %v6877_v54  ;;  %v8459_v51 = vld [vmem:[#allocation28_spill] sm:$0xff] }
 0x5a8   :  { %v2334_v34 = vadd.f32 nan, %v2302_v28  ;;  %v4961_v39 = vadd.f32 %v8457_v3, %v1661_v32  ;;  %v7235_v36 = vadd.f32 %v2332_v26, %v8458_v33  ;;  %v1663_v57 = vadd.f32 nan, %v6884_v62  ;;  %v8460_v32 = vld [vmem:[#allocation31_spill] sm:$0xff] }
 0x5a9   :  { %v2335_v43 = vadd.f32 nan, %v2303_v15  ;;  %v2237_v58 = vpop.f32.mrb[72].mxu0  ;;  %v2396_v23 = vmax.bf16 %v8315_v37, %v2380_v24  ;;  %v7240_v12 = vadd.f32 %v2333_v29, %v8459_v51  ;;  %v2395_v41 = vmax.bf16 %v8315_v37, %v2379_v13  ;;  %v8461_v29 = vld [vmem:[#allocation32_spill] sm:$0xff] }
 0x5aa   :  { %v2238_v10 = vadd.f32 %v2237_v58, %v8456_v53  ;;  %v7244_v54 = vadd.f32 %v4955_v48, %v2237_v58  ;;  %v2239_v28 = vpop.f32.mrb[73].mxu0  ;;  %v7247_v9 = vadd.f32 %v2334_v34, %v8460_v32  ;;  %v1664_v26 = vadd.f32 nan, %v6891_v7 }
 0x5ab   :  { %v2240_v62 = vadd.f32 %v2239_v28, %v8456_v53  ;;  %v7251_v15 = vadd.f32 %v4957_v61, %v2239_v28  ;;  %v2241_v24 = vpop.f32.mrb[74].mxu0  ;;  %2556 = vmatprep.subr.bf16.mxu1 %v2396_v23  ;;  %v7254_v51 = vadd.f32 %v2335_v43, %v8461_v29  ;;  %v1665_v13 = vadd.f32 nan, %v6897_v50  ;;  %v8464_v23 = vld [vmem:[#allocation36_spill] sm:$0xff] }
 0x5ac   :  { %v2304_v48 = vadd.f32 %v6830_v55, %v2238_v10  ;;  %v2242_v58 = vadd.f32 %v2241_v24, %v8457_v3  ;;  %v7259_v35 = vadd.f32 %v4959_v18, %v2241_v24  ;;  %v2243_v34 = vpop.f32.mrb[75].mxu0  ;;  %2557 = vmatpush1.bf16.msra.mxu1 %v2395_v41  ;;  %v4963_v28 = vadd.f32 %v8464_v23, %v1662_v4  ;;  %v8465_v41 = vld [vmem:[#allocation66_spill] sm:$0xff]  ;;  %v8466_v24 = vld [vmem:[#allocation33_spill] sm:$0xff] }
 0x5ad   :  { %v2305_v7 = vadd.f32 %v6834_v20, %v2240_v62  ;;  %v2244_v53 = vadd.f32 %v2243_v34, %v8457_v3  ;;  %v7263_v61 = vadd.f32 %v4961_v39, %v2243_v34  ;;  %v4965_v50 = vadd.f32 %v8464_v23, %v1663_v57 }
 0x5ae   :  { %8462 = vst [vmem:[#allocation18_spill] sm:$0xff] %v7259_v35  ;;  %v2336_v43 = vadd.f32 nan, %v2304_v48  ;;  %v2306_v29 = vadd.f32 %v6842_v14, %v2242_v58  ;;  %v2381_v55 = vpack.c.bf16 %v7259_v35, %v7244_v54  ;;  %v4967_v3 = vadd.f32 %v8465_v41, %v1664_v26 }
 0x5af   :  { %8463 = vst [vmem:[#allocation11_spill] sm:$0xff] %v7263_v61  ;;  %v2337_v18 = vadd.f32 nan, %v2305_v7  ;;  %v2307_v10 = vadd.f32 %v6849_v60, %v2244_v53  ;;  %v2382_v20 = vpack.c.bf16 %v7263_v61, %v7251_v15  ;;  %v1666_v39 = vadd.f32 nan, %v6915_v16  ;;  %v8467_v60 = vld [vmem:[#allocation34_spill] sm:$0xff] }
 0x5b0   :  { %v2338_v62 = vadd.f32 nan, %v2306_v29  ;;  %v4969_v4 = vadd.f32 %v8465_v41, %v1665_v13  ;;  %v7277_v14 = vadd.f32 %v2336_v43, %v8466_v24  ;;  %v1667_v48 = vadd.f32 nan, %v6922_v1  ;;  %v8468_v13 = vld [vmem:[#allocation35_spill] sm:$0xff] }
 0x5b1   :  { %v2339_v58 = vadd.f32 nan, %v2307_v10  ;;  %v2247_v57 = vpop.f32.mrb[76].mxu0  ;;  %v2398_v34 = vmax.bf16 %v8315_v37, %v2382_v20  ;;  %v7282_v7 = vadd.f32 %v2337_v18, %v8467_v60  ;;  %v2397_v53 = vmax.bf16 %v8315_v37, %v2381_v55  ;;  %v8469_v18 = vld [vmem:[#allocation37_spill] sm:$0xff] }
 0x5b2   :  { %v2248_v26 = vadd.f32 %v2247_v57, %v8464_v23  ;;  %v7286_v16 = vadd.f32 %v4963_v28, %v2247_v57  ;;  %v2249_v29 = vpop.f32.mrb[77].mxu0  ;;  %v7289_v61 = vadd.f32 %v2338_v62, %v8468_v13  ;;  %v1668_v43 = vadd.f32 nan, %v6929_v19 }
 0x5b3   :  { %v2250_v1 = vadd.f32 %v2249_v29, %v8464_v23  ;;  %v7293_v10 = vadd.f32 %v4965_v50, %v2249_v29  ;;  %v2251_v20 = vpop.f32.mrb[78].mxu0  ;;  %2558 = vmatprep.subr.bf16.mxu1 %v2398_v34  ;;  %v7296_v60 = vadd.f32 %v2339_v58, %v8469_v18  ;;  %v1669_v55 = vadd.f32 nan, %v6935_v59  ;;  %v8472_v34 = vld [vmem:[#allocation44_spill] sm:$0xff] }
 0x5b4   :  { %v2308_v28 = vadd.f32 %v6868_v49, %v2248_v26  ;;  %v2252_v57 = vadd.f32 %v2251_v20, %v8465_v41  ;;  %v7301_v35 = vadd.f32 %v4967_v3, %v2251_v20  ;;  %v2253_v62 = vpop.f32.mrb[79].mxu0  ;;  %2559 = vmatpush1.bf16.msra.mxu1 %v2397_v53  ;;  %v4971_v29 = vadd.f32 %v8472_v34, %v1666_v39  ;;  %v8473_v53 = vld [vmem:[#allocation70_spill] sm:$0xff]  ;;  %v8474_v20 = vld [vmem:[#allocation39_spill] sm:$0xff] }
 0x5b5   :  { %v2309_v19 = vadd.f32 %v6872_v44, %v2250_v1  ;;  %v2254_v23 = vadd.f32 %v2253_v62, %v8465_v41  ;;  %v7305_v50 = vadd.f32 %v4969_v4, %v2253_v62  ;;  %v4973_v59 = vadd.f32 %v8472_v34, %v1667_v48 }
 0x5b6   :  { %8470 = vst [vmem:[#allocation20_spill] sm:$0xff] %v7301_v35  ;;  %v2340_v58 = vadd.f32 nan, %v2308_v28  ;;  %v2310_v18 = vadd.f32 %v6880_v63, %v2252_v57  ;;  %v2383_v49 = vpack.c.bf16 %v7301_v35, %v7286_v16  ;;  %v4975_v41 = vadd.f32 %v8473_v53, %v1668_v43 }
 0x5b7   :  { %8471 = vst [vmem:[#allocation13_spill] sm:$0xff] %v7305_v50  ;;  %v2341_v3 = vadd.f32 nan, %v2309_v19  ;;  %v2311_v26 = vadd.f32 %v6887_v8, %v2254_v23  ;;  %v2384_v44 = vpack.c.bf16 %v7305_v50, %v7293_v10  ;;  %v1670_v4 = vadd.f32 nan, %v6953_v56  ;;  %v8475_v8 = vld [vmem:[#allocation40_spill] sm:$0xff] }
 0x5b8   :  { %v2342_v1 = vadd.f32 nan, %v2310_v18  ;;  %v4977_v39 = vadd.f32 %v8473_v53, %v1669_v55  ;;  %v7319_v63 = vadd.f32 %v2340_v58, %v8474_v20  ;;  %v1671_v28 = vadd.f32 nan, %v6960_v52  ;;  %v8477_v55 = vld [vmem:[#allocation41_spill] sm:$0xff]  ;;  %v8485_v20 = vld [vmem:[#allocation67_spill] sm:$0xff] }
 0x5b9   :  { %v2343_v57 = vadd.f32 nan, %v2311_v26  ;;  %v2257_v48 = vpop.f32.mrb[80].mxu0  ;;  %v2400_v62 = vmax.bf16 %v8315_v37, %v2384_v44  ;;  %v7324_v19 = vadd.f32 %v2341_v3, %v8475_v8  ;;  %v2399_v23 = vmax.bf16 %v8315_v37, %v2383_v49  ;;  %v8479_v3 = vld [vmem:[#allocation42_spill] sm:$0xff] }
 0x5ba   :  { %v2258_v43 = vadd.f32 %v2257_v48, %v8472_v34  ;;  %v7328_v56 = vadd.f32 %v4971_v29, %v2257_v48  ;;  %v2259_v18 = vpop.f32.mrb[81].mxu0  ;;  %v7331_v50 = vadd.f32 %v2342_v1, %v8477_v55  ;;  %v1672_v58 = vadd.f32 nan, %v6967_v25  ;;  %v8481_v25 = vld [vmem:[#allocation117_spill] sm:$0xff] }
 0x5bb   :  { %v2260_v52 = vadd.f32 %v2259_v18, %v8472_v34  ;;  %v7335_v26 = vadd.f32 %v4973_v59, %v2259_v18  ;;  %v2261_v44 = vpop.f32.mrb[82].mxu0  ;;  %2560 = vmatprep.subr.bf16.mxu1 %v2400_v62  ;;  %v7338_v8 = vadd.f32 %v2343_v57, %v8479_v3  ;;  %v1673_v49 = vadd.f32 nan, %v6973_v2  ;;  %v8483_v18 = vld [vmem:[#allocation118_spill] sm:$0xff]  ;;  %v8484_v3 = vld [vmem:[#allocation52_spill] sm:$0xff] }
 0x5bc   :  { %8476 = vst [vmem:[#allocation22_spill] sm:$0xff] %v7328_v56  ;;  %v2312_v29 = vadd.f32 %v6906_v0, %v2258_v43  ;;  %v2262_v48 = vadd.f32 %v2261_v44, %v8473_v53  ;;  %v7343_v35 = vadd.f32 %v4975_v41, %v2261_v44  ;;  %v2263_v1 = vpop.f32.mrb[83].mxu0  ;;  %2561 = vmatpush1.bf16.msra.mxu1 %v2399_v23 }
 0x5bd   :  { %8478 = vst [vmem:[#allocation15_spill] sm:$0xff] %v7335_v26  ;;  %v2313_v55 = vadd.f32 %v8481_v25, %v2260_v52  ;;  %v2264_v34 = vadd.f32 %v2263_v1, %v8473_v53  ;;  %v7347_v59 = vadd.f32 %v4977_v39, %v2263_v1  ;;  %v4979_v0 = vadd.f32 %v8484_v3, %v1670_v4  ;;  %v8486_v53 = vld [vmem:[#allocation73_spill] sm:$0xff]  ;;  %v8487_v1 = vld [vmem:[#allocation43_spill] sm:$0xff] }
 0x5be   :  { %8480 = vst [vmem:[#allocation24_spill] sm:$0xff] %v7343_v35  ;;  %v2344_v62 = vadd.f32 nan, %v2312_v29  ;;  %v2314_v57 = vadd.f32 %v8483_v18, %v2262_v48  ;;  %v2385_v2 = vpack.c.bf16 %v7343_v35, %v7328_v56  ;;  %v4981_v52 = vadd.f32 %v8484_v3, %v1671_v28  ;;  %v8497_v56 = vld [vmem:[#allocation68_spill] sm:$0xff] }
 0x5bf   :  { %8482 = vst [vmem:[#allocation17_spill] sm:$0xff] %v7347_v59  ;;  %v2345_v43 = vadd.f32 nan, %v2313_v55  ;;  %v2315_v41 = vadd.f32 %v8485_v20, %v2264_v34  ;;  %v2386_v23 = vpack.c.bf16 %v7347_v59, %v7335_v26  ;;  %v4983_v39 = vadd.f32 %v8486_v53, %v1672_v58  ;;  %v8488_v20 = vld [vmem:[#allocation45_spill] sm:$0xff] }
 0x5c0   :  { %v2346_v44 = vadd.f32 nan, %v2314_v57  ;;  %v4985_v29 = vadd.f32 %v8486_v53, %v1673_v49  ;;  %v7360_v48 = vadd.f32 %v2344_v62, %v8487_v1  ;;  %v1674_v25 = vadd.f32 nan, %v6991_v6  ;;  %v8490_v49 = vld [vmem:[#allocation47_spill] sm:$0xff]  ;;  %v8492_v62 = vld [vmem:[#allocation74_spill] sm:$0xff] }
 0x5c1   :  { %v2347_v18 = vadd.f32 nan, %v2315_v41  ;;  %v2267_v4 = vpop.f32.mrb[84].mxu0  ;;  %v2402_v55 = vmax.bf16 %v8315_v37, %v2386_v23  ;;  %v7365_v34 = vadd.f32 %v2345_v43, %v8488_v20  ;;  %v2401_v59 = vmax.bf16 %v8315_v37, %v2385_v2  ;;  %v8494_v43 = vld [vmem:[#allocation48_spill] sm:$0xff]  ;;  %v8496_v2 = vld [vmem:[#allocation6_spill] sm:$0xff] }
 0x5c2   :  { %v2268_v28 = vadd.f32 %v2267_v4, %v8484_v3  ;;  %v7369_v57 = vadd.f32 %v4979_v0, %v2267_v4  ;;  %v2269_v58 = vpop.f32.mrb[85].mxu0  ;;  %v7372_v35 = vadd.f32 %v2346_v44, %v8490_v49  ;;  %v1675_v1 = vadd.f32 nan, %v8492_v62  ;;  %v8499_v62 = vld [vmem:[#allocation12_spill] sm:$0xff] }
 0x5c3   :  { %8489 = vst [vmem:[#allocation26_spill] sm:$0xff] %v7365_v34  ;;  %v2270_v6 = vadd.f32 %v2269_v58, %v8484_v3  ;;  %v7376_v41 = vadd.f32 %v4981_v52, %v2269_v58  ;;  %v2271_v23 = vpop.f32.mrb[86].mxu0  ;;  %2562 = vmatprep.subr.bf16.mxu1 %v2402_v55  ;;  %v7379_v20 = vadd.f32 %v2347_v18, %v8494_v43  ;;  %v1676_v26 = vadd.f32 nan, %v8496_v2  ;;  %v8500_v3 = vld [vmem:[#allocation69_spill] sm:$0xff]  ;;  %v8503_v2 = vld [vmem:[#allocation10_spill] sm:$0xff] }
 0x5c4   :  { %8491 = vst [vmem:[#allocation19_spill] sm:$0xff] %v7372_v35  ;;  %v2316_v0 = vadd.f32 %v8497_v56, %v2268_v28  ;;  %v2272_v4 = vadd.f32 %v2271_v23, %v8486_v53  ;;  %v7384_v34 = vadd.f32 %v4983_v39, %v2271_v23  ;;  %v2273_v44 = vpop.f32.mrb[87].mxu0  ;;  %2563 = vmatpush1.bf16.msra.mxu1 %v2401_v59  ;;  %v1677_v49 = vadd.f32 nan, %v8499_v62  ;;  %v8502_v43 = vld [vmem:[#allocation5_spill] sm:$0xff]  ;;  %v8504_v23 = vld [vmem:[#allocation59_spill] sm:$0xff] }
 0x5c5   :  { %8493 = vst [vmem:[#allocation30_spill] sm:$0xff] %v7376_v41  ;;  %8495 = vst [vmem:[#allocation21_spill] sm:$0xff] %v7379_v20  ;;  %v2317_v52 = vadd.f32 %v8500_v3, %v2270_v6  ;;  %v2274_v58 = vadd.f32 %v2273_v44, %v8486_v53  ;;  %v7389_v55 = vadd.f32 %v4985_v29, %v2273_v44  ;;  %v8505_v53 = vld [vmem:[#allocation76_spill] sm:$0xff]  ;;  %v8506_v44 = vld [vmem:[#allocation49_spill] sm:$0xff] }
 0x5c6   :  { %8498 = vst [vmem:[#allocation38_spill] sm:$0xff] %v7384_v34  ;;  %v2348_v18 = vadd.f32 nan, %v2316_v0  ;;  %v2318_v20 = vadd.f32 %v8502_v43, %v2272_v4  ;;  %v2387_v56 = vpack.c.bf16 %v7384_v34, %v7369_v57  ;;  %v4987_v62 = vadd.f32 %v8504_v23, %v1674_v25 }
 0x5c7   :  { %8501 = vst [vmem:[#allocation23_spill] sm:$0xff] %v7389_v55  ;;  %v2349_v28 = vadd.f32 nan, %v2317_v52  ;;  %v2319_v39 = vadd.f32 %v8503_v2, %v2274_v58  ;;  %v2388_v59 = vpack.c.bf16 %v7389_v55, %v7376_v41  ;;  %v4989_v6 = vadd.f32 %v8504_v23, %v1675_v1  ;;  %v8507_v58 = vld [vmem:[#allocation50_spill] sm:$0xff] }
 0x5c8   :  { %v2350_v35 = vadd.f32 nan, %v2318_v20  ;;  %v4991_v29 = vadd.f32 %v8505_v53, %v1676_v26  ;;  %v7401_v0 = vadd.f32 %v2348_v18, %v8506_v44  ;;  %v4993_v52 = vadd.f32 %v8505_v53, %v1677_v49  ;;  %v8509_v26 = vld [vmem:[#allocation51_spill] sm:$0xff] }
 0x5c9   :  { %v2351_v43 = vadd.f32 nan, %v2319_v39  ;;  %v2277_v4 = vpop.f32.mrb[88].mxu0  ;;  %v2404_v3 = vmax.bf16 %v8315_v37, %v2388_v59  ;;  %v7406_v2 = vadd.f32 %v2349_v28, %v8507_v58  ;;  %v2403_v55 = vmax.bf16 %v8315_v37, %v2387_v56  ;;  %v8511_v28 = vld [vmem:[#allocation53_spill] sm:$0xff]  ;;  %v8512_v44 = vld [vmem:[#allocation71_spill] sm:$0xff] }
 0x5ca   :  { %v2278_v25 = vadd.f32 %v2277_v4, %v8504_v23  ;;  %v7410_v20 = vadd.f32 %v4987_v62, %v2277_v4  ;;  %v2279_v1 = vpop.f32.mrb[89].mxu0  ;;  %v7413_v34 = vadd.f32 %v2350_v35, %v8509_v26  ;;  %v1678_v18 = vadd.f32 nan, %v7028_v21 }
 0x5cb   :  { %v2280_v39 = vadd.f32 %v2279_v1, %v8504_v23  ;;  %v7417_v59 = vadd.f32 %v4989_v6, %v2279_v1  ;;  %v2281_v49 = vpop.f32.mrb[90].mxu0  ;;  %2564 = vmatprep.subr.bf16.mxu1 %v2404_v3  ;;  %v7420_v58 = vadd.f32 %v2351_v43, %v8511_v28  ;;  %v1679_v56 = vadd.f32 nan, %v7034_v38  ;;  %v8515_v1 = vld [vmem:[#allocation72_spill] sm:$0xff] }
 0x5cc   :  { %8508 = vst [vmem:[#allocation46_spill] sm:$0xff] %v7410_v20  ;;  %v2320_v62 = vadd.f32 %v8512_v44, %v2278_v25  ;;  %v2282_v4 = vadd.f32 %v2281_v49, %v8505_v53  ;;  %v7425_v41 = vadd.f32 %v4991_v29, %v2281_v49  ;;  %v2283_v35 = vpop.f32.mrb[91].mxu0  ;;  %2565 = vmatpush1.bf16.msra.mxu1 %v2403_v55  ;;  %v1680_v21 = vadd.f32 nan, %v7040_v47  ;;  %v8516_v44 = vld [vmem:[#allocation7_spill] sm:$0xff]  ;;  %v2133_v55 = vpop.permute.xlu1 %2132 }
 0x5cd   :  { %8510 = vst [vmem:[#allocation25_spill] sm:$0xff] %v7417_v59  ;;  %v2321_v23 = vadd.f32 %v6986_v42, %v2280_v39  ;;  %v2284_v6 = vadd.f32 %v2283_v35, %v8505_v53  ;;  %v7430_v3 = vadd.f32 %v4993_v52, %v2283_v35  ;;  %v1681_v25 = vadd.f32 nan, %v8516_v44  ;;  %v8517_v49 = vld [vmem:[#allocation75_spill] sm:$0xff]  ;;  %v8518_v39 = vld [vmem:[#allocation65_spill] sm:$0xff] }
 0x5ce   :  { %8513 = vst [vmem:[#allocation54_spill] sm:$0xff] %v7425_v41  ;;  %v2352_v43 = vadd.f32 nan, %v2320_v62  ;;  %v2322_v28 = vadd.f32 %v8515_v1, %v2282_v4  ;;  %v2389_v38 = vpack.c.bf16 %v7425_v41, %v7410_v20  ;;  %v4995_v53 = vadd.f32 %v8518_v39, %v1678_v18  ;;  %v8519_v62 = vld [vmem:[#allocation55_spill] sm:$0xff] }
 0x5cf   :  { %8514 = vst [vmem:[#allocation29_spill] sm:$0xff] %v7430_v3  ;;  %v2353_v29 = vadd.f32 nan, %v2321_v23  ;;  %v2323_v26 = vadd.f32 %v8517_v49, %v2284_v6  ;;  %v2390_v47 = vpack.c.bf16 %v7430_v3, %v7417_v59  ;;  %v4997_v52 = vadd.f32 %v8518_v39, %v1679_v56  ;;  %v8520_v23 = vld [vmem:[#allocation56_spill] sm:$0xff]  ;;  %v8523_v3 = vld [vmem:[#allocation57_spill] sm:$0xff] }
 0x5d0   :  { %v2354_v42 = vadd.f32 nan, %v2322_v28  ;;  %v7442_v35 = vadd.f32 %v2352_v43, %v8519_v62  ;;  %v4999_v41 = vadd.f32 %v2133_v55, %v1680_v21  ;;  %v2405_v6 = vmax.bf16 %v8315_v37, %v2389_v38  ;;  %v8526_v62 = vld [vmem:[#allocation58_spill] sm:$0xff] }
 0x5d1   :  { %v2355_v4 = vadd.f32 nan, %v2323_v26  ;;  %v2287_v1 = vpop.f32.mrb[92].mxu0  ;;  %v2406_v44 = vmax.bf16 %v8315_v37, %v2390_v47  ;;  %v7446_v20 = vadd.f32 %v2353_v29, %v8520_v23  ;;  %v5001_v47 = vadd.f32 %v2133_v55, %v1681_v25  ;;  %v8527_v23 = vld [vmem:[#allocation77_spill] sm:$0xff] }
 0x5d2   :  { %v2288_v49 = vadd.f32 %v2287_v1, %v8518_v39  ;;  %v7450_v28 = vadd.f32 %v4995_v53, %v2287_v1  ;;  %v2289_v18 = vpop.f32.mrb[93].mxu0  ;;  %v7453_v56 = vadd.f32 %v2354_v42, %v8523_v3  ;;  %v8529_v1 = vld [vmem:[#allocation78_spill] sm:$0xff] }
 0x5d3   :  { %8521 = vst [vmem:[#allocation62_spill] sm:$0xff] %v7446_v20  ;;  %v2290_v43 = vadd.f32 %v2289_v18, %v8518_v39  ;;  %v7456_v26 = vadd.f32 %v4997_v52, %v2289_v18  ;;  %v2291_v21 = vpop.f32.mrb[94].mxu0  ;;  %2566 = vmatprep.subr.bf16.mxu1 %v2406_v44  ;;  %v7459_v29 = vadd.f32 %v2355_v4, %v8526_v62  ;;  %v8531_v52 = vld [vmem:[#allocation79_spill] sm:$0xff]  ;;  %v8532_v44 = vld [vmem:[#allocation80_spill] sm:$0xff] }
 0x5d4   :  { %8522 = vst [vmem:[#allocation27_spill] sm:$0xff] %v7450_v28  ;;  %8524 = vst [vmem:[#allocation31_spill] sm:$0xff] %v7453_v56  ;;  %v2324_v38 = vadd.f32 %v8527_v23, %v2288_v49  ;;  %v2292_v59 = vadd.f32 %v2291_v21, %v2133_v55  ;;  %v7462_v20 = vadd.f32 %v4999_v41, %v2291_v21  ;;  %v2293_v53 = vpop.f32.mrb[95].mxu0  ;;  %2567 = vmatpush1.bf16.msra.mxu1 %v2405_v6  ;;  %v8533_v49 = vld [vmem:[#allocation60_spill] sm:$0xff]  ;;  %v8534_v21 = vld [vmem:[#allocation61_spill] sm:$0xff] }
 0x5d5   :  { %8525 = vst [vmem:[#allocation36_spill] sm:$0xff] %v7456_v26  ;;  %v2325_v42 = vadd.f32 %v8529_v1, %v2290_v43  ;;  %v2294_v3 = vadd.f32 %v2293_v53, %v2133_v55  ;;  %v7465_v56 = vadd.f32 %v5001_v47, %v2293_v53  ;;  %v8536_v1 = vld [vmem:[#allocation64_spill] sm:$0xff] }
 0x5d6   :  { %8528 = vst [vmem:[#allocation66_spill] sm:$0xff] %v7462_v20  ;;  %v2356_v39 = vadd.f32 nan, %v2324_v38  ;;  %v2326_v18 = vadd.f32 %v8531_v52, %v2292_v59  ;;  %v2391_v25 = vpack.c.bf16 %v7462_v20, %v7450_v28  ;;  %v8535_v38 = vld [vmem:[#allocation63_spill] sm:$0xff] }
 0x5d7   :  { %8530 = vst [vmem:[#allocation33_spill] sm:$0xff] %v7465_v56  ;;  %v2357_v4 = vadd.f32 nan, %v2325_v42  ;;  %v2327_v62 = vadd.f32 %v8532_v44, %v2294_v3  ;;  %v2392_v41 = vpack.c.bf16 %v7465_v56, %v7456_v26  ;;  %v5375_v3 = vld [vmem:[%s8147_s2 + $0x80] sm:$0xff]   ;;  %v5378_v52 = vld [vmem:[%s8147_s2 + $0x98] sm:$0xff]  }
 0x5d8   :  { %v2358_v23 = vadd.f32 nan, %v2326_v18  ;;  %v7474_v6 = vadd.f32 %v2356_v39, %v8533_v49  ;;  %v2407_v59 = vmax.bf16 %v8315_v37, %v2391_v25  ;;  %v5377_v39 = vld [vmem:[%s8147_s2 + $0x90] sm:$0xff]   ;;  %v5379_v18 = vld [vmem:[%s8147_s2 + $0xa0] sm:$0xff]   ;;  %v5380_v25 = vld [vmem:[%s8147_s2 + $0xa8] sm:$0xff]  }
 0x5d9   :  { %v2359_v43 = vadd.f32 nan, %v2327_v62  ;;  %v2408_v55 = vmax.bf16 %v8315_v37, %v2392_v41  ;;  %v7478_v47 = vadd.f32 %v2357_v4, %v8534_v21  ;;  %v5376_v62 = vld [vmem:[%s8147_s2 + $0x88] sm:$0xff]   ;;  %v5381_v4 = vld [vmem:[%s8147_s2 + $0xb0] sm:$0xff]   ;;  %v5382_v44 = vld [vmem:[%s8147_s2 + $0xb8] sm:$0xff]  }
 0x5da   :  { %v7482_v53 = vadd.f32 %v2358_v23, %v8535_v38  ;;  %v2429_v23 = vpop.permute.xlu0 %2428 }
 0x5db   :  { %2568 = vmatprep.subr.bf16.mxu1 %v2408_v55  ;;  %v7488_v42 = vadd.f32 %v2359_v43, %v8536_v1  ;;  %v2434_v55 = vpop.permute.xlu1 %2433 }
 0x5dc   :  { %2569 = vmatpush1.bf16.msra.mxu1 %v2407_v59 }
 0x5dd   :  { %8537 = vst [vmem:[#allocation35_spill] sm:$0xff] %v7488_v42 }
 0x5de   :  { %v2439_v56 = vpop.permute.xlu0 %2438 }
 0x5df   :  { %2587 = vmatmul.mubr.bf16.vlgmr.msra.gmra.mrb[124].mxu1 %v5375_v3  ;;  %v2444_v20 = vpop.permute.xlu1 %2443 }
 0x5e0   :  { %2596 = vmatprep.mubr.bf16.mxu1 %v8315_v37 }
 0x5e7   :  { %2597 = vmatmul.mubr.bf16.gmra.mrb[128].mxu1 %v5376_v62 }
 0x5e8   :  { %2606 = vmatprep.mubr.bf16.mxu1 %v8315_v37 }
 0x5ef   :  { %2607 = vmatmul.mubr.bf16.gmra.mrb[132].mxu1 %v5377_v39 }
 0x5f0   :  { %2616 = vmatprep.mubr.bf16.mxu1 %v8315_v37 }
 0x5f7   :  { %2617 = vmatmul.mubr.bf16.gmra.mrb[136].mxu1 %v5378_v52 }
 0x5f8   :  { %2626 = vmatprep.mubr.bf16.mxu1 %v8315_v37 }
 0x5ff   :  { %2627 = vmatmul.mubr.bf16.gmra.mrb[140].mxu1 %v5379_v18 }
 0x600   :  { %2636 = vmatprep.mubr.bf16.mxu1 %v8315_v37 }
 0x607   :  { %2637 = vmatmul.mubr.bf16.gmra.mrb[144].mxu1 %v5380_v25 }
 0x608   :  { %2646 = vmatprep.mubr.bf16.mxu1 %v8315_v37 }
 0x60f   :  { %2647 = vmatmul.mubr.bf16.gmra.mrb[148].mxu1 %v5381_v4 }
 0x610   :  { %2656 = vmatprep.mubr.bf16.mxu1 %v8315_v37 }
 0x617   :  { %2657 = vmatmul.mubr.bf16.gmra.mrb[152].mxu1 %v5382_v44 }
 0x618   :  { %3264 = vmatprep.mubr.bf16.mxu1 %v8315_v37 }
 0x6b2   :  { %v2588_v41 = vpop.f32.mrb[124].mxu1 }
 0x6b3   :  { %v2590_v43 = vpop.f32.mrb[125].mxu1  ;;  %v2589_v3 = vadd.f32 %v2588_v41, %v2429_v23 }
 0x6b4   :  { %v2592_v59 = vpop.f32.mrb[126].mxu1  ;;  %v2591_v52 = vadd.f32 %v2590_v43, %v2429_v23 }
 0x6b5   :  { %v2593_v62 = vadd.f32 %v2592_v59, %v2434_v55  ;;  %v2594_v39 = vpop.f32.mrb[127].mxu1 }
 0x6b6   :  { %v2595_v18 = vadd.f32 %v2594_v39, %v2434_v55 }
 0x6b7   :  { %v2684_v25 = vpack.c.bf16 %v2593_v62, %v2589_v3  ;;  %v2449_v62 = vpop.permute.xlu0 %2448 }
 0x6b8   :  { %v2685_v4 = vpack.c.bf16 %v2595_v18, %v2591_v52  ;;  %v2454_v18 = vpop.permute.xlu1 %2453 }
 0x6b9   :  { %v2700_v44 = vmax.bf16 %v8315_v37, %v2684_v25 }
 0x6ba   :  { %v2598_v1 = vpop.f32.mrb[128].mxu1  ;;  %v2701_v38 = vmax.bf16 %v8315_v37, %v2685_v4 }
 0x6bb   :  { %v2600_v21 = vpop.f32.mrb[129].mxu1  ;;  %v2599_v26 = vadd.f32 %v2598_v1, %v2439_v56 }
 0x6bc   :  { %v2602_v49 = vpop.f32.mrb[130].mxu1  ;;  %2861 = vmatprep.subr.bf16.mxu0 %v2701_v38  ;;  %v2601_v41 = vadd.f32 %v2600_v21, %v2439_v56  ;;  %v2459_v21 = vpop.permute.xlu0 %2458 }
 0x6bd   :  { %v2603_v28 = vadd.f32 %v2602_v49, %v2444_v20  ;;  %v2604_v42 = vpop.f32.mrb[131].mxu1  ;;  %2862 = vmatpush1.bf16.msra.mxu0 %v2700_v44 }
 0x6be   :  { %v2605_v59 = vadd.f32 %v2604_v42, %v2444_v20 }
 0x6bf   :  { %v2686_v23 = vpack.c.bf16 %v2603_v28, %v2599_v26 }
 0x6c0   :  { %v2687_v43 = vpack.c.bf16 %v2605_v59, %v2601_v41  ;;  %v2464_v59 = vpop.permute.xlu1 %2463 }
 0x6c1   :  { %v2702_v39 = vmax.bf16 %v8315_v37, %v2686_v23 }
 0x6c2   :  { %v2608_v55 = vpop.f32.mrb[132].mxu1  ;;  %v2703_v3 = vmax.bf16 %v8315_v37, %v2687_v43 }
 0x6c3   :  { %v2610_v52 = vpop.f32.mrb[133].mxu1  ;;  %v2609_v4 = vadd.f32 %v2608_v55, %v2449_v62 }
 0x6c4   :  { %v2612_v25 = vpop.f32.mrb[134].mxu1  ;;  %2863 = vmatprep.subr.bf16.mxu0 %v2703_v3  ;;  %v2611_v49 = vadd.f32 %v2610_v52, %v2449_v62 }
 0x6c5   :  { %v2613_v38 = vadd.f32 %v2612_v25, %v2454_v18  ;;  %v2614_v1 = vpop.f32.mrb[135].mxu1  ;;  %2864 = vmatpush1.bf16.msra.mxu0 %v2702_v39 }
 0x6c6   :  { %v2615_v44 = vadd.f32 %v2614_v1, %v2454_v18 }
 0x6c7   :  { %v2688_v56 = vpack.c.bf16 %v2613_v38, %v2609_v4  ;;  %v2469_v38 = vpop.permute.xlu0 %2468 }
 0x6c8   :  { %v2689_v20 = vpack.c.bf16 %v2615_v44, %v2611_v49  ;;  %v2474_v44 = vpop.permute.xlu1 %2473 }
 0x6c9   :  { %v2704_v42 = vmax.bf16 %v8315_v37, %v2688_v56 }
 0x6ca   :  { %v2618_v28 = vpop.f32.mrb[136].mxu1  ;;  %v2705_v26 = vmax.bf16 %v8315_v37, %v2689_v20 }
 0x6cb   :  { %v2620_v41 = vpop.f32.mrb[137].mxu1  ;;  %v2619_v43 = vadd.f32 %v2618_v28, %v2459_v21 }
 0x6cc   :  { %v2622_v23 = vpop.f32.mrb[138].mxu1  ;;  %2865 = vmatprep.subr.bf16.mxu0 %v2705_v26  ;;  %v2621_v25 = vadd.f32 %v2620_v41, %v2459_v21 }
 0x6cd   :  { %v2623_v3 = vadd.f32 %v2622_v23, %v2464_v59  ;;  %v2624_v55 = vpop.f32.mrb[139].mxu1  ;;  %2866 = vmatpush1.bf16.msra.mxu0 %v2704_v42 }
 0x6ce   :  { %v2625_v39 = vadd.f32 %v2624_v55, %v2464_v59 }
 0x6cf   :  { %v2690_v62 = vpack.c.bf16 %v2623_v3, %v2619_v43  ;;  %v2479_v3 = vpop.permute.xlu0 %2478 }
 0x6d0   :  { %v2691_v52 = vpack.c.bf16 %v2625_v39, %v2621_v25  ;;  %v2484_v39 = vpop.permute.xlu1 %2483 }
 0x6d1   :  { %v2706_v1 = vmax.bf16 %v8315_v37, %v2690_v62 }
 0x6d2   :  { %v2628_v18 = vpop.f32.mrb[140].mxu1  ;;  %v2707_v4 = vmax.bf16 %v8315_v37, %v2691_v52 }
 0x6d3   :  { %v2630_v49 = vpop.f32.mrb[141].mxu1  ;;  %v2629_v20 = vadd.f32 %v2628_v18, %v2469_v38 }
 0x6d4   :  { %v2632_v56 = vpop.f32.mrb[142].mxu1  ;;  %2867 = vmatprep.subr.bf16.mxu0 %v2707_v4  ;;  %v2631_v23 = vadd.f32 %v2630_v49, %v2469_v38 }
 0x6d5   :  { %v2633_v26 = vadd.f32 %v2632_v56, %v2474_v44  ;;  %v2634_v28 = vpop.f32.mrb[143].mxu1  ;;  %2868 = vmatpush1.bf16.msra.mxu0 %v2706_v1 }
 0x6d6   :  { %v2635_v42 = vadd.f32 %v2634_v28, %v2474_v44 }
 0x6d7   :  { %v2692_v21 = vpack.c.bf16 %v2633_v26, %v2629_v20  ;;  %v2489_v26 = vpop.permute.xlu0 %2488 }
 0x6d8   :  { %v2693_v41 = vpack.c.bf16 %v2635_v42, %v2631_v23  ;;  %v2494_v42 = vpop.permute.xlu1 %2493 }
 0x6d9   :  { %v2708_v55 = vmax.bf16 %v8315_v37, %v2692_v21 }
 0x6da   :  { %v2638_v59 = vpop.f32.mrb[144].mxu1  ;;  %v2709_v43 = vmax.bf16 %v8315_v37, %v2693_v41 }
 0x6db   :  { %v2640_v25 = vpop.f32.mrb[145].mxu1  ;;  %v2639_v52 = vadd.f32 %v2638_v59, %v2479_v3 }
 0x6dc   :  { %v2642_v62 = vpop.f32.mrb[146].mxu1  ;;  %2869 = vmatprep.subr.bf16.mxu0 %v2709_v43  ;;  %v2641_v56 = vadd.f32 %v2640_v25, %v2479_v3 }
 0x6dd   :  { %v2643_v4 = vadd.f32 %v2642_v62, %v2484_v39  ;;  %v2644_v18 = vpop.f32.mrb[147].mxu1  ;;  %2870 = vmatpush1.bf16.msra.mxu0 %v2708_v55 }
 0x6de   :  { %v2645_v1 = vadd.f32 %v2644_v18, %v2484_v39 }
 0x6df   :  { %v2694_v38 = vpack.c.bf16 %v2643_v4, %v2639_v52  ;;  %v2499_v4 = vpop.permute.xlu0 %2498 }
 0x6e0   :  { %v2695_v49 = vpack.c.bf16 %v2645_v1, %v2641_v56  ;;  %v2504_v1 = vpop.permute.xlu1 %2503 }
 0x6e1   :  { %v2710_v28 = vmax.bf16 %v8315_v37, %v2694_v38 }
 0x6e2   :  { %v2648_v44 = vpop.f32.mrb[148].mxu1  ;;  %v2711_v20 = vmax.bf16 %v8315_v37, %v2695_v49 }
 0x6e3   :  { %v2650_v23 = vpop.f32.mrb[149].mxu1  ;;  %v2649_v41 = vadd.f32 %v2648_v44, %v2489_v26 }
 0x6e4   :  { %v2652_v21 = vpop.f32.mrb[150].mxu1  ;;  %2871 = vmatprep.subr.bf16.mxu0 %v2711_v20  ;;  %v2651_v62 = vadd.f32 %v2650_v23, %v2489_v26 }
 0x6e5   :  { %v2653_v43 = vadd.f32 %v2652_v21, %v2494_v42  ;;  %v2654_v59 = vpop.f32.mrb[151].mxu1  ;;  %2872 = vmatpush1.bf16.msra.mxu0 %v2710_v28 }
 0x6e6   :  { %v2655_v55 = vadd.f32 %v2654_v59, %v2494_v42  ;;  %v5384_v59 = vld [vmem:[%s8149_s4 + $0x88] sm:$0xff]  }
 0x6e7   :  { %v2696_v3 = vpack.c.bf16 %v2653_v43, %v2649_v41  ;;  %v5383_v43 = vld [vmem:[%s8149_s4 + $0x80] sm:$0xff]  }
 0x6e8   :  { %v2697_v25 = vpack.c.bf16 %v2655_v55, %v2651_v62  ;;  %v5385_v62 = vld [vmem:[%s8149_s4 + $0x90] sm:$0xff]   ;;  %v5386_v55 = vld [vmem:[%s8149_s4 + $0x98] sm:$0xff]  }
 0x6e9   :  { %v2712_v18 = vmax.bf16 %v8315_v37, %v2696_v3  ;;  %v5387_v3 = vld [vmem:[%s8149_s4 + $0xa0] sm:$0xff]  }
 0x6ea   :  { %v2658_v39 = vpop.f32.mrb[152].mxu1  ;;  %v2713_v52 = vmax.bf16 %v8315_v37, %v2697_v25  ;;  %v5388_v25 = vld [vmem:[%s8149_s4 + $0xa8] sm:$0xff]  }
 0x6eb   :  { %v2660_v56 = vpop.f32.mrb[153].mxu1  ;;  %v2659_v49 = vadd.f32 %v2658_v39, %v2499_v4  ;;  %v5389_v39 = vld [vmem:[%s8149_s4 + $0xb0] sm:$0xff]  }
 0x6ec   :  { %v2662_v38 = vpop.f32.mrb[154].mxu1  ;;  %2873 = vmatprep.subr.bf16.mxu0 %v2713_v52  ;;  %v2661_v21 = vadd.f32 %v2660_v56, %v2499_v4  ;;  %v5390_v52 = vld [vmem:[%s8149_s4 + $0xb8] sm:$0xff]   ;;  %v2218_v4 = vadd.f32 %v7168_v5, %v8448_v30  ;;  %v2222_v56 = vadd.f32 %v7180_v17, %v8449_v11 }
 0x6ed   :  { %v2663_v20 = vadd.f32 %v2662_v38, %v2504_v1  ;;  %v2664_v44 = vpop.f32.mrb[155].mxu1  ;;  %2874 = vmatpush1.bf16.msra.mxu0 %v2712_v18  ;;  %v2220_v18 = vadd.f32 %v7174_v46, %v8448_v30  ;;  %v8538_v38 = vld [vmem:[#allocation113_spill] sm:$0xff]  ;;  %v2741_v46 = vpop.permute.xlu1 %2740 }
 0x6ee   :  { %v2665_v28 = vadd.f32 %v2664_v44, %v2504_v1  ;;  %v2224_v1 = vadd.f32 %v7187_v31, %v8449_v11 }
 0x6ef   :  { %v2698_v26 = vpack.c.bf16 %v2663_v20, %v2659_v49  ;;  %v2296_v49 = vadd.f32 %v8538_v38, %v2218_v4  ;;  %v8539_v20 = vld [vmem:[#allocation114_spill] sm:$0xff] }
 0x6f0   :  { %v2699_v23 = vpack.c.bf16 %v2665_v28, %v2661_v21  ;;  %v2297_v44 = vadd.f32 %v8539_v20, %v2220_v18  ;;  %v8540_v21 = vld [vmem:[#allocation115_spill] sm:$0xff] }
 0x6f1   :  { %v2714_v41 = vmax.bf16 %v8315_v37, %v2698_v26  ;;  %v2298_v28 = vadd.f32 %v8540_v21, %v2222_v56  ;;  %v8541_v26 = vld [vmem:[#allocation116_spill] sm:$0xff] }
 0x6f2   :  { %v2715_v42 = vmax.bf16 %v8315_v37, %v2699_v23  ;;  %v2299_v23 = vadd.f32 %v8541_v26, %v2224_v1 }
 0x6f3   :  { %v2330_v5 = vadd.f32 nan, %v2298_v28  ;;  %v8542_v28 = vld [vmem:[#allocation14_spill] sm:$0xff] }
 0x6f4   :  { %2875 = vmatprep.subr.bf16.mxu0 %v2715_v42  ;;  %v2328_v42 = vadd.f32 nan, %v2296_v49 }
 0x6f5   :  { %2876 = vmatpush1.bf16.msra.mxu0 %v2714_v41  ;;  %v2329_v41 = vadd.f32 nan, %v2297_v44  ;;  %v5007_v31 = vadd.f32 %v2741_v46, %v2330_v5  ;;  %v8543_v5 = vld [vmem:[#allocation8_spill] sm:$0xff] }
 0x6f8   :  { %2894 = vmatmul.mubr.bf16.vlgmr.msra.gmra.mrb[96].mxu0 %v5383_v43  ;;  %v2736_v43 = vpop.permute.xlu0 %2735 }
 0x6f9   :  { %2903 = vmatprep.mubr.bf16.mxu0 %v8315_v37  ;;  %v5003_v30 = vadd.f32 %v2736_v43, %v2328_v42  ;;  %v5005_v17 = vadd.f32 %v2736_v43, %v2329_v41 }
 0x6fc   :  { %v2746_v42 = vpop.permute.xlu0 %2745 }
 0x700   :  { %2904 = vmatmul.mubr.bf16.gmra.mrb[100].mxu0 %v5384_v59  ;;  %v2331_v59 = vadd.f32 nan, %v2299_v23 }
 0x701   :  { %2913 = vmatprep.mubr.bf16.mxu0 %v8315_v37 }
 0x702   :  { %v5009_v4 = vadd.f32 %v2741_v46, %v2331_v59 }
 0x708   :  { %2914 = vmatmul.mubr.bf16.gmra.mrb[104].mxu0 %v5385_v62 }
 0x709   :  { %2923 = vmatprep.mubr.bf16.mxu0 %v8315_v37 }
 0x710   :  { %2924 = vmatmul.mubr.bf16.gmra.mrb[108].mxu0 %v5386_v55 }
 0x711   :  { %2933 = vmatprep.mubr.bf16.mxu0 %v8315_v37 }
 0x718   :  { %2934 = vmatmul.mubr.bf16.gmra.mrb[112].mxu0 %v5387_v3 }
 0x719   :  { %2943 = vmatprep.mubr.bf16.mxu0 %v8315_v37 }
 0x720   :  { %2944 = vmatmul.mubr.bf16.gmra.mrb[116].mxu0 %v5388_v25 }
 0x721   :  { %2953 = vmatprep.mubr.bf16.mxu0 %v8315_v37 }
 0x728   :  { %2954 = vmatmul.mubr.bf16.gmra.mrb[120].mxu0 %v5389_v39 }
 0x729   :  { %2963 = vmatprep.mubr.bf16.mxu0 %v8315_v37 }
 0x730   :  { %2964 = vmatmul.mubr.bf16.gmra.mrb[124].mxu0 %v5390_v52 }
 0x731   :  { %3571 = vmatprep.mubr.bf16.mxu0 %v8315_v37 }
 0x7cb   :  { %v2895_v62 = vpop.f32.mrb[96].mxu0 }
 0x7cc   :  { %v2896_v55 = vadd.f32 %v2895_v62, %v2736_v43  ;;  %v5004_v3 = vadd.f32 %v5003_v30, %v2895_v62  ;;  %v2897_v11 = vpop.f32.mrb[97].mxu0  ;;  %v2751_v62 = vpop.permute.xlu1 %2750 }
 0x7cd   :  { %v2898_v25 = vadd.f32 %v2897_v11, %v2736_v43  ;;  %v5006_v39 = vadd.f32 %v5005_v17, %v2897_v11  ;;  %v2899_v52 = vpop.f32.mrb[98].mxu0  ;;  %v5015_v17 = vadd.f32 %v7240_v12, %v2746_v42 }
 0x7ce   :  { %v2974_v18 = vadd.f32 %v7172_v22, %v2896_v55  ;;  %v2900_v56 = vadd.f32 %v2899_v52, %v2741_v46  ;;  %v5008_v1 = vadd.f32 %v5007_v31, %v2899_v52  ;;  %v2901_v38 = vpop.f32.mrb[99].mxu0  ;;  %v5012_v22 = vadd.f32 %v7235_v36, %v2746_v42  ;;  %v8544_v55 = vld [vmem:[#allocation81_spill] sm:$0xff]  ;;  %v8546_v36 = vld [vmem:[#allocation83_spill] sm:$0xff] }
 0x7cf   :  { %v2975_v49 = vadd.f32 %v7178_v45, %v2898_v25  ;;  %v2902_v20 = vadd.f32 %v2901_v38, %v2741_v46  ;;  %v5010_v44 = vadd.f32 %v5009_v4, %v2901_v38  ;;  %v5018_v31 = vadd.f32 %v7247_v9, %v2751_v62  ;;  %v8545_v25 = vld [vmem:[#allocation82_spill] sm:$0xff]  ;;  %v8547_v9 = vld [vmem:[#allocation84_spill] sm:$0xff] }
 0x7d0   :  { %v3006_v21 = vadd.f32 nan, %v2974_v18  ;;  %v2976_v26 = vadd.f32 %v8542_v28, %v2900_v56  ;;  %v3055_v23 = vpack.c.bf16 %v5008_v1, %v5004_v3 }
 0x7d1   :  { %v3007_v41 = vadd.f32 nan, %v2975_v49  ;;  %v2977_v43 = vadd.f32 %v8543_v5, %v2902_v20  ;;  %v3056_v30 = vpack.c.bf16 %v5010_v44, %v5006_v39  ;;  %v5021_v20 = vadd.f32 %v7254_v51, %v2751_v62  ;;  %v8549_v51 = vld [vmem:[#allocation28_spill] sm:$0xff] }
 0x7d2   :  { %v3008_v59 = vadd.f32 nan, %v2976_v26  ;;  %v7586_v11 = vadd.f32 %v3006_v21, %v8544_v55  ;;  %v3071_v39 = vmax.bf16 %v8315_v37, %v3055_v23 }
 0x7d3   :  { %v3009_v45 = vadd.f32 nan, %v2977_v43  ;;  %v2905_v46 = vpop.f32.mrb[100].mxu0  ;;  %v3072_v3 = vmax.bf16 %v8315_v37, %v3056_v30  ;;  %v7591_v52 = vadd.f32 %v3007_v41, %v8545_v25  ;;  %v8548_v30 = vld [vmem:[#allocation16_spill] sm:$0xff] }
 0x7d4   :  { %v2906_v4 = vadd.f32 %v2905_v46, %v2746_v42  ;;  %v5013_v18 = vadd.f32 %v5012_v22, %v2905_v46  ;;  %v2907_v56 = vpop.f32.mrb[101].mxu0  ;;  %v7595_v1 = vadd.f32 %v3008_v59, %v8546_v36 }
 0x7d5   :  { %v2908_v12 = vadd.f32 %v2907_v56, %v2746_v42  ;;  %v5016_v38 = vadd.f32 %v5015_v17, %v2907_v56  ;;  %v2909_v49 = vpop.f32.mrb[102].mxu0  ;;  %3232 = vmatprep.subr.bf16.mxu1 %v3072_v3  ;;  %v7599_v44 = vadd.f32 %v3009_v45, %v8547_v9  ;;  %v2756_v17 = vpop.permute.xlu0 %2755  ;;  %v8550_v45 = vld [vmem:[#allocation9_spill] sm:$0xff]  ;;  %v8554_v9 = vld [vmem:[#allocation87_spill] sm:$0xff] }
 0x7d6   :  { %v2978_v21 = vadd.f32 %v7207_v27, %v2906_v4  ;;  %v2910_v28 = vadd.f32 %v2909_v49, %v2751_v62  ;;  %v5019_v26 = vadd.f32 %v5018_v31, %v2909_v49  ;;  %v2911_v23 = vpop.f32.mrb[103].mxu0  ;;  %3233 = vmatpush1.bf16.msra.mxu1 %v3071_v39  ;;  %v2761_v27 = vpop.permute.xlu1 %2760  ;;  %v5024_v25 = vadd.f32 %v7277_v14, %v2756_v17 }
 0x7d7   :  { %v2979_v41 = vadd.f32 %v7211_v40, %v2908_v12  ;;  %v2912_v5 = vadd.f32 %v2911_v23, %v2751_v62  ;;  %v5022_v43 = vadd.f32 %v5021_v20, %v2911_v23  ;;  %v5027_v40 = vadd.f32 %v7282_v7, %v2756_v17  ;;  %v8551_v62 = vld [vmem:[#allocation85_spill] sm:$0xff]  ;;  %v8553_v12 = vld [vmem:[#allocation86_spill] sm:$0xff] }
 0x7d8   :  { %v3010_v42 = vadd.f32 %v2978_v21, %v8458_v33  ;;  %v2980_v59 = vadd.f32 %v8548_v30, %v2910_v28  ;;  %v3057_v22 = vpack.c.bf16 %v5019_v26, %v5013_v18  ;;  %v8552_v33 = vld [vmem:[#allocation32_spill] sm:$0xff]  ;;  %v5030_v18 = vadd.f32 %v7289_v61, %v2761_v27 }
 0x7d9   :  { %v3011_v55 = vadd.f32 %v2979_v41, %v8549_v51  ;;  %v2981_v46 = vadd.f32 %v8550_v45, %v2912_v5  ;;  %v3058_v3 = vpack.c.bf16 %v5022_v43, %v5016_v38  ;;  %v5033_v23 = vadd.f32 %v7296_v60, %v2761_v27  ;;  %v8555_v61 = vld [vmem:[#allocation88_spill] sm:$0xff]  ;;  %v8557_v60 = vld [vmem:[#allocation34_spill] sm:$0xff] }
 0x7da   :  { %v3012_v31 = vadd.f32 %v2980_v59, %v8460_v32  ;;  %v7611_v39 = vadd.f32 %v3010_v42, %v8551_v62  ;;  %v3073_v38 = vmax.bf16 %v8315_v37, %v3057_v22 }
 0x7db   :  { %v3013_v4 = vadd.f32 %v2981_v46, %v8552_v33  ;;  %v2915_v56 = vpop.f32.mrb[104].mxu0  ;;  %v3074_v36 = vmax.bf16 %v8315_v37, %v3058_v3  ;;  %v7617_v49 = vadd.f32 %v3011_v55, %v8553_v12  ;;  %v8556_v55 = vld [vmem:[#allocation18_spill] sm:$0xff]  ;;  %v2766_v3 = vpop.permute.xlu0 %2765 }
 0x7dc   :  { %v2916_v32 = vadd.f32 %v2915_v56, %v2756_v17  ;;  %v5025_v20 = vadd.f32 %v5024_v25, %v2915_v56  ;;  %v2917_v14 = vpop.f32.mrb[105].mxu0  ;;  %v7621_v7 = vadd.f32 %v3012_v31, %v8554_v9  ;;  %v8558_v25 = vld [vmem:[#allocation11_spill] sm:$0xff] }
 0x7dd   :  { %v2918_v21 = vadd.f32 %v2917_v14, %v2756_v17  ;;  %v5028_v28 = vadd.f32 %v5027_v40, %v2917_v14  ;;  %v2919_v26 = vpop.f32.mrb[106].mxu0  ;;  %3234 = vmatprep.subr.bf16.mxu1 %v3074_v36  ;;  %v7625_v41 = vadd.f32 %v3013_v4, %v8555_v61  ;;  %v5036_v4 = vadd.f32 %v7319_v63, %v2766_v3 }
 0x7de   :  { %v2982_v5 = vadd.f32 %v7244_v54, %v2916_v32  ;;  %v2920_v43 = vadd.f32 %v2919_v26, %v2761_v27  ;;  %v5031_v42 = vadd.f32 %v5030_v18, %v2919_v26  ;;  %v2921_v30 = vpop.f32.mrb[107].mxu0  ;;  %3235 = vmatpush1.bf16.msra.mxu1 %v3073_v38  ;;  %v2771_v54 = vpop.permute.xlu1 %2770  ;;  %v8561_v32 = vld [vmem:[#allocation90_spill] sm:$0xff] }
 0x7df   :  { %v2983_v59 = vadd.f32 %v7251_v15, %v2918_v21  ;;  %v2922_v22 = vadd.f32 %v2921_v30, %v2761_v27  ;;  %v5034_v51 = vadd.f32 %v5033_v23, %v2921_v30  ;;  %v5039_v15 = vadd.f32 %v7324_v19, %v2766_v3  ;;  %v8559_v27 = vld [vmem:[#allocation89_spill] sm:$0xff]  ;;  %v8562_v21 = vld [vmem:[#allocation91_spill] sm:$0xff] }
 0x7e0   :  { %v3014_v17 = vadd.f32 %v2982_v5, %v8466_v24  ;;  %v2984_v45 = vadd.f32 %v8556_v55, %v2920_v43  ;;  %v3059_v46 = vpack.c.bf16 %v5031_v42, %v5025_v20  ;;  %v8560_v24 = vld [vmem:[#allocation37_spill] sm:$0xff]  ;;  %v5042_v12 = vadd.f32 %v7331_v50, %v2771_v54  ;;  %v8563_v50 = vld [vmem:[#allocation92_spill] sm:$0xff]  ;;  %v8564_v55 = vld [vmem:[#allocation39_spill] sm:$0xff] }
 0x7e1   :  { %v3015_v31 = vadd.f32 %v2983_v59, %v8557_v60  ;;  %v2985_v40 = vadd.f32 %v8558_v25, %v2922_v22  ;;  %v3060_v62 = vpack.c.bf16 %v5034_v51, %v5028_v28  ;;  %v5045_v61 = vadd.f32 %v7338_v8, %v2771_v54  ;;  %v8566_v8 = vld [vmem:[#allocation40_spill] sm:$0xff] }
 0x7e2   :  { %v3016_v33 = vadd.f32 %v2984_v45, %v8468_v13  ;;  %v7637_v56 = vadd.f32 %v3014_v17, %v8559_v27  ;;  %v3075_v14 = vmax.bf16 %v8315_v37, %v3059_v46  ;;  %v8565_v46 = vld [vmem:[#allocation20_spill] sm:$0xff] }
 0x7e3   :  { %v3017_v18 = vadd.f32 %v2985_v40, %v8560_v24  ;;  %v2925_v36 = vpop.f32.mrb[108].mxu0  ;;  %v3076_v38 = vmax.bf16 %v8315_v37, %v3060_v62  ;;  %v7643_v20 = vadd.f32 %v3015_v31, %v8561_v32  ;;  %v2776_v31 = vpop.permute.xlu0 %2775  ;;  %v8567_v40 = vld [vmem:[#allocation13_spill] sm:$0xff]  ;;  %v8569_v24 = vld [vmem:[#allocation26_spill] sm:$0xff]  ;;  %v8572_v32 = vld [vmem:[#allocation19_spill] sm:$0xff] }
 0x7e4   :  { %v2926_v13 = vadd.f32 %v2925_v36, %v2766_v3  ;;  %v5037_v9 = vadd.f32 %v5036_v4, %v2925_v36  ;;  %v2927_v63 = vpop.f32.mrb[109].mxu0  ;;  %v7647_v19 = vadd.f32 %v3016_v33, %v8562_v21  ;;  %v8568_v4 = vld [vmem:[#allocation41_spill] sm:$0xff]  ;;  %v5048_v27 = vadd.f32 %v7360_v48, %v2776_v31  ;;  %v8571_v36 = vld [vmem:[#allocation42_spill] sm:$0xff] }
 0x7e5   :  { %v2928_v28 = vadd.f32 %v2927_v63, %v2766_v3  ;;  %v5040_v26 = vadd.f32 %v5039_v15, %v2927_v63  ;;  %v2929_v23 = vpop.f32.mrb[110].mxu0  ;;  %3236 = vmatprep.subr.bf16.mxu1 %v3076_v38  ;;  %v7651_v5 = vadd.f32 %v3017_v18, %v8563_v50 }
 0x7e6   :  { %v2986_v43 = vadd.f32 %v7286_v16, %v2926_v13  ;;  %v2930_v42 = vadd.f32 %v2929_v23, %v2771_v54  ;;  %v5043_v30 = vadd.f32 %v5042_v12, %v2929_v23  ;;  %v2931_v59 = vpop.f32.mrb[111].mxu0  ;;  %3237 = vmatpush1.bf16.msra.mxu1 %v3075_v14  ;;  %v2781_v16 = vpop.permute.xlu1 %2780  ;;  %v8574_v23 = vld [vmem:[#allocation95_spill] sm:$0xff] }
 0x7e7   :  { %v2987_v22 = vadd.f32 %v7293_v10, %v2928_v28  ;;  %v2932_v51 = vadd.f32 %v2931_v59, %v2771_v54  ;;  %v5046_v17 = vadd.f32 %v5045_v61, %v2931_v59  ;;  %v5051_v10 = vadd.f32 %v8569_v24, %v2776_v31  ;;  %v8570_v54 = vld [vmem:[#allocation93_spill] sm:$0xff] }
 0x7e8   :  { %v3018_v45 = vadd.f32 %v2986_v43, %v8564_v55  ;;  %v2988_v3 = vadd.f32 %v8565_v46, %v2930_v42  ;;  %v3061_v60 = vpack.c.bf16 %v5043_v30, %v5037_v9  ;;  %v5054_v14 = vadd.f32 %v8572_v32, %v2781_v16  ;;  %v8573_v9 = vld [vmem:[#allocation94_spill] sm:$0xff]  ;;  %v8575_v30 = vld [vmem:[#allocation21_spill] sm:$0xff]  ;;  %v8583_v32 = vld [vmem:[#allocation47_spill] sm:$0xff] }
 0x7e9   :  { %v3019_v25 = vadd.f32 %v2987_v22, %v8566_v8  ;;  %v2989_v62 = vadd.f32 %v8567_v40, %v2932_v51  ;;  %v3062_v33 = vpack.c.bf16 %v5046_v17, %v5040_v26  ;;  %v5057_v59 = vadd.f32 %v8575_v30, %v2781_v16  ;;  %v8576_v22 = vld [vmem:[#allocation96_spill] sm:$0xff]  ;;  %v8577_v17 = vld [vmem:[#allocation22_spill] sm:$0xff]  ;;  %v8581_v24 = vld [vmem:[#allocation45_spill] sm:$0xff] }
 0x7ea   :  { %v3020_v15 = vadd.f32 %v2988_v3, %v8568_v4  ;;  %v7663_v18 = vadd.f32 %v3018_v45, %v8570_v54  ;;  %v3077_v21 = vmax.bf16 %v8315_v37, %v3061_v60  ;;  %v8578_v60 = vld [vmem:[#allocation15_spill] sm:$0xff]  ;;  %v8582_v54 = vld [vmem:[#allocation17_spill] sm:$0xff] }
 0x7eb   :  { %v3021_v12 = vadd.f32 %v2989_v62, %v8571_v36  ;;  %v2935_v38 = vpop.f32.mrb[112].mxu0  ;;  %v3078_v13 = vmax.bf16 %v8315_v37, %v3062_v33  ;;  %v7669_v63 = vadd.f32 %v3019_v25, %v8573_v9  ;;  %v8579_v62 = vld [vmem:[#allocation43_spill] sm:$0xff]  ;;  %v8580_v33 = vld [vmem:[#allocation24_spill] sm:$0xff] }
 0x7ec   :  { %v2936_v28 = vadd.f32 %v2935_v38, %v2776_v31  ;;  %v5049_v26 = vadd.f32 %v5048_v27, %v2935_v38  ;;  %v2937_v48 = vpop.f32.mrb[113].mxu0  ;;  %v7673_v61 = vadd.f32 %v3020_v15, %v8574_v23  ;;  %v2786_v27 = vpop.permute.xlu0 %2785 }
 0x7ed   :  { %v2938_v50 = vadd.f32 %v2937_v48, %v2776_v31  ;;  %v5052_v43 = vadd.f32 %v5051_v10, %v2937_v48  ;;  %v2939_v42 = vpop.f32.mrb[114].mxu0  ;;  %3238 = vmatprep.subr.bf16.mxu1 %v3078_v13  ;;  %v7677_v51 = vadd.f32 %v3021_v12, %v8576_v22  ;;  %v2791_v38 = vpop.permute.xlu1 %2790  ;;  %v5060_v13 = vadd.f32 %v7401_v0, %v2786_v27 }
 0x7ee   :  { %v2990_v55 = vadd.f32 %v8577_v17, %v2936_v28  ;;  %v2940_v45 = vadd.f32 %v2939_v42, %v2781_v16  ;;  %v5055_v46 = vadd.f32 %v5054_v14, %v2939_v42  ;;  %v2941_v3 = vpop.f32.mrb[115].mxu0  ;;  %3239 = vmatpush1.bf16.msra.mxu1 %v3077_v21  ;;  %v5063_v9 = vadd.f32 %v7406_v2, %v2786_v27  ;;  %v8585_v28 = vld [vmem:[#allocation48_spill] sm:$0xff]  ;;  %v8586_v42 = vld [vmem:[#allocation98_spill] sm:$0xff]  ;;  %v8587_v17 = vld [vmem:[#allocation99_spill] sm:$0xff] }
 0x7ef   :  { %v2991_v8 = vadd.f32 %v8578_v60, %v2938_v50  ;;  %v2942_v25 = vadd.f32 %v2941_v3, %v2781_v16  ;;  %v5058_v40 = vadd.f32 %v5057_v59, %v2941_v3  ;;  %v8584_v16 = vld [vmem:[#allocation97_spill] sm:$0xff]  ;;  %v5069_v3 = vadd.f32 %v7420_v58, %v2791_v38  ;;  %v8592_v58 = vld [vmem:[#allocation50_spill] sm:$0xff] }
 0x7f0   :  { %v3022_v31 = vadd.f32 %v2990_v55, %v8579_v62  ;;  %v2992_v4 = vadd.f32 %v8580_v33, %v2940_v45  ;;  %v3063_v15 = vpack.c.bf16 %v5055_v46, %v5049_v26  ;;  %v5066_v26 = vadd.f32 %v7413_v34, %v2791_v38  ;;  %v8588_v34 = vld [vmem:[#allocation100_spill] sm:$0xff] }
 0x7f1   :  { %v3023_v10 = vadd.f32 %v2991_v8, %v8581_v24  ;;  %v2993_v36 = vadd.f32 %v8582_v54, %v2942_v25  ;;  %v3064_v12 = vpack.c.bf16 %v5058_v40, %v5052_v43  ;;  %v8590_v24 = vld [vmem:[#allocation49_spill] sm:$0xff] }
 0x7f2   :  { %v3024_v14 = vadd.f32 %v2992_v4, %v8583_v32  ;;  %v7689_v21 = vadd.f32 %v3022_v31, %v8584_v16  ;;  %v3079_v43 = vmax.bf16 %v8315_v37, %v3063_v15  ;;  %v8589_v31 = vld [vmem:[#allocation30_spill] sm:$0xff]  ;;  %v8594_v16 = vld [vmem:[#allocation51_spill] sm:$0xff] }
 0x7f3   :  { %v3025_v48 = vadd.f32 %v2993_v36, %v8585_v28  ;;  %v2945_v23 = vpop.f32.mrb[116].mxu0  ;;  %v3080_v50 = vmax.bf16 %v8315_v37, %v3064_v12  ;;  %v7695_v30 = vadd.f32 %v3023_v10, %v8586_v42  ;;  %v8591_v10 = vld [vmem:[#allocation38_spill] sm:$0xff]  ;;  %v2796_v12 = vpop.permute.xlu0 %2795  ;;  %v8597_v42 = vld [vmem:[#allocation53_spill] sm:$0xff] }
 0x7f4   :  { %v2946_v59 = vadd.f32 %v2945_v23, %v2786_v27  ;;  %v5061_v22 = vadd.f32 %v5060_v13, %v2945_v23  ;;  %v2947_v0 = vpop.f32.mrb[117].mxu0  ;;  %v7699_v2 = vadd.f32 %v3024_v14, %v8587_v17  ;;  %v8593_v14 = vld [vmem:[#allocation23_spill] sm:$0xff]  ;;  %v8595_v23 = vld [vmem:[#allocation62_spill] sm:$0xff] }
 0x7f5   :  { %v2948_v55 = vadd.f32 %v2947_v0, %v2786_v27  ;;  %v5064_v45 = vadd.f32 %v5063_v9, %v2947_v0  ;;  %v2949_v46 = vpop.f32.mrb[118].mxu0  ;;  %3240 = vmatprep.subr.bf16.mxu1 %v3080_v50  ;;  %v7703_v60 = vadd.f32 %v3025_v48, %v8588_v34  ;;  %v5072_v48 = vadd.f32 %v7442_v35, %v2796_v12 }
 0x7f6   :  { %v2994_v8 = vadd.f32 %v7369_v57, %v2946_v59  ;;  %v2950_v25 = vadd.f32 %v2949_v46, %v2791_v38  ;;  %v5067_v40 = vadd.f32 %v5066_v26, %v2949_v46  ;;  %v2951_v62 = vpop.f32.mrb[119].mxu0  ;;  %3241 = vmatpush1.bf16.msra.mxu1 %v3079_v43  ;;  %v2801_v57 = vpop.permute.xlu1 %2800  ;;  %v5075_v26 = vadd.f32 %v8595_v23, %v2796_v12 }
 0x7f7   :  { %v2995_v33 = vadd.f32 %v8589_v31, %v2948_v55  ;;  %v2952_v4 = vadd.f32 %v2951_v62, %v2791_v38  ;;  %v5070_v15 = vadd.f32 %v5069_v3, %v2951_v62  ;;  %v8596_v38 = vld [vmem:[#allocation101_spill] sm:$0xff]  ;;  %v8599_v55 = vld [vmem:[#allocation102_spill] sm:$0xff]  ;;  %v2806_v23 = vpop.permute.xlu0 %2805 }
 0x7f8   :  { %v3026_v27 = vadd.f32 %v2994_v8, %v8590_v24  ;;  %v2996_v54 = vadd.f32 %v8591_v10, %v2950_v25  ;;  %v3065_v36 = vpack.c.bf16 %v5067_v40, %v5061_v22  ;;  %v8598_v22 = vld [vmem:[#allocation31_spill] sm:$0xff]  ;;  %v8602_v24 = vld [vmem:[#allocation46_spill] sm:$0xff] }
 0x7f9   :  { %v3027_v32 = vadd.f32 %v2995_v33, %v8592_v58  ;;  %v2997_v13 = vadd.f32 %v8593_v14, %v2952_v4  ;;  %v3066_v9 = vpack.c.bf16 %v5070_v15, %v5064_v45  ;;  %v5078_v0 = vadd.f32 %v8598_v22, %v2801_v57  ;;  %v8600_v8 = vld [vmem:[#allocation103_spill] sm:$0xff]  ;;  %v8601_v4 = vld [vmem:[#allocation104_spill] sm:$0xff]  ;;  %v8603_v58 = vld [vmem:[#allocation25_spill] sm:$0xff] }
 0x7fa   :  { %v3028_v28 = vadd.f32 %v2996_v54, %v8594_v16  ;;  %v7715_v50 = vadd.f32 %v3026_v27, %v8596_v38  ;;  %v3081_v45 = vmax.bf16 %v8315_v37, %v3065_v36  ;;  %v5081_v33 = vadd.f32 %v7459_v29, %v2801_v57  ;;  %v8605_v16 = vld [vmem:[#allocation54_spill] sm:$0xff]  ;;  %v8606_v29 = vld [vmem:[#allocation56_spill] sm:$0xff]  ;;  %v8607_v38 = vld [vmem:[#allocation29_spill] sm:$0xff] }
 0x7fb   :  { %v3029_v43 = vadd.f32 %v2997_v13, %v8597_v42  ;;  %v2955_v59 = vpop.f32.mrb[120].mxu0  ;;  %v3082_v17 = vmax.bf16 %v8315_v37, %v3066_v9  ;;  %v7721_v46 = vadd.f32 %v3027_v32, %v8599_v55  ;;  %v8604_v9 = vld [vmem:[#allocation55_spill] sm:$0xff]  ;;  %v8608_v22 = vld [vmem:[#allocation57_spill] sm:$0xff]  ;;  %v5087_v55 = vadd.f32 %v7478_v47, %v2806_v23 }
 0x7fc   :  { %v2956_v3 = vadd.f32 %v2955_v59, %v2796_v12  ;;  %v5073_v34 = vadd.f32 %v5072_v48, %v2955_v59  ;;  %v2957_v35 = vpop.f32.mrb[121].mxu0  ;;  %v7725_v25 = vadd.f32 %v3028_v28, %v8600_v8  ;;  %v2811_v59 = vpop.permute.xlu1 %2810 }
 0x7fd   :  { %v2958_v40 = vadd.f32 %v2957_v35, %v2796_v12  ;;  %v5076_v62 = vadd.f32 %v5075_v26, %v2957_v35  ;;  %v2959_v31 = vpop.f32.mrb[122].mxu0  ;;  %3242 = vmatprep.subr.bf16.mxu1 %v3082_v17  ;;  %v7729_v15 = vadd.f32 %v3029_v43, %v8601_v4  ;;  %v5084_v17 = vadd.f32 %v7474_v6, %v2806_v23 }
 0x7fe   :  { %v2998_v27 = vadd.f32 %v8602_v24, %v2956_v3  ;;  %v2960_v10 = vadd.f32 %v2959_v31, %v2801_v57  ;;  %v5079_v54 = vadd.f32 %v5078_v0, %v2959_v31  ;;  %v2961_v36 = vpop.f32.mrb[123].mxu0  ;;  %3243 = vmatpush1.bf16.msra.mxu1 %v3081_v45  ;;  %v8610_v3 = vld [vmem:[#allocation58_spill] sm:$0xff] }
 0x7ff   :  { %v2999_v32 = vadd.f32 %v8603_v58, %v2958_v40  ;;  %v2962_v14 = vadd.f32 %v2961_v36, %v2801_v57  ;;  %v5082_v13 = vadd.f32 %v5081_v33, %v2961_v36  ;;  %v8609_v57 = vld [vmem:[#allocation105_spill] sm:$0xff]  ;;  %v8611_v31 = vld [vmem:[#allocation106_spill] sm:$0xff]  ;;  %v8613_v58 = vld [vmem:[#allocation35_spill] sm:$0xff] }
 0x800   :  { %v3030_v12 = vadd.f32 %v2998_v27, %v8604_v9  ;;  %v3000_v28 = vadd.f32 %v8605_v16, %v2960_v10  ;;  %v3067_v48 = vpack.c.bf16 %v5079_v54, %v5073_v34  ;;  %v5090_v34 = vadd.f32 %v7482_v53, %v2811_v59  ;;  %v8612_v27 = vld [vmem:[#allocation107_spill] sm:$0xff]  ;;  %v8614_v53 = vld [vmem:[#allocation108_spill] sm:$0xff] }
 0x801   :  { %v3031_v26 = vadd.f32 %v2999_v32, %v8606_v29  ;;  %v3001_v42 = vadd.f32 %v8607_v38, %v2962_v14  ;;  %v3068_v43 = vpack.c.bf16 %v5082_v13, %v5076_v62  ;;  %v5093_v32 = vadd.f32 %v8613_v58, %v2811_v59  ;;  %v8615_v13 = vld [vmem:[#allocation27_spill] sm:$0xff]  ;;  %v8626_v58 = vld [vmem:[#allocation112_spill] sm:$0xff] }
 0x802   :  { %v3032_v0 = vadd.f32 %v3000_v28, %v8608_v22  ;;  %v7741_v45 = vadd.f32 %v3030_v12, %v8609_v57  ;;  %v3083_v62 = vmax.bf16 %v8315_v37, %v3067_v48  ;;  %v8616_v48 = vld [vmem:[#allocation36_spill] sm:$0xff]  ;;  %v8620_v57 = vld [vmem:[#allocation33_spill] sm:$0xff] }
 0x803   :  { %v3033_v35 = vadd.f32 %v3001_v42, %v8610_v3  ;;  %v2965_v8 = vpop.f32.mrb[124].mxu0  ;;  %v3084_v40 = vmax.bf16 %v8315_v37, %v3068_v43  ;;  %v7747_v33 = vadd.f32 %v3031_v26, %v8611_v31  ;;  %v8617_v42 = vld [vmem:[#allocation60_spill] sm:$0xff]  ;;  %v8618_v43 = vld [vmem:[#allocation66_spill] sm:$0xff]  ;;  %v8622_v31 = vld [vmem:[#allocation109_spill] sm:$0xff] }
 0x804   :  { %v2966_v4 = vadd.f32 %v2965_v8, %v2806_v23  ;;  %v5085_v24 = vadd.f32 %v5084_v17, %v2965_v8  ;;  %v2967_v6 = vpop.f32.mrb[125].mxu0  ;;  %v7751_v47 = vadd.f32 %v3032_v0, %v8612_v27  ;;  %v8619_v17 = vld [vmem:[#allocation61_spill] sm:$0xff]  ;;  %v8621_v8 = vld [vmem:[#allocation63_spill] sm:$0xff] }
 0x805   :  { %v2968_v10 = vadd.f32 %v2967_v6, %v2806_v23  ;;  %v5088_v54 = vadd.f32 %v5087_v55, %v2967_v6  ;;  %v2969_v36 = vpop.f32.mrb[126].mxu0  ;;  %3244 = vmatprep.subr.bf16.mxu1 %v3084_v40  ;;  %v7755_v14 = vadd.f32 %v3033_v35, %v8614_v53  ;;  %v8624_v6 = vld [vmem:[#allocation110_spill] sm:$0xff]  ;;  %v5392_v53 = vld [vmem:[%s8147_s2 + $0xc8] sm:$0xff]  }
 0x806   :  { %v3002_v9 = vadd.f32 %v8615_v13, %v2966_v4  ;;  %v2970_v12 = vadd.f32 %v2969_v36, %v2811_v59  ;;  %v5091_v16 = vadd.f32 %v5090_v34, %v2969_v36  ;;  %v2971_v28 = vpop.f32.mrb[127].mxu0  ;;  %3245 = vmatpush1.bf16.msra.mxu1 %v3083_v62  ;;  %v8623_v62 = vld [vmem:[#allocation64_spill] sm:$0xff]  ;;  %v5393_v13 = vld [vmem:[%s8147_s2 + $0xd0] sm:$0xff]  }
 0x807   :  { %v3003_v29 = vadd.f32 %v8616_v48, %v2968_v10  ;;  %v2972_v26 = vadd.f32 %v2971_v28, %v2811_v59  ;;  %v5094_v38 = vadd.f32 %v5093_v32, %v2971_v28  ;;  %v5397_v28 = vld [vmem:[%s8147_s2 + $0xf0] sm:$0xff]   ;;  %v5398_v48 = vld [vmem:[%s8147_s2 + $0xf8] sm:$0xff]  }
 0x808   :  { %v3034_v23 = vadd.f32 %v3002_v9, %v8617_v42  ;;  %v3004_v22 = vadd.f32 %v8618_v43, %v2970_v12  ;;  %v3069_v0 = vpack.c.bf16 %v5091_v16, %v5085_v24  ;;  %v8625_v24 = vld [vmem:[#allocation111_spill] sm:$0xff]  ;;  %v5395_v12 = vld [vmem:[%s8147_s2 + $0xe0] sm:$0xff]   ;;  %v5396_v16 = vld [vmem:[%s8147_s2 + $0xe8] sm:$0xff]   ;;  %v3112_v42 = vpop.permute.xlu1 %3111 }
 0x809   :  { %v3035_v55 = vadd.f32 %v3003_v29, %v8619_v17  ;;  %v3005_v3 = vadd.f32 %v8620_v57, %v2972_v26  ;;  %v3070_v35 = vpack.c.bf16 %v5094_v38, %v5088_v54  ;;  %v5391_v54 = vld [vmem:[%s8147_s2 + $0xc0] sm:$0xff]   ;;  %v5394_v9 = vld [vmem:[%s8147_s2 + $0xd8] sm:$0xff]   ;;  %v3107_v26 = vpop.permute.xlu0 %3106 }
 0x80a   :  { %v3036_v40 = vadd.f32 %v3004_v22, %v8621_v8  ;;  %v7765_v34 = vadd.f32 %v3034_v23, %v8622_v31  ;;  %v3085_v10 = vmax.bf16 %v8315_v37, %v3069_v0 }
 0x80b   :  { %v3037_v4 = vadd.f32 %v3005_v3, %v8623_v62  ;;  %v3086_v59 = vmax.bf16 %v8315_v37, %v3070_v35  ;;  %v7770_v27 = vadd.f32 %v3035_v55, %v8624_v6 }
 0x80c   :  { %v7774_v36 = vadd.f32 %v3036_v40, %v8625_v24 }
 0x80d   :  { %3246 = vmatprep.subr.bf16.mxu1 %v3086_v59  ;;  %v7780_v32 = vadd.f32 %v3037_v4, %v8626_v58  ;;  %v3117_v40 = vpop.permute.xlu0 %3116  ;;  %v3122_v4 = vpop.permute.xlu1 %3121 }
 0x80e   :  { %3247 = vmatpush1.bf16.msra.mxu1 %v3085_v10 }
 0x811   :  { %3265 = vmatmul.mubr.bf16.vlgmr.msra.gmra.mrb[156].mxu1 %v5391_v54 }
 0x812   :  { %3274 = vmatprep.mubr.bf16.mxu1 %v8315_v37 }
 0x819   :  { %3275 = vmatmul.mubr.bf16.gmra.mrb[160].mxu1 %v5392_v53 }
 0x81a   :  { %3284 = vmatprep.mubr.bf16.mxu1 %v8315_v37 }
 0x821   :  { %3285 = vmatmul.mubr.bf16.gmra.mrb[164].mxu1 %v5393_v13 }
 0x822   :  { %3294 = vmatprep.mubr.bf16.mxu1 %v8315_v37 }
 0x829   :  { %3295 = vmatmul.mubr.bf16.gmra.mrb[168].mxu1 %v5394_v9 }
 0x82a   :  { %3304 = vmatprep.mubr.bf16.mxu1 %v8315_v37 }
 0x831   :  { %3305 = vmatmul.mubr.bf16.gmra.mrb[172].mxu1 %v5395_v12 }
 0x832   :  { %3314 = vmatprep.mubr.bf16.mxu1 %v8315_v37 }
 0x839   :  { %3315 = vmatmul.mubr.bf16.gmra.mrb[176].mxu1 %v5396_v16  ;;  %v3127_v16 = vpop.permute.xlu0 %3126 }
 0x83a   :  { %3324 = vmatprep.mubr.bf16.mxu1 %v8315_v37 }
 0x841   :  { %3325 = vmatmul.mubr.bf16.gmra.mrb[180].mxu1 %v5397_v28 }
 0x842   :  { %3334 = vmatprep.mubr.bf16.mxu1 %v8315_v37 }
 0x849   :  { %3335 = vmatmul.mubr.bf16.gmra.mrb[184].mxu1 %v5398_v48 }
 0x84a   :  { %3942 = vmatprep.mubr.bf16.mxu1 %v8315_v37 }
 0x8e4   :  { %v3266_v29 = vpop.f32.mrb[156].mxu1 }
 0x8e5   :  { %v3268_v38 = vpop.f32.mrb[157].mxu1  ;;  %v3267_v43 = vadd.f32 %v3266_v29, %v3107_v26  ;;  %v3132_v29 = vpop.permute.xlu1 %3131 }
 0x8e6   :  { %v3270_v23 = vpop.f32.mrb[158].mxu1  ;;  %v3269_v17 = vadd.f32 %v3268_v38, %v3107_v26 }
 0x8e7   :  { %v3271_v22 = vadd.f32 %v3270_v23, %v3112_v42  ;;  %v3272_v0 = vpop.f32.mrb[159].mxu1 }
 0x8e8   :  { %v3273_v55 = vadd.f32 %v3272_v0, %v3112_v42 }
 0x8e9   :  { %v3362_v57 = vpack.c.bf16 %v3271_v22, %v3267_v43 }
 0x8ea   :  { %v3363_v3 = vpack.c.bf16 %v3273_v55, %v3269_v17 }
 0x8eb   :  { %v3378_v31 = vmax.bf16 %v8315_v37, %v3362_v57 }
 0x8ec   :  { %v3276_v35 = vpop.f32.mrb[160].mxu1  ;;  %v3379_v8 = vmax.bf16 %v8315_v37, %v3363_v3  ;;  %v3137_v3 = vpop.permute.xlu0 %3136 }
 0x8ed   :  { %v3278_v62 = vpop.f32.mrb[161].mxu1  ;;  %v3277_v6 = vadd.f32 %v3276_v35, %v3117_v40 }
 0x8ee   :  { %v3280_v59 = vpop.f32.mrb[162].mxu1  ;;  %3539 = vmatprep.subr.bf16.mxu0 %v3379_v8  ;;  %v3279_v54 = vadd.f32 %v3278_v62, %v3117_v40  ;;  %v3142_v40 = vpop.permute.xlu1 %3141 }
 0x8ef   :  { %v3281_v10 = vadd.f32 %v3280_v59, %v3122_v4  ;;  %v3282_v24 = vpop.f32.mrb[163].mxu1  ;;  %3540 = vmatpush1.bf16.msra.mxu0 %v3378_v31 }
 0x8f0   :  { %v3283_v58 = vadd.f32 %v3282_v24, %v3122_v4 }
 0x8f1   :  { %v3364_v53 = vpack.c.bf16 %v3281_v10, %v3277_v6 }
 0x8f2   :  { %v3365_v13 = vpack.c.bf16 %v3283_v58, %v3279_v54 }
 0x8f3   :  { %v3380_v28 = vmax.bf16 %v8315_v37, %v3364_v53 }
 0x8f4   :  { %v3286_v9 = vpop.f32.mrb[164].mxu1  ;;  %v3381_v12 = vmax.bf16 %v8315_v37, %v3365_v13  ;;  %v3147_v13 = vpop.permute.xlu0 %3146 }
 0x8f5   :  { %v3288_v48 = vpop.f32.mrb[165].mxu1  ;;  %v3287_v38 = vadd.f32 %v3286_v9, %v3127_v16 }
 0x8f6   :  { %v3290_v26 = vpop.f32.mrb[166].mxu1  ;;  %3541 = vmatprep.subr.bf16.mxu0 %v3381_v12  ;;  %v3289_v43 = vadd.f32 %v3288_v48, %v3127_v16  ;;  %v3152_v16 = vpop.permute.xlu1 %3151 }
 0x8f7   :  { %v3291_v42 = vadd.f32 %v3290_v26, %v3132_v29  ;;  %v3292_v23 = vpop.f32.mrb[167].mxu1  ;;  %3542 = vmatpush1.bf16.msra.mxu0 %v3380_v28 }
 0x8f8   :  { %v3293_v22 = vadd.f32 %v3292_v23, %v3132_v29 }
 0x8f9   :  { %v3366_v0 = vpack.c.bf16 %v3291_v42, %v3287_v38 }
 0x8fa   :  { %v3367_v17 = vpack.c.bf16 %v3293_v22, %v3289_v43 }
 0x8fb   :  { %v3382_v35 = vmax.bf16 %v8315_v37, %v3366_v0 }
 0x8fc   :  { %v3296_v55 = vpop.f32.mrb[168].mxu1  ;;  %v3383_v57 = vmax.bf16 %v8315_v37, %v3367_v17  ;;  %v3157_v17 = vpop.permute.xlu0 %3156 }
 0x8fd   :  { %v3298_v8 = vpop.f32.mrb[169].mxu1  ;;  %v3297_v62 = vadd.f32 %v3296_v55, %v3137_v3 }
 0x8fe   :  { %v3300_v31 = vpop.f32.mrb[170].mxu1  ;;  %3543 = vmatprep.subr.bf16.mxu0 %v3383_v57  ;;  %v3299_v6 = vadd.f32 %v3298_v8, %v3137_v3  ;;  %v3162_v3 = vpop.permute.xlu1 %3161 }
 0x8ff   :  { %v3301_v4 = vadd.f32 %v3300_v31, %v3142_v40  ;;  %v3302_v59 = vpop.f32.mrb[171].mxu1  ;;  %3544 = vmatpush1.bf16.msra.mxu0 %v3382_v35 }
 0x900   :  { %v3303_v10 = vadd.f32 %v3302_v59, %v3142_v40 }
 0x901   :  { %v3368_v24 = vpack.c.bf16 %v3301_v4, %v3297_v62 }
 0x902   :  { %v3369_v54 = vpack.c.bf16 %v3303_v10, %v3299_v6 }
 0x903   :  { %v3384_v9 = vmax.bf16 %v8315_v37, %v3368_v24 }
 0x904   :  { %v3306_v58 = vpop.f32.mrb[172].mxu1  ;;  %v3385_v53 = vmax.bf16 %v8315_v37, %v3369_v54  ;;  %v3167_v54 = vpop.permute.xlu0 %3166 }
 0x905   :  { %v3308_v12 = vpop.f32.mrb[173].mxu1  ;;  %v3307_v48 = vadd.f32 %v3306_v58, %v3147_v13 }
 0x906   :  { %v3310_v28 = vpop.f32.mrb[174].mxu1  ;;  %3545 = vmatprep.subr.bf16.mxu0 %v3385_v53  ;;  %v3309_v38 = vadd.f32 %v3308_v12, %v3147_v13  ;;  %v3172_v13 = vpop.permute.xlu1 %3171 }
 0x907   :  { %v3311_v29 = vadd.f32 %v3310_v28, %v3152_v16  ;;  %v3312_v26 = vpop.f32.mrb[175].mxu1  ;;  %3546 = vmatpush1.bf16.msra.mxu0 %v3384_v9 }
 0x908   :  { %v3313_v42 = vadd.f32 %v3312_v26, %v3152_v16 }
 0x909   :  { %v3370_v23 = vpack.c.bf16 %v3311_v29, %v3307_v48 }
 0x90a   :  { %v3371_v43 = vpack.c.bf16 %v3313_v42, %v3309_v38 }
 0x90b   :  { %v3386_v55 = vmax.bf16 %v8315_v37, %v3370_v23 }
 0x90c   :  { %v3316_v22 = vpop.f32.mrb[176].mxu1  ;;  %v3387_v0 = vmax.bf16 %v8315_v37, %v3371_v43  ;;  %v3177_v43 = vpop.permute.xlu0 %3176 }
 0x90d   :  { %v3318_v57 = vpop.f32.mrb[177].mxu1  ;;  %v3317_v8 = vadd.f32 %v3316_v22, %v3157_v17 }
 0x90e   :  { %v3320_v35 = vpop.f32.mrb[178].mxu1  ;;  %3547 = vmatprep.subr.bf16.mxu0 %v3387_v0  ;;  %v3319_v62 = vadd.f32 %v3318_v57, %v3157_v17  ;;  %v3182_v17 = vpop.permute.xlu1 %3181 }
 0x90f   :  { %v3321_v40 = vadd.f32 %v3320_v35, %v3162_v3  ;;  %v3322_v31 = vpop.f32.mrb[179].mxu1  ;;  %3548 = vmatpush1.bf16.msra.mxu0 %v3386_v55 }
 0x910   :  { %v3323_v4 = vadd.f32 %v3322_v31, %v3162_v3 }
 0x911   :  { %v3372_v59 = vpack.c.bf16 %v3321_v40, %v3317_v8 }
 0x912   :  { %v3373_v6 = vpack.c.bf16 %v3323_v4, %v3319_v62 }
 0x913   :  { %v3388_v58 = vmax.bf16 %v8315_v37, %v3372_v59 }
 0x914   :  { %v3326_v10 = vpop.f32.mrb[180].mxu1  ;;  %v3389_v24 = vmax.bf16 %v8315_v37, %v3373_v6  ;;  %v5399_v6 = vld [vmem:[%s8149_s4 + $0xc0] sm:$0xff]  }
 0x915   :  { %v3328_v53 = vpop.f32.mrb[181].mxu1  ;;  %v3327_v12 = vadd.f32 %v3326_v10, %v3167_v54  ;;  %v5400_v10 = vld [vmem:[%s8149_s4 + $0xc8] sm:$0xff]  }
 0x916   :  { %v3330_v9 = vpop.f32.mrb[182].mxu1  ;;  %3549 = vmatprep.subr.bf16.mxu0 %v3389_v24  ;;  %v3329_v48 = vadd.f32 %v3328_v53, %v3167_v54  ;;  %v5401_v24 = vld [vmem:[%s8149_s4 + $0xd0] sm:$0xff]   ;;  %v5402_v54 = vld [vmem:[%s8149_s4 + $0xd8] sm:$0xff]   ;;  %v5404_v53 = vld [vmem:[%s8149_s4 + $0xe8] sm:$0xff]  }
 0x917   :  { %v3331_v16 = vadd.f32 %v3330_v9, %v3172_v13  ;;  %v3332_v28 = vpop.f32.mrb[183].mxu1  ;;  %3550 = vmatpush1.bf16.msra.mxu0 %v3388_v58  ;;  %v5403_v58 = vld [vmem:[%s8149_s4 + $0xe0] sm:$0xff]   ;;  %v5406_v9 = vld [vmem:[%s8149_s4 + $0xf8] sm:$0xff]  }
 0x918   :  { %v3333_v29 = vadd.f32 %v3332_v28, %v3172_v13  ;;  %v5405_v13 = vld [vmem:[%s8149_s4 + $0xf0] sm:$0xff]   ;;  %v3419_v28 = vpop.permute.xlu1 %3418 }
 0x919   :  { %v3374_v26 = vpack.c.bf16 %v3331_v16, %v3327_v12  ;;  %v3414_v12 = vpop.permute.xlu0 %3413 }
 0x91a   :  { %v3375_v38 = vpack.c.bf16 %v3333_v29, %v3329_v48  ;;  %v5096_v16 = vadd.f32 %v7586_v11, %v3414_v12  ;;  %v5099_v29 = vadd.f32 %v7591_v52, %v3414_v12 }
 0x91b   :  { %v3390_v22 = vmax.bf16 %v8315_v37, %v3374_v26 }
 0x91c   :  { %v3336_v42 = vpop.f32.mrb[184].mxu1  ;;  %v3391_v23 = vmax.bf16 %v8315_v37, %v3375_v38 }
 0x91d   :  { %v3338_v0 = vpop.f32.mrb[185].mxu1  ;;  %v3337_v57 = vadd.f32 %v3336_v42, %v3177_v43  ;;  %v5102_v42 = vadd.f32 %v7595_v1, %v3419_v28  ;;  %v3429_v1 = vpop.permute.xlu1 %3428 }
 0x91e   :  { %v3340_v55 = vpop.f32.mrb[186].mxu1  ;;  %3551 = vmatprep.subr.bf16.mxu0 %v3391_v23  ;;  %v3339_v8 = vadd.f32 %v3338_v0, %v3177_v43 }
 0x91f   :  { %v3341_v3 = vadd.f32 %v3340_v55, %v3182_v17  ;;  %v3342_v35 = vpop.f32.mrb[187].mxu1  ;;  %3552 = vmatpush1.bf16.msra.mxu0 %v3390_v22  ;;  %v5105_v22 = vadd.f32 %v7599_v44, %v3419_v28 }
 0x920   :  { %v3343_v40 = vadd.f32 %v3342_v35, %v3182_v17 }
 0x921   :  { %v3376_v31 = vpack.c.bf16 %v3341_v3, %v3337_v57  ;;  %v3424_v57 = vpop.permute.xlu0 %3423 }
 0x922   :  { %v3377_v62 = vpack.c.bf16 %v3343_v40, %v3339_v8  ;;  %v5108_v3 = vadd.f32 %v7611_v39, %v3424_v57  ;;  %v5111_v8 = vadd.f32 %v7617_v49, %v3424_v57 }
 0x923   :  { %v3392_v59 = vmax.bf16 %v8315_v37, %v3376_v31 }
 0x924   :  { %v3393_v4 = vmax.bf16 %v8315_v37, %v3377_v62 }
 0x926   :  { %3553 = vmatprep.subr.bf16.mxu0 %v3393_v4  ;;  %v5114_v4 = vadd.f32 %v7621_v7, %v3429_v1 }
 0x927   :  { %3554 = vmatpush1.bf16.msra.mxu0 %v3392_v59 }
 0x92a   :  { %3572 = vmatmul.mubr.bf16.vlgmr.msra.gmra.mrb[128].mxu0 %v5399_v6 }
 0x92b   :  { %3581 = vmatprep.mubr.bf16.mxu0 %v8315_v37 }
 0x932   :  { %3582 = vmatmul.mubr.bf16.gmra.mrb[132].mxu0 %v5400_v10  ;;  %v5117_v10 = vadd.f32 %v7625_v41, %v3429_v1 }
 0x933   :  { %3591 = vmatprep.mubr.bf16.mxu0 %v8315_v37 }
 0x93a   :  { %3592 = vmatmul.mubr.bf16.gmra.mrb[136].mxu0 %v5401_v24 }
 0x93b   :  { %3601 = vmatprep.mubr.bf16.mxu0 %v8315_v37 }
 0x942   :  { %3602 = vmatmul.mubr.bf16.gmra.mrb[140].mxu0 %v5402_v54 }
 0x943   :  { %3611 = vmatprep.mubr.bf16.mxu0 %v8315_v37 }
 0x94a   :  { %3612 = vmatmul.mubr.bf16.gmra.mrb[144].mxu0 %v5403_v58  ;;  %v3434_v58 = vpop.permute.xlu0 %3433 }
 0x94b   :  { %3621 = vmatprep.mubr.bf16.mxu0 %v8315_v37  ;;  %v5120_v7 = vadd.f32 %v7637_v56, %v3434_v58  ;;  %v5123_v12 = vadd.f32 %v7643_v20, %v3434_v58 }
 0x952   :  { %3622 = vmatmul.mubr.bf16.gmra.mrb[148].mxu0 %v5404_v53 }
 0x953   :  { %3631 = vmatprep.mubr.bf16.mxu0 %v8315_v37 }
 0x95a   :  { %3632 = vmatmul.mubr.bf16.gmra.mrb[152].mxu0 %v5405_v13  ;;  %v3439_v13 = vpop.permute.xlu1 %3438 }
 0x95b   :  { %3641 = vmatprep.mubr.bf16.mxu0 %v8315_v37 }
 0x962   :  { %3642 = vmatmul.mubr.bf16.gmra.mrb[156].mxu0 %v5406_v9 }
 0x9fd   :  { %v3573_v48 = vpop.f32.mrb[128].mxu0 }
 0x9fe   :  { %v7860_v26 = vadd.f32 %v5096_v16, %v3573_v48  ;;  %v3575_v38 = vpop.f32.mrb[129].mxu0 }
 0x9ff   :  { %v7863_v23 = vadd.f32 %v5099_v29, %v3575_v38  ;;  %v3577_v43 = vpop.f32.mrb[130].mxu0  ;;  %v5126_v29 = vadd.f32 %v7647_v19, %v3439_v13 }
 0xa00   :  { %v7866_v0 = vadd.f32 %v5102_v42, %v3577_v43  ;;  %v3579_v17 = vpop.f32.mrb[131].mxu0  ;;  %v5129_v43 = vadd.f32 %v7651_v5, %v3439_v13 }
 0xa01   :  { %v7868_v55 = vadd.f32 %v5105_v22, %v3579_v17 }
 0xa02   :  { %v3733_v11 = vpack.c.bf16 %v7866_v0, %v7860_v26 }
 0xa03   :  { %v3734_v52 = vpack.c.bf16 %v7868_v55, %v7863_v23 }
 0xa04   :  { %v3749_v40 = vmax.bf16 %v8315_v37, %v3733_v11  ;;  %v3444_v11 = vpop.permute.xlu0 %3443 }
 0xa05   :  { %v3583_v35 = vpop.f32.mrb[132].mxu0  ;;  %v3750_v44 = vmax.bf16 %v8315_v37, %v3734_v52  ;;  %v5132_v19 = vadd.f32 %v7663_v18, %v3444_v11  ;;  %v3449_v52 = vpop.permute.xlu1 %3448  ;;  %v5135_v1 = vadd.f32 %v7669_v63, %v3444_v11 }
 0xa06   :  { %v7878_v31 = vadd.f32 %v5108_v3, %v3583_v35  ;;  %v3585_v62 = vpop.f32.mrb[133].mxu0 }
 0xa07   :  { %v7881_v59 = vadd.f32 %v5111_v8, %v3585_v62  ;;  %v3587_v6 = vpop.f32.mrb[134].mxu0  ;;  %3910 = vmatprep.subr.bf16.mxu1 %v3750_v44 }
 0xa08   :  { %v7884_v39 = vadd.f32 %v5114_v4, %v3587_v6  ;;  %v3589_v24 = vpop.f32.mrb[135].mxu0  ;;  %3911 = vmatpush1.bf16.msra.mxu1 %v3749_v40  ;;  %v5138_v40 = vadd.f32 %v7673_v61, %v3449_v52  ;;  %v5141_v6 = vadd.f32 %v7677_v51, %v3449_v52 }
 0xa09   :  { %v7886_v49 = vadd.f32 %v5117_v10, %v3589_v24 }
 0xa0a   :  { %v3735_v54 = vpack.c.bf16 %v7884_v39, %v7878_v31 }
 0xa0b   :  { %v3736_v53 = vpack.c.bf16 %v7886_v49, %v7881_v59 }
 0xa0c   :  { %v3751_v16 = vmax.bf16 %v8315_v37, %v3735_v54  ;;  %v3454_v54 = vpop.permute.xlu0 %3453 }
 0xa0d   :  { %v3593_v9 = vpop.f32.mrb[136].mxu0  ;;  %v3752_v41 = vmax.bf16 %v8315_v37, %v3736_v53  ;;  %v5144_v61 = vadd.f32 %v7689_v21, %v3454_v54  ;;  %v3459_v53 = vpop.permute.xlu1 %3458  ;;  %v5147_v13 = vadd.f32 %v7695_v30, %v3454_v54 }
 0xa0e   :  { %v7896_v28 = vadd.f32 %v5120_v7, %v3593_v9  ;;  %v3595_v48 = vpop.f32.mrb[137].mxu0 }
 0xa0f   :  { %v7899_v38 = vadd.f32 %v5123_v12, %v3595_v48  ;;  %v3597_v42 = vpop.f32.mrb[138].mxu0  ;;  %3912 = vmatprep.subr.bf16.mxu1 %v3752_v41 }
 0xa10   :  { %v7902_v56 = vadd.f32 %v5126_v29, %v3597_v42  ;;  %v3599_v22 = vpop.f32.mrb[139].mxu0  ;;  %3913 = vmatpush1.bf16.msra.mxu1 %v3751_v16  ;;  %v5150_v16 = vadd.f32 %v7699_v2, %v3459_v53  ;;  %v5153_v42 = vadd.f32 %v7703_v60, %v3459_v53 }
 0xa11   :  { %v7904_v20 = vadd.f32 %v5129_v43, %v3599_v22 }
 0xa12   :  { %v3737_v17 = vpack.c.bf16 %v7902_v56, %v7896_v28 }
 0xa13   :  { %v3738_v57 = vpack.c.bf16 %v7904_v20, %v7899_v38 }
 0xa14   :  { %v3753_v35 = vmax.bf16 %v8315_v37, %v3737_v17  ;;  %v3464_v17 = vpop.permute.xlu0 %3463 }
 0xa15   :  { %v3603_v3 = vpop.f32.mrb[140].mxu0  ;;  %v3754_v5 = vmax.bf16 %v8315_v37, %v3738_v57  ;;  %v5156_v2 = vadd.f32 %v7715_v50, %v3464_v17  ;;  %v3469_v57 = vpop.permute.xlu1 %3468  ;;  %v5159_v52 = vadd.f32 %v7721_v46, %v3464_v17 }
 0xa16   :  { %v7914_v8 = vadd.f32 %v5132_v19, %v3603_v3  ;;  %v3605_v44 = vpop.f32.mrb[141].mxu0 }
 0xa17   :  { %v7917_v62 = vadd.f32 %v5135_v1, %v3605_v44  ;;  %v3607_v4 = vpop.f32.mrb[142].mxu0  ;;  %3914 = vmatprep.subr.bf16.mxu1 %v3754_v5 }
 0xa18   :  { %v7920_v18 = vadd.f32 %v5138_v40, %v3607_v4  ;;  %v3609_v10 = vpop.f32.mrb[143].mxu0  ;;  %3915 = vmatpush1.bf16.msra.mxu1 %v3753_v35  ;;  %v5162_v35 = vadd.f32 %v7725_v25, %v3469_v57  ;;  %v5165_v4 = vadd.f32 %v7729_v15, %v3469_v57 }
 0xa19   :  { %v7922_v63 = vadd.f32 %v5141_v6, %v3609_v10 }
 0xa1a   :  { %v3739_v24 = vpack.c.bf16 %v7920_v18, %v7914_v8 }
 0xa1b   :  { %v3740_v58 = vpack.c.bf16 %v7922_v63, %v7917_v62 }
 0xa1c   :  { %v3755_v9 = vmax.bf16 %v8315_v37, %v3739_v24  ;;  %v3474_v24 = vpop.permute.xlu0 %3473 }
 0xa1d   :  { %v3613_v7 = vpop.f32.mrb[144].mxu0  ;;  %v3756_v51 = vmax.bf16 %v8315_v37, %v3740_v58  ;;  %v5168_v25 = vadd.f32 %v7741_v45, %v3474_v24  ;;  %v3479_v58 = vpop.permute.xlu1 %3478  ;;  %v5171_v53 = vadd.f32 %v7747_v33, %v3474_v24 }
 0xa1e   :  { %v7932_v12 = vadd.f32 %v5144_v61, %v3613_v7  ;;  %v3615_v41 = vpop.f32.mrb[145].mxu0 }
 0xa1f   :  { %v7935_v48 = vadd.f32 %v5147_v13, %v3615_v41  ;;  %v3617_v29 = vpop.f32.mrb[146].mxu0  ;;  %3916 = vmatprep.subr.bf16.mxu1 %v3756_v51 }
 0xa20   :  { %v7938_v21 = vadd.f32 %v5150_v16, %v3617_v29  ;;  %v3619_v43 = vpop.f32.mrb[147].mxu0  ;;  %3917 = vmatpush1.bf16.msra.mxu1 %v3755_v9  ;;  %v5174_v9 = vadd.f32 %v7751_v47, %v3479_v58  ;;  %v5177_v29 = vadd.f32 %v7755_v14, %v3479_v58  ;;  %v5410_v58 = vld [vmem:[%s8147_s2 + $0x118] sm:$0xff]  }
 0xa21   :  { %v7940_v30 = vadd.f32 %v5153_v42, %v3619_v43 }
 0xa22   :  { %v3741_v22 = vpack.c.bf16 %v7938_v21, %v7932_v12 }
 0xa23   :  { %v3742_v11 = vpack.c.bf16 %v7940_v30, %v7935_v48 }
 0xa24   :  { %v3757_v3 = vmax.bf16 %v8315_v37, %v3741_v22  ;;  %v3484_v22 = vpop.permute.xlu0 %3483 }
 0xa25   :  { %v3623_v19 = vpop.f32.mrb[148].mxu0  ;;  %v3758_v60 = vmax.bf16 %v8315_v37, %v3742_v11  ;;  %v5180_v47 = vadd.f32 %v7765_v34, %v3484_v22  ;;  %v3489_v11 = vpop.permute.xlu1 %3488  ;;  %v5183_v57 = vadd.f32 %v7770_v27, %v3484_v22 }
 0xa26   :  { %v7950_v1 = vadd.f32 %v5156_v2, %v3623_v19  ;;  %v3625_v5 = vpop.f32.mrb[149].mxu0 }
 0xa27   :  { %v7953_v44 = vadd.f32 %v5159_v52, %v3625_v5  ;;  %v3627_v40 = vpop.f32.mrb[150].mxu0  ;;  %3918 = vmatprep.subr.bf16.mxu1 %v3758_v60 }
 0xa28   :  { %v7956_v50 = vadd.f32 %v5162_v35, %v3627_v40  ;;  %v3629_v6 = vpop.f32.mrb[151].mxu0  ;;  %3919 = vmatpush1.bf16.msra.mxu1 %v3757_v3  ;;  %v5186_v3 = vadd.f32 %v7774_v36, %v3489_v11  ;;  %v5189_v40 = vadd.f32 %v7780_v32, %v3489_v11  ;;  %v5407_v32 = vld [vmem:[%s8147_s2 + $0x100] sm:$0xff]  }
 0xa29   :  { %v7958_v46 = vadd.f32 %v5165_v4, %v3629_v6 }
 0xa2a   :  { %v3743_v10 = vpack.c.bf16 %v7956_v50, %v7950_v1 }
 0xa2b   :  { %v3744_v54 = vpack.c.bf16 %v7958_v46, %v7953_v44 }
 0xa2c   :  { %v3759_v7 = vmax.bf16 %v8315_v37, %v3743_v10 }
 0xa2d   :  { %v3633_v61 = vpop.f32.mrb[152].mxu0  ;;  %v3760_v15 = vmax.bf16 %v8315_v37, %v3744_v54  ;;  %v5408_v54 = vld [vmem:[%s8147_s2 + $0x108] sm:$0xff]  }
 0xa2e   :  { %v7968_v13 = vadd.f32 %v5168_v25, %v3633_v61  ;;  %v3635_v51 = vpop.f32.mrb[153].mxu0  ;;  %v5409_v25 = vld [vmem:[%s8147_s2 + $0x110] sm:$0xff]   ;;  %v5411_v61 = vld [vmem:[%s8147_s2 + $0x120] sm:$0xff]  }
 0xa2f   :  { %v7971_v41 = vadd.f32 %v5171_v53, %v3635_v51  ;;  %v3637_v16 = vpop.f32.mrb[154].mxu0  ;;  %3920 = vmatprep.subr.bf16.mxu1 %v3760_v15  ;;  %v5412_v53 = vld [vmem:[%s8147_s2 + $0x128] sm:$0xff]   ;;  %v5413_v15 = vld [vmem:[%s8147_s2 + $0x130] sm:$0xff]  }
 0xa30   :  { %v7974_v45 = vadd.f32 %v5174_v9, %v3637_v16  ;;  %v3639_v42 = vpop.f32.mrb[155].mxu0  ;;  %3921 = vmatpush1.bf16.msra.mxu1 %v3759_v7  ;;  %v5414_v7 = vld [vmem:[%s8147_s2 + $0x138] sm:$0xff]   ;;  %v3785_v9 = vpop.permute.xlu0 %3784 }
 0xa31   :  { %v7976_v33 = vadd.f32 %v5177_v29, %v3639_v42  ;;  %v3790_v29 = vpop.permute.xlu1 %3789 }
 0xa32   :  { %v3745_v43 = vpack.c.bf16 %v7974_v45, %v7968_v13 }
 0xa33   :  { %v3746_v17 = vpack.c.bf16 %v7976_v33, %v7971_v41 }
 0xa34   :  { %v3761_v19 = vmax.bf16 %v8315_v37, %v3745_v43 }
 0xa35   :  { %v3643_v2 = vpop.f32.mrb[156].mxu0  ;;  %v3762_v14 = vmax.bf16 %v8315_v37, %v3746_v17 }
 0xa36   :  { %v7986_v52 = vadd.f32 %v5180_v47, %v3643_v2  ;;  %v3645_v60 = vpop.f32.mrb[157].mxu0 }
 0xa37   :  { %v7989_v5 = vadd.f32 %v5183_v57, %v3645_v60  ;;  %v3647_v35 = vpop.f32.mrb[158].mxu0  ;;  %3922 = vmatprep.subr.bf16.mxu1 %v3762_v14  ;;  %v3795_v60 = vpop.permute.xlu0 %3794 }
 0xa38   :  { %v7992_v34 = vadd.f32 %v5186_v3, %v3647_v35  ;;  %v3649_v4 = vpop.f32.mrb[159].mxu0  ;;  %3923 = vmatpush1.bf16.msra.mxu1 %v3761_v19 }
 0xa39   :  { %v7994_v27 = vadd.f32 %v5189_v40, %v3649_v4  ;;  %v3800_v40 = vpop.permute.xlu1 %3799 }
 0xa3a   :  { %v3747_v6 = vpack.c.bf16 %v7992_v34, %v7986_v52 }
 0xa3b   :  { %v3748_v10 = vpack.c.bf16 %v7994_v27, %v7989_v5 }
 0xa3c   :  { %v3763_v24 = vmax.bf16 %v8315_v37, %v3747_v6 }
 0xa3d   :  { %v3764_v36 = vmax.bf16 %v8315_v37, %v3748_v10 }
 0xa3f   :  { %3924 = vmatprep.subr.bf16.mxu1 %v3764_v36 }
 0xa40   :  { %3925 = vmatpush1.bf16.msra.mxu1 %v3763_v24 }
 0xa43   :  { %3943 = vmatmul.mubr.bf16.vlgmr.msra.gmra.mrb[188].mxu1 %v5407_v32 }
 0xa44   :  { %3952 = vmatprep.mubr.bf16.mxu1 %v8315_v37 }
 0xa4b   :  { %3953 = vmatmul.mubr.bf16.gmra.mrb[192].mxu1 %v5408_v54 }
 0xa4c   :  { %3962 = vmatprep.mubr.bf16.mxu1 %v8315_v37 }
 0xa53   :  { %3963 = vmatmul.mubr.bf16.gmra.mrb[196].mxu1 %v5409_v25 }
 0xa54   :  { %3972 = vmatprep.mubr.bf16.mxu1 %v8315_v37 }
 0xa5b   :  { %3973 = vmatmul.mubr.bf16.gmra.mrb[200].mxu1 %v5410_v58 }
 0xa5c   :  { %3982 = vmatprep.mubr.bf16.mxu1 %v8315_v37 }
 0xa63   :  { %3983 = vmatmul.mubr.bf16.gmra.mrb[204].mxu1 %v5411_v61 }
 0xa64   :  { %3992 = vmatprep.mubr.bf16.mxu1 %v8315_v37 }
 0xa6b   :  { %3993 = vmatmul.mubr.bf16.gmra.mrb[208].mxu1 %v5412_v53  ;;  %v3805_v53 = vpop.permute.xlu0 %3804 }
 0xa6c   :  { %4002 = vmatprep.mubr.bf16.mxu1 %v8315_v37 }
 0xa73   :  { %4003 = vmatmul.mubr.bf16.gmra.mrb[212].mxu1 %v5413_v15 }
 0xa74   :  { %4012 = vmatprep.mubr.bf16.mxu1 %v8315_v37 }
 0xa7b   :  { %4013 = vmatmul.mubr.bf16.gmra.mrb[216].mxu1 %v5414_v7 }
 0xa7c   :  { %4249 = vmatprep.mubr.bf16.mxu1 %v8315_v37 }
 0xb16   :  { %v3944_v51 = vpop.f32.mrb[188].mxu1 }
 0xb17   :  { %v3946_v16 = vpop.f32.mrb[189].mxu1  ;;  %v3945_v43 = vadd.f32 %v3944_v51, %v3785_v9  ;;  %v3810_v51 = vpop.permute.xlu1 %3809 }
 0xb18   :  { %v3948_v42 = vpop.f32.mrb[190].mxu1  ;;  %v3947_v47 = vadd.f32 %v3946_v16, %v3785_v9 }
 0xb19   :  { %v3949_v22 = vadd.f32 %v3948_v42, %v3790_v29  ;;  %v3950_v17 = vpop.f32.mrb[191].mxu1 }
 0xb1a   :  { %v3951_v11 = vadd.f32 %v3950_v17, %v3790_v29 }
 0xb1b   :  { %v4040_v2 = vpack.c.bf16 %v3949_v22, %v3945_v43 }
 0xb1c   :  { %v4041_v57 = vpack.c.bf16 %v3951_v11, %v3947_v47 }
 0xb1d   :  { %v4056_v3 = vmax.bf16 %v8315_v37, %v4040_v2 }
 0xb1e   :  { %v3954_v14 = vpop.f32.mrb[192].mxu1  ;;  %v4057_v19 = vmax.bf16 %v8315_v37, %v4041_v57  ;;  %v3815_v57 = vpop.permute.xlu0 %3814 }
 0xb1f   :  { %v3956_v35 = vpop.f32.mrb[193].mxu1  ;;  %v3955_v6 = vadd.f32 %v3954_v14, %v3795_v60 }
 0xb20   :  { %v3958_v4 = vpop.f32.mrb[194].mxu1  ;;  %4217 = vmatprep.subr.bf16.mxu1 %v4057_v19  ;;  %v3957_v24 = vadd.f32 %v3956_v35, %v3795_v60  ;;  %v3820_v60 = vpop.permute.xlu1 %3819 }
 0xb21   :  { %v3959_v10 = vadd.f32 %v3958_v4, %v3800_v40  ;;  %v3960_v36 = vpop.f32.mrb[195].mxu1  ;;  %4218 = vmatpush1.bf16.msra.mxu1 %v4056_v3 }
 0xb22   :  { %v3961_v32 = vadd.f32 %v3960_v36, %v3800_v40 }
 0xb23   :  { %v4042_v54 = vpack.c.bf16 %v3959_v10, %v3955_v6 }
 0xb24   :  { %v4043_v25 = vpack.c.bf16 %v3961_v32, %v3957_v24 }
 0xb25   :  { %v4058_v15 = vmax.bf16 %v8315_v37, %v4042_v54 }
 0xb26   :  { %v3964_v58 = vpop.f32.mrb[196].mxu1  ;;  %v4059_v61 = vmax.bf16 %v8315_v37, %v4043_v25  ;;  %v3825_v25 = vpop.permute.xlu0 %3824 }
 0xb27   :  { %v3966_v7 = vpop.f32.mrb[197].mxu1  ;;  %v3965_v16 = vadd.f32 %v3964_v58, %v3805_v53 }
 0xb28   :  { %v3968_v9 = vpop.f32.mrb[198].mxu1  ;;  %4219 = vmatprep.subr.bf16.mxu1 %v4059_v61  ;;  %v3967_v43 = vadd.f32 %v3966_v7, %v3805_v53  ;;  %v3830_v53 = vpop.permute.xlu1 %3829 }
 0xb29   :  { %v3969_v29 = vadd.f32 %v3968_v9, %v3810_v51  ;;  %v3970_v42 = vpop.f32.mrb[199].mxu1  ;;  %4220 = vmatpush1.bf16.msra.mxu1 %v4058_v15 }
 0xb2a   :  { %v3971_v22 = vadd.f32 %v3970_v42, %v3810_v51 }
 0xb2b   :  { %v4044_v17 = vpack.c.bf16 %v3969_v29, %v3965_v16 }
 0xb2c   :  { %v4045_v47 = vpack.c.bf16 %v3971_v22, %v3967_v43 }
 0xb2d   :  { %v4060_v14 = vmax.bf16 %v8315_v37, %v4044_v17 }
 0xb2e   :  { %v3974_v11 = vpop.f32.mrb[200].mxu1  ;;  %v4061_v2 = vmax.bf16 %v8315_v37, %v4045_v47  ;;  %v3835_v47 = vpop.permute.xlu0 %3834 }
 0xb2f   :  { %v3976_v19 = vpop.f32.mrb[201].mxu1  ;;  %v3975_v35 = vadd.f32 %v3974_v11, %v3815_v57 }
 0xb30   :  { %v3978_v3 = vpop.f32.mrb[202].mxu1  ;;  %4221 = vmatprep.subr.bf16.mxu1 %v4061_v2  ;;  %v3977_v6 = vadd.f32 %v3976_v19, %v3815_v57  ;;  %v3840_v57 = vpop.permute.xlu1 %3839 }
 0xb31   :  { %v3979_v40 = vadd.f32 %v3978_v3, %v3820_v60  ;;  %v3980_v4 = vpop.f32.mrb[203].mxu1  ;;  %4222 = vmatpush1.bf16.msra.mxu1 %v4060_v14 }
 0xb32   :  { %v3981_v10 = vadd.f32 %v3980_v4, %v3820_v60 }
 0xb33   :  { %v4046_v36 = vpack.c.bf16 %v3979_v40, %v3975_v35 }
 0xb34   :  { %v4047_v24 = vpack.c.bf16 %v3981_v10, %v3977_v6 }
 0xb35   :  { %v4062_v58 = vmax.bf16 %v8315_v37, %v4046_v36 }
 0xb36   :  { %v3984_v32 = vpop.f32.mrb[204].mxu1  ;;  %v4063_v54 = vmax.bf16 %v8315_v37, %v4047_v24  ;;  %v3845_v24 = vpop.permute.xlu0 %3844 }
 0xb37   :  { %v3986_v61 = vpop.f32.mrb[205].mxu1  ;;  %v3985_v7 = vadd.f32 %v3984_v32, %v3825_v25 }
 0xb38   :  { %v3988_v15 = vpop.f32.mrb[206].mxu1  ;;  %4223 = vmatprep.subr.bf16.mxu1 %v4063_v54  ;;  %v3987_v16 = vadd.f32 %v3986_v61, %v3825_v25  ;;  %v3850_v25 = vpop.permute.xlu1 %3849 }
 0xb39   :  { %v3989_v51 = vadd.f32 %v3988_v15, %v3830_v53  ;;  %v3990_v9 = vpop.f32.mrb[207].mxu1  ;;  %4224 = vmatpush1.bf16.msra.mxu1 %v4062_v58 }
 0xb3a   :  { %v3991_v29 = vadd.f32 %v3990_v9, %v3830_v53 }
 0xb3b   :  { %v4048_v42 = vpack.c.bf16 %v3989_v51, %v3985_v7 }
 0xb3c   :  { %v4049_v43 = vpack.c.bf16 %v3991_v29, %v3987_v16 }
 0xb3d   :  { %v4064_v11 = vmax.bf16 %v8315_v37, %v4048_v42 }
 0xb3e   :  { %v3994_v22 = vpop.f32.mrb[208].mxu1  ;;  %v4065_v17 = vmax.bf16 %v8315_v37, %v4049_v43  ;;  %v3855_v43 = vpop.permute.xlu0 %3854 }
 0xb3f   :  { %v3996_v2 = vpop.f32.mrb[209].mxu1  ;;  %v3995_v19 = vadd.f32 %v3994_v22, %v3835_v47 }
 0xb40   :  { %v3998_v14 = vpop.f32.mrb[210].mxu1  ;;  %4225 = vmatprep.subr.bf16.mxu1 %v4065_v17  ;;  %v3997_v35 = vadd.f32 %v3996_v2, %v3835_v47  ;;  %v3860_v47 = vpop.permute.xlu1 %3859 }
 0xb41   :  { %v3999_v60 = vadd.f32 %v3998_v14, %v3840_v57  ;;  %v4000_v3 = vpop.f32.mrb[211].mxu1  ;;  %4226 = vmatpush1.bf16.msra.mxu1 %v4064_v11 }
 0xb42   :  { %v4001_v40 = vadd.f32 %v4000_v3, %v3840_v57 }
 0xb43   :  { %v4050_v4 = vpack.c.bf16 %v3999_v60, %v3995_v19 }
 0xb44   :  { %v4051_v6 = vpack.c.bf16 %v4001_v40, %v3997_v35 }
 0xb45   :  { %v4066_v32 = vmax.bf16 %v8315_v37, %v4050_v4 }
 0xb46   :  { %v4004_v10 = vpop.f32.mrb[212].mxu1  ;;  %v4067_v36 = vmax.bf16 %v8315_v37, %v4051_v6  ;;  %v5415_v6 = vld [vmem:[%s8149_s4 + $0x100] sm:$0xff]  }
 0xb47   :  { %v4006_v54 = vpop.f32.mrb[213].mxu1  ;;  %v4005_v61 = vadd.f32 %v4004_v10, %v3845_v24  ;;  %v5416_v10 = vld [vmem:[%s8149_s4 + $0x108] sm:$0xff]  }
 0xb48   :  { %v4008_v58 = vpop.f32.mrb[214].mxu1  ;;  %4227 = vmatprep.subr.bf16.mxu1 %v4067_v36  ;;  %v4007_v7 = vadd.f32 %v4006_v54, %v3845_v24  ;;  %v5417_v36 = vld [vmem:[%s8149_s4 + $0x110] sm:$0xff]   ;;  %v5418_v24 = vld [vmem:[%s8149_s4 + $0x118] sm:$0xff]   ;;  %v5420_v54 = vld [vmem:[%s8149_s4 + $0x128] sm:$0xff]  }
 0xb49   :  { %v4009_v53 = vadd.f32 %v4008_v58, %v3850_v25  ;;  %v4010_v15 = vpop.f32.mrb[215].mxu1  ;;  %4228 = vmatpush1.bf16.msra.mxu1 %v4066_v32  ;;  %v5419_v32 = vld [vmem:[%s8149_s4 + $0x120] sm:$0xff]   ;;  %v5422_v58 = vld [vmem:[%s8149_s4 + $0x138] sm:$0xff]  }
 0xb4a   :  { %v4011_v51 = vadd.f32 %v4010_v15, %v3850_v25  ;;  %v5421_v25 = vld [vmem:[%s8149_s4 + $0x130] sm:$0xff]  }
 0xb4b   :  { %v4052_v9 = vpack.c.bf16 %v4009_v53, %v4005_v61  ;;  %v4092_v61 = vpop.permute.xlu0 %4091 }
 0xb4c   :  { %v4053_v16 = vpack.c.bf16 %v4011_v51, %v4007_v7  ;;  %v4097_v51 = vpop.permute.xlu1 %4096 }
 0xb4d   :  { %v4068_v22 = vmax.bf16 %v8315_v37, %v4052_v9 }
 0xb4e   :  { %v4014_v29 = vpop.f32.mrb[216].mxu1  ;;  %v4069_v42 = vmax.bf16 %v8315_v37, %v4053_v16 }
 0xb4f   :  { %v4016_v17 = vpop.f32.mrb[217].mxu1  ;;  %v4015_v2 = vadd.f32 %v4014_v29, %v3855_v43 }
 0xb50   :  { %v4018_v11 = vpop.f32.mrb[218].mxu1  ;;  %4229 = vmatprep.subr.bf16.mxu1 %v4069_v42  ;;  %v4017_v19 = vadd.f32 %v4016_v17, %v3855_v43 }
 0xb51   :  { %v4019_v57 = vadd.f32 %v4018_v11, %v3860_v47  ;;  %v4020_v14 = vpop.f32.mrb[219].mxu1  ;;  %4230 = vmatpush1.bf16.msra.mxu1 %v4068_v22 }
 0xb52   :  { %v4021_v60 = vadd.f32 %v4020_v14, %v3860_v47 }
 0xb53   :  { %v4054_v3 = vpack.c.bf16 %v4019_v57, %v4015_v2  ;;  %v4102_v57 = vpop.permute.xlu0 %4101 }
 0xb54   :  { %v4055_v35 = vpack.c.bf16 %v4021_v60, %v4017_v19 }
 0xb55   :  { %v4070_v4 = vmax.bf16 %v8315_v37, %v4054_v3 }
 0xb56   :  { %v4071_v40 = vmax.bf16 %v8315_v37, %v4055_v35  ;;  %v4107_v35 = vpop.permute.xlu1 %4106 }
 0xb58   :  { %4231 = vmatprep.subr.bf16.mxu1 %v4071_v40 }
 0xb59   :  { %4232 = vmatpush1.bf16.msra.mxu1 %v4070_v4 }
 0xb5c   :  { %4250 = vmatmul.mubr.bf16.vlgmr.msra.gmra.mrb[220].mxu1 %v5415_v6 }
 0xb5d   :  { %4259 = vmatprep.mubr.bf16.mxu1 %v8315_v37 }
 0xb64   :  { %4260 = vmatmul.mubr.bf16.gmra.mrb[224].mxu1 %v5416_v10 }
 0xb65   :  { %4269 = vmatprep.mubr.bf16.mxu1 %v8315_v37 }
 0xb6c   :  { %4270 = vmatmul.mubr.bf16.gmra.mrb[228].mxu1 %v5417_v36 }
 0xb6d   :  { %4279 = vmatprep.mubr.bf16.mxu1 %v8315_v37 }
 0xb74   :  { %4280 = vmatmul.mubr.bf16.gmra.mrb[232].mxu1 %v5418_v24 }
 0xb75   :  { %4289 = vmatprep.mubr.bf16.mxu1 %v8315_v37 }
 0xb7c   :  { %4290 = vmatmul.mubr.bf16.gmra.mrb[236].mxu1 %v5419_v32 }
 0xb7d   :  { %4299 = vmatprep.mubr.bf16.mxu1 %v8315_v37 }
 0xb84   :  { %4300 = vmatmul.mubr.bf16.gmra.mrb[240].mxu1 %v5420_v54 }
 0xb85   :  { %4309 = vmatprep.mubr.bf16.mxu1 %v8315_v37 }
 0xb8c   :  { %4310 = vmatmul.mubr.bf16.gmra.mrb[244].mxu1 %v5421_v25  ;;  %v4112_v25 = vpop.permute.xlu0 %4111 }
 0xb8d   :  { %4319 = vmatprep.mubr.bf16.mxu1 %v8315_v37 }
 0xb94   :  { %4320 = vmatmul.mubr.bf16.gmra.mrb[248].mxu1 %v5422_v58 }
 0xb95   :  { %4433 = vmatprep.mubr.bf16.mxu1 %v8315_v37 }
 0xc2f   :  { %v4251_v53 = vpop.f32.mrb[220].mxu1 }
 0xc30   :  { %v4252_v15 = vadd.f32 %v4251_v53, %v4092_v61  ;;  %v4253_v7 = vpop.f32.mrb[221].mxu1 }
 0xc31   :  { %v4254_v9 = vadd.f32 %v4253_v7, %v4092_v61  ;;  %v4255_v16 = vpop.f32.mrb[222].mxu1  ;;  %v4117_v7 = vpop.permute.xlu1 %4116 }
 0xc32   :  { %v4256_v29 = vadd.f32 %v4255_v16, %v4097_v51  ;;  %v4257_v42 = vpop.f32.mrb[223].mxu1  ;;  %v4330_v22 = vadd.f32 %v7860_v26, %v4252_v15 }
 0xc33   :  { %v4258_v43 = vadd.f32 %v4257_v42, %v4097_v51  ;;  %v4331_v47 = vadd.f32 %v7863_v23, %v4254_v9 }
 0xc34   :  { %v4332_v17 = vadd.f32 %v7866_v0, %v4256_v29 }
 0xc35   :  { %v4333_v11 = vadd.f32 %v7868_v55, %v4258_v43 }
 0xc36   :  { %v4363_v2 = vpack.c.bf16 %v4332_v17, %v4330_v22 }
 0xc37   :  { %v4364_v14 = vpack.c.bf16 %v4333_v11, %v4331_v47  ;;  %v4261_v19 = vpop.f32.mrb[224].mxu1  ;;  %v4122_v47 = vpop.permute.xlu0 %4121 }
 0xc38   :  { %v4262_v60 = vadd.f32 %v4261_v19, %v4102_v57  ;;  %v4263_v3 = vpop.f32.mrb[225].mxu1  ;;  %v4379_v10 = vmax.bf16 %v8315_v37, %v4363_v2  ;;  %v4127_v19 = vpop.permute.xlu1 %4126 }
 0xc39   :  { %v4264_v40 = vadd.f32 %v4263_v3, %v4102_v57  ;;  %v4265_v4 = vpop.f32.mrb[226].mxu1  ;;  %v4380_v6 = vmax.bf16 %v8315_v37, %v4364_v14 }
 0xc3a   :  { %v4266_v26 = vadd.f32 %v4265_v4, %v4107_v35  ;;  %v4267_v36 = vpop.f32.mrb[227].mxu1  ;;  %v4334_v23 = vadd.f32 %v7878_v31, %v4262_v60 }
 0xc3b   :  { %v4268_v0 = vadd.f32 %v4267_v36, %v4107_v35  ;;  %4401 = vmatprep.subr.bf16.mxu1 %v4380_v6  ;;  %v4335_v24 = vadd.f32 %v7881_v59, %v4264_v40  ;;  %v4132_v36 = vpop.permute.xlu0 %4131 }
 0xc3c   :  { %v4336_v55 = vadd.f32 %v7884_v39, %v4266_v26  ;;  %4402 = vmatpush1.bf16.msra.mxu1 %v4379_v10 }
 0xc3d   :  { %v4337_v32 = vadd.f32 %v7886_v49, %v4268_v0 }
 0xc3e   :  { %v4365_v54 = vpack.c.bf16 %v4336_v55, %v4334_v23 }
 0xc3f   :  { %v4366_v58 = vpack.c.bf16 %v4337_v32, %v4335_v24  ;;  %v4271_v61 = vpop.f32.mrb[228].mxu1  ;;  %v4137_v32 = vpop.permute.xlu1 %4136 }
 0xc40   :  { %v4272_v53 = vadd.f32 %v4271_v61, %v4112_v25  ;;  %v4273_v15 = vpop.f32.mrb[229].mxu1  ;;  %v4381_v31 = vmax.bf16 %v8315_v37, %v4365_v54 }
 0xc41   :  { %v4274_v51 = vadd.f32 %v4273_v15, %v4112_v25  ;;  %v4275_v9 = vpop.f32.mrb[230].mxu1  ;;  %v4382_v16 = vmax.bf16 %v8315_v37, %v4366_v58 }
 0xc42   :  { %v4276_v29 = vadd.f32 %v4275_v9, %v4117_v7  ;;  %v4277_v39 = vpop.f32.mrb[231].mxu1  ;;  %v4338_v59 = vadd.f32 %v7896_v28, %v4272_v53  ;;  %v4142_v9 = vpop.permute.xlu0 %4141 }
 0xc43   :  { %v4278_v42 = vadd.f32 %v4277_v39, %v4117_v7  ;;  %4403 = vmatprep.subr.bf16.mxu1 %v4382_v16  ;;  %v4339_v43 = vadd.f32 %v7899_v38, %v4274_v51 }
 0xc44   :  { %v4340_v49 = vadd.f32 %v7902_v56, %v4276_v29  ;;  %4404 = vmatpush1.bf16.msra.mxu1 %v4381_v31 }
 0xc45   :  { %v4341_v22 = vadd.f32 %v7904_v20, %v4278_v42  ;;  %v4147_v42 = vpop.permute.xlu1 %4146 }
 0xc46   :  { %v4367_v17 = vpack.c.bf16 %v4340_v49, %v4338_v59 }
 0xc47   :  { %v4368_v11 = vpack.c.bf16 %v4341_v22, %v4339_v43  ;;  %v4281_v2 = vpop.f32.mrb[232].mxu1 }
 0xc48   :  { %v4282_v57 = vadd.f32 %v4281_v2, %v4122_v47  ;;  %v4283_v14 = vpop.f32.mrb[233].mxu1  ;;  %v4383_v28 = vmax.bf16 %v8315_v37, %v4367_v17 }
 0xc49   :  { %v4284_v60 = vadd.f32 %v4283_v14, %v4122_v47  ;;  %v4285_v3 = vpop.f32.mrb[234].mxu1  ;;  %v4384_v35 = vmax.bf16 %v8315_v37, %v4368_v11 }
 0xc4a   :  { %v4286_v40 = vadd.f32 %v4285_v3, %v4127_v19  ;;  %v4287_v56 = vpop.f32.mrb[235].mxu1  ;;  %v4342_v38 = vadd.f32 %v7914_v8, %v4282_v57  ;;  %v4152_v57 = vpop.permute.xlu0 %4151 }
 0xc4b   :  { %v4288_v4 = vadd.f32 %v4287_v56, %v4127_v19  ;;  %4405 = vmatprep.subr.bf16.mxu1 %v4384_v35  ;;  %v4343_v6 = vadd.f32 %v7917_v62, %v4284_v60  ;;  %v4157_v35 = vpop.permute.xlu1 %4156 }
 0xc4c   :  { %v4344_v20 = vadd.f32 %v7920_v18, %v4286_v40  ;;  %4406 = vmatpush1.bf16.msra.mxu1 %v4383_v28 }
 0xc4d   :  { %v4345_v10 = vadd.f32 %v7922_v63, %v4288_v4 }
 0xc4e   :  { %v4369_v26 = vpack.c.bf16 %v4344_v20, %v4342_v38 }
 0xc4f   :  { %v4370_v0 = vpack.c.bf16 %v4345_v10, %v4343_v6  ;;  %v4291_v23 = vpop.f32.mrb[236].mxu1 }
 0xc50   :  { %v4292_v55 = vadd.f32 %v4291_v23, %v4132_v36  ;;  %v4293_v24 = vpop.f32.mrb[237].mxu1  ;;  %v4385_v8 = vmax.bf16 %v8315_v37, %v4369_v26  ;;  %v4162_v26 = vpop.permute.xlu0 %4161 }
 0xc51   :  { %v4294_v54 = vadd.f32 %v4293_v24, %v4132_v36  ;;  %v4295_v25 = vpop.f32.mrb[238].mxu1  ;;  %v4386_v58 = vmax.bf16 %v8315_v37, %v4370_v0  ;;  %v4167_v24 = vpop.permute.xlu1 %4166 }
 0xc52   :  { %v4296_v61 = vadd.f32 %v4295_v25, %v4137_v32  ;;  %v4297_v18 = vpop.f32.mrb[239].mxu1  ;;  %v4346_v62 = vadd.f32 %v7932_v12, %v4292_v55 }
 0xc53   :  { %v4298_v53 = vadd.f32 %v4297_v18, %v4137_v32  ;;  %4407 = vmatprep.subr.bf16.mxu1 %v4386_v58  ;;  %v4347_v15 = vadd.f32 %v7935_v48, %v4294_v54 }
 0xc54   :  { %v4348_v63 = vadd.f32 %v7938_v21, %v4296_v61  ;;  %4408 = vmatpush1.bf16.msra.mxu1 %v4385_v8 }
 0xc55   :  { %v4349_v7 = vadd.f32 %v7940_v30, %v4298_v53 }
 0xc56   :  { %v4371_v51 = vpack.c.bf16 %v4348_v63, %v4346_v62 }
 0xc57   :  { %v4372_v16 = vpack.c.bf16 %v4349_v7, %v4347_v15  ;;  %v4301_v31 = vpop.f32.mrb[240].mxu1  ;;  %v4362_v7 = vld [vmem:[%s8151_s6] sm:$0x3]  ;;  %s4465_s6 = sshll.u32 %s5456_s22, 4  ;;  %s4466_s6 = int_to_ptr.vmem [resolvable:$true] %s4465_s6 }
 0xc58   :  { %v4302_v29 = vadd.f32 %v4301_v31, %v4142_v9  ;;  %v4303_v39 = vpop.f32.mrb[241].mxu1  ;;  %v4387_v12 = vmax.bf16 %v8315_v37, %v4371_v51  ;;  %s5431_s23 = scalar_lea.vmem %s4466_s6, 128  ;;  %p5436_p1 = scmp.lt.s32.totalorder %s4466_s6, %s4466_s6 }
 0xc59   :  { %v4304_v59 = vadd.f32 %v4303_v39, %v4142_v9  ;;  %v4305_v49 = vpop.f32.mrb[242].mxu1  ;;  %v4388_v43 = vmax.bf16 %v8315_v37, %v4372_v16  ;;  %p5432_p0 = scmp.ne.s32.totalorder %s4466_s6, %s5431_s23  ;;  %p5437_p2 = scmp.lt.s32.totalorder %s5431_s23, %s5431_s23 }
 0xc5a   :  { %v4306_v22 = vadd.f32 %v4305_v49, %v4147_v42  ;;  %v4307_v21 = vpop.f32.mrb[243].mxu1  ;;  %v4350_v48 = vadd.f32 %v7950_v1, %v4302_v29 }
 0xc5b   :  { %v4308_v17 = vadd.f32 %v4307_v21, %v4147_v42  ;;  %4409 = vmatprep.subr.bf16.mxu1 %v4388_v43  ;;  %v4351_v47 = vadd.f32 %v7953_v44, %v4304_v59  ;;  %p5438_p3 = por %p5437_p2, %p5436_p1 }
 0xc5c   :  { %v4352_v30 = vadd.f32 %v7956_v50, %v4306_v22  ;;  %4410 = vmatpush1.bf16.msra.mxu1 %v4387_v12 }
 0xc5d   :  { %v4353_v11 = vadd.f32 %v7958_v46, %v4308_v17  ;;  %p5439_p4 = pnand %p5438_p3, %p5432_p0 }
 0xc5e   :  { %v4373_v2 = vpack.c.bf16 %v4352_v30, %v4350_v48 }
 0xc5f   :  { %v4374_v14 = vpack.c.bf16 %v4353_v11, %v4351_v47  ;;  %v4311_v19 = vpop.f32.mrb[244].mxu1 }
 0xc60   :  { %v4312_v60 = vadd.f32 %v4311_v19, %v4152_v57  ;;  %v4313_v3 = vpop.f32.mrb[245].mxu1  ;;  %v4389_v1 = vmax.bf16 %v8315_v37, %v4373_v2 }
 0xc61   :  { %v4314_v28 = vadd.f32 %v4313_v3, %v4152_v57  ;;  %v4315_v40 = vpop.f32.mrb[246].mxu1  ;;  %v4390_v56 = vmax.bf16 %v8315_v37, %v4374_v14 }
 0xc62   :  { %v4316_v4 = vadd.f32 %v4315_v40, %v4157_v35  ;;  %v4317_v50 = vpop.f32.mrb[247].mxu1  ;;  %v4354_v44 = vadd.f32 %v7968_v13, %v4312_v60 }
 0xc63   :  { %v4318_v38 = vadd.f32 %v4317_v50, %v4157_v35  ;;  %4411 = vmatprep.subr.bf16.mxu1 %v4390_v56  ;;  %v4355_v20 = vadd.f32 %v7971_v41, %v4314_v28 }
 0xc64   :  { %v4356_v46 = vadd.f32 %v7974_v45, %v4316_v4  ;;  %4412 = vmatpush1.bf16.msra.mxu1 %v4389_v1 }
 0xc65   :  { %v4357_v6 = vadd.f32 %v7976_v33, %v4318_v38 }
 0xc66   :  { %v4375_v10 = vpack.c.bf16 %v4356_v46, %v4354_v44 }
 0xc67   :  { %v4376_v36 = vpack.c.bf16 %v4357_v6, %v4355_v20  ;;  %v4321_v0 = vpop.f32.mrb[248].mxu1 }
 0xc68   :  { %v4322_v23 = vadd.f32 %v4321_v0, %v4162_v26  ;;  %v4323_v55 = vpop.f32.mrb[249].mxu1  ;;  %v4391_v13 = vmax.bf16 %v8315_v37, %v4375_v10 }
 0xc69   :  { %v4324_v32 = vadd.f32 %v4323_v55, %v4162_v26  ;;  %v4325_v54 = vpop.f32.mrb[250].mxu1  ;;  %v4392_v25 = vmax.bf16 %v8315_v37, %v4376_v36 }
 0xc6a   :  { %v4326_v58 = vadd.f32 %v4325_v54, %v4167_v24  ;;  %v4327_v45 = vpop.f32.mrb[251].mxu1  ;;  %v4358_v41 = vadd.f32 %v7986_v52, %v4322_v23  ;;  %v4399_v52 = vpop.permute.xlu0 %4398 }
 0xc6b   :  { %v4328_v8 = vadd.f32 %v4327_v45, %v4167_v24  ;;  %4413 = vmatprep.subr.bf16.mxu1 %v4392_v25  ;;  %v4359_v61 = vadd.f32 %v7989_v5, %v4324_v32 }
 0xc6c   :  { %v4360_v33 = vadd.f32 %v7992_v34, %v4326_v58  ;;  %4414 = vmatpush1.bf16.msra.mxu1 %v4391_v13 }
 0xc6d   :  { %v4361_v18 = vadd.f32 %v7994_v27, %v4328_v8 }
 0xc6e   :  { %v4377_v53 = vpack.c.bf16 %v4360_v33, %v4358_v41 }
 0xc6f   :  { %v4378_v62 = vpack.c.bf16 %v4361_v18, %v4359_v61 }
 0xc70   :  { %v4393_v15 = vmax.bf16 %v8315_v37, %v4377_v53 }
 0xc71   :  { %v4394_v63 = vmax.bf16 %v8315_v37, %v4378_v62 }
 0xc73   :  { %4415 = vmatprep.subr.bf16.mxu1 %v4394_v63 }
 0xc74   :  { %4416 = vmatpush1.bf16.msra.mxu1 %v4393_v15 }
 0xc77   :  { %4434 = vmatmul.mubr.bf16.vlgmr.msra.gmra.mrb[252].mxu1 %v4362_v7 }
 0xd4a   :  { %v4435_v34 = vpop.f32.mrb[252].mxu1 }
 0xd4b   :  { %v4436_v51 = vadd.f32 %v4435_v34, %v4399_v52  ;;  %v4437_v9 = vpop.f32.mrb[253].mxu1 }
 0xd4c   :  { %v4438_v5 = vadd.f32 %v4437_v9, %v4399_v52  ;;  %v4439_v16 = vpop.f32.mrb[254].mxu1 }
 0xd4d   :  { %v4857_v27 = vmul.f32 -1.442695, %v4436_v51  ;;  %v4440_v31 = vpop.f32.mrb[255].mxu1 }
 0xd4e   :  { %v4858_v29 = vmul.f32 -1.442695, %v4438_v5 }
 0xd4f   :  { %5423 = vpow2.f32 %v4857_v27 }
 0xd50   :  { %5425 = vpow2.f32 %v4858_v29 }
 0xd59   :  { %v5424_v39 = vpop.eup %5423 }
 0xd5a   :  { %v5426_v37 = vpop.eup %5425  ;;  %v4448_v42 = vadd.f32 1.0, %v5424_v39 }
 0xd5b   :  { %v4449_v59 = vadd.f32 1.0, %v5426_v37 }
 0xd5c   :  { %5427 = vrcp.f32 %v4448_v42 }
 0xd5d   :  { %5429 = vrcp.f32 %v4449_v59 }
 0xd66   :  { %v5428_v49 = vpop.eup %5427 }
 0xd67   :  { %v5430_v43 = vpop.eup %5429 }
 0xd68   :  { %v4456_v12 = vcombine.low %v5428_v49, %v5430_v43 }
 0xd6a   :  { %4458 = vst [vmem:[#allocation2] sm:$0x77] %v4456_v12 }
 0xd6b   :  { %5442 = shalt.err (!%p5439_p4)
}
 0xd6c   :  { %s5443_s25 = scalar_lea.hbm %s8153_s8, 128 }
 0xd6d   :  { %p5444_p5 = scmp.ne.s32.totalorder %s8153_s8, %s5443_s25  ;;  %p5447_p6 = scmp.lt.u32.totalorder %s5443_s25, %s8153_s8 }
 0xd6f   :  { %p5449_p7 = pnand %p5447_p6, %p5444_p5 }
 0xd71   :  { %5452 = shalt.err (!%p5449_p7)
}
 0xd72   :  { %4468 = dma.vmem_to_hbm [thread:$0]  %s4466_s6, 128, %s8153_s8, [#allocation3]  }
 0xd73   :  { %5453 = dma.done.wait [#allocation3], 128  }
 0xd74   :  { %5454 = vsyncadd [#allocation3], 4294967168 }
 0xd75   :  { %4472 = vsyncpa [#allocation3], 1 }

</bundles_post_ra>
